<compile_context>
chip_gen: v7x
topology: tpu7x:2x2x1
jax: 0.10.0
libtpu: 0.0.40
codegen_flags: <defaults>
</compile_context>

<pallas_src>
import functools
import math

import jax
import jax.numpy as jnp
from jax.experimental import pallas as pl
from jax.experimental.pallas import tpu as pltpu


def _round_up(x, m):
    return (x + m - 1) // m * m


def _hint_multiple(idx, m):
    """Alignment hint for dynamic starts; no-op on Python ints."""
    return idx if isinstance(idx, int) else pl.multiple_of(idx, m)


# ---------------------------------------------------------------------------
# Fused 2-layer GRU kernel over one time chunk.
# Activations are time-major and pre-flattened: row index = t * B_pad + b.
# PyTorch gate order (r, z, n); b_hh_n stays inside the r*(...) term.
# ---------------------------------------------------------------------------
def gru2_kernel(x_ref, w0i_ref, w0h_ref, b0i_ref, b0h_ref,
                w1c_ref, b1i_ref, b1h_ref,
                out_ref, gi0_ref, h_ref,
                *, n_batch, hidden, n_steps, unroll):
    B = n_batch
    H = hidden

    # Carried hidden state (layer0 rows [0:B], layer1 rows [B:2B]) lives in a
    # persistent VMEM scratch; zero it on the first chunk only.
    @pl.when(pl.program_id(0) == 0)
    def _init():
        h_ref[...] = jnp.zeros_like(h_ref)

    # ---- Hoisted layer-0 input projection: ONE big MXU matmul per chunk ----
    # (Tc*B, D) bf16 @ (D, 3H) bf16 -> f32, bias added once.
    gi0_ref[...] = (
        jnp.dot(x_ref[...], w0i_ref[...], preferred_element_type=jnp.float32)
        + b0i_ref[...]
    )

    # Small weights / biases held once; biases pre-broadcast outside the loop.
    w0h = w0h_ref[...]                                   # (H, 3H)  bf16
    w1c = w1c_ref[...]                                   # (H, 6H)  bf16
    b0h = jnp.broadcast_to(b0h_ref[...], (B, 3 * H))     # zeros except b_hh_n
    b1i = jnp.broadcast_to(b1i_ref[...], (B, 3 * H))
    b1h = jnp.broadcast_to(b1h_ref[...], (B, 3 * H))

    def gates(gi, gh, h_prev):
        r = jax.nn.sigmoid(gi[:, 0:H] + gh[:, 0:H])
        z = jax.nn.sigmoid(gi[:, H:2 * H] + gh[:, H:2 * H])
        n = jnp.tanh(gi[:, 2 * H:3 * H] + r * gh[:, 2 * H:3 * H])
        return (1.0 - z) * n + z * h_prev

    def step(t, carry):
        h0, h1 = carry
        row = _hint_multiple(t * B, B)

        # ----- layer 0: only the hidden matmul is on the sequential path ----
        gi0 = gi0_ref[pl.ds(row, B), :]                               # (B, 3H)
        gh0 = jnp.dot(h0.astype(jnp.bfloat16), w0h,
                      preferred_element_type=jnp.float32) + b0h
        h0 = gates(gi0, gh0, h0)

        # ----- layer 1: gi1 (from h0_t) and gh1 (from h1_prev) come from ----
        # ----- ONE stacked matmul: (2B, H) @ (H, 6H) -> (2B, 6H)         ----
        stacked = jnp.concatenate([h0, h1], axis=0).astype(jnp.bfloat16)
        g = jnp.dot(stacked, w1c, preferred_element_type=jnp.float32)
        gi1 = g[0:B, 0:3 * H] + b1i
        gh1 = g[B:2 * B, 3 * H:6 * H] + b1h
        h1 = gates(gi1, gh1, h1)

        out_ref[pl.ds(row, B), :] = h1.astype(out_ref.dtype)
        return (h0, h1)

    h_init = (h_ref[0:B, :], h_ref[B:2 * B, :])
    h0_f, h1_f = jax.lax.fori_loop(0, n_steps, step, h_init, unroll=unroll)

    # Carry hidden state into the next chunk.
    h_ref[0:B, :] = h0_f
    h_ref[B:2 * B, :] = h1_f


def _vmem_limit_bytes(tc, b_pad, d, h):
    """Explicit scoped-VMEM budget sized from the actual block sums."""
    bf16, f32 = 2, 4
    blocks = (
        2 * tc * b_pad * d * bf16                           # x chunk (2 bufs)
        + 2 * tc * b_pad * h * f32                          # out chunk (2 bufs)
        + tc * b_pad * 3 * h * f32                          # gi0 scratch
        + 2 * b_pad * h * f32                               # carried h
        + 2 * (d * 3 * h + h * 3 * h + h * 6 * h) * bf16    # weights (2 bufs)
        + 2 * 4 * 3 * h * f32                               # biases
    )
    # 2x headroom for compiler temporaries; clamp to a range safe on all chips
    # (v7x has only 64 MiB physical VMEM per TensorCore).
    return int(min(48 * 1024 * 1024, max(8 * 1024 * 1024, 2 * blocks)))


# ---------------------------------------------------------------------------
# Wrapper: pad B to the sublane multiple, time-major + bf16 cast + flatten in
# one XLA pass, chunked pallas_call, un-pad / re-layout the output.
# ---------------------------------------------------------------------------
def feat_aggregate(feats, params, *, time_chunk=8):
    """feats: (B, T, D) batch_first -> (B, T, H) GRU output sequence.

    For long sequences raise `time_chunk` (e.g. 32) so each chunk's hoisted
    projection matmul has >= 256 rows (v6e MXU fill/drain amortization).
    """
    B, T, D = feats.shape
    H = params["w0_hh_t"].shape[0]

    B_pad = _round_up(B, 8)                    # f32 sublane multiple
    Tc = min(time_chunk, _round_up(T, 8))      # chunk length (bounds VMEM)
    T_pad = _round_up(T, Tc)
    n_chunks = T_pad // Tc

    x = feats
    if B_pad != B or T_pad != T:
        x = jnp.pad(x, ((0, B_pad - B), (0, T_pad - T), (0, 0)))
    # One fused pass over the big tensor: transpose to time-major, cast to
    # bf16 (halves DMA bytes), flatten leading dims (free, row-major).
    x_flat = (jnp.transpose(x, (1, 0, 2))
              .astype(jnp.bfloat16)
              .reshape(T_pad * B_pad, D))

    unroll = True if Tc <= 32 else 8
    kernel = functools.partial(
        gru2_kernel, n_batch=B_pad, hidden=H, n_steps=Tc, unroll=unroll)

    out_flat = pl.pallas_call(
        kernel,
        out_shape=jax.ShapeDtypeStruct((T_pad * B_pad, H), jnp.float32),
        grid_spec=pltpu.PrefetchScalarGridSpec(
            num_scalar_prefetch=0,
            grid=(n_chunks,),
            in_specs=[
                pl.BlockSpec((Tc * B_pad, D), lambda i: (i, 0)),   # x chunk
                pl.BlockSpec((D, 3 * H), lambda i: (0, 0)),        # W0_ih^T
                pl.BlockSpec((H, 3 * H), lambda i: (0, 0)),        # W0_hh^T
                pl.BlockSpec((1, 3 * H), lambda i: (0, 0)),        # b0 input side
                pl.BlockSpec((1, 3 * H), lambda i: (0, 0)),        # b0 hidden n-pad
                pl.BlockSpec((H, 6 * H), lambda i: (0, 0)),        # [W1_ih^T|W1_hh^T]
                pl.BlockSpec((1, 3 * H), lambda i: (0, 0)),        # b1 input side
                pl.BlockSpec((1, 3 * H), lambda i: (0, 0)),        # b1 hidden n-pad
            ],
            out_specs=pl.BlockSpec((Tc * B_pad, H), lambda i: (i, 0)),
            scratch_shapes=[
                pltpu.VMEM((Tc * B_pad, 3 * H), jnp.float32),      # hoisted gi0
                pltpu.VMEM((2 * B_pad, H), jnp.float32),           # carried h0/h1
            ],
        ),
        compiler_params=pltpu.CompilerParams(
            dimension_semantics=("arbitrary",),                    # recurrence
            vmem_limit_bytes=_vmem_limit_bytes(Tc, B_pad, D, H),
        ),
    )(x_flat,
      params["w0_ih_t"], params["w0_hh_t"], params["b0_i"], params["b0_h"],
      params["w1_cat_t"], params["b1_i"], params["b1_h"])

    out = out_flat.reshape(T_pad, B_pad, H).transpose(1, 0, 2)
    return out[:B, :T]


# ---------------------------------------------------------------------------
# Parameter construction (PyTorch GRU default init: U(-1/sqrt(H), 1/sqrt(H))).
# Biases pre-combined; weights pre-transposed, bf16 (MXU operands); layer 1's
# W_ih/W_hh concatenated for the single stacked per-step matmul.
# ---------------------------------------------------------------------------
def init_feat_aggregate_params(key, input_size=1024, hidden_size=128):
    H = hidden_size
    k = 1.0 / math.sqrt(H)

    def layer(key, d_in):
        k1, k2, k3, k4 = jax.random.split(key, 4)
        w_ih = jax.random.uniform(k1, (3 * H, d_in), jnp.float32, -k, k)
        w_hh = jax.random.uniform(k2, (3 * H, H), jnp.float32, -k, k)
        b_ih = jax.random.uniform(k3, (3 * H,), jnp.float32, -k, k)
        b_hh = jax.random.uniform(k4, (3 * H,), jnp.float32, -k, k)
        # r/z gates: fold b_hh into the input-side bias (added to gi).
        # n gate: b_hh_n must stay inside r*(W_hn h + b_hn) -> padded hidden bias.
        b_i = b_ih.at[:2 * H].add(b_hh[:2 * H])
        b_h = jnp.concatenate([jnp.zeros((2 * H,), jnp.float32), b_hh[2 * H:]])
        return w_ih, w_hh, b_i, b_h

    key, k0, k1l = jax.random.split(key, 3)
    w0_ih, w0_hh, b0_i, b0_h = layer(k0, input_size)
    w1_ih, w1_hh, b1_i, b1_h = layer(k1l, H)

    params = {
        "w0_ih_t": w0_ih.T.astype(jnp.bfloat16),                     # (D, 3H)
        "w0_hh_t": w0_hh.T.astype(jnp.bfloat16),                     # (H, 3H)
        "b0_i": b0_i.reshape(1, -1),
        "b0_h": b0_h.reshape(1, -1),
        "w1_cat_t": jnp.concatenate([w1_ih.T, w1_hh.T],
                                    axis=1).astype(jnp.bfloat16),    # (H, 6H)
        "b1_i": b1_i.reshape(1, -1),
        "b1_h": b1_h.reshape(1, -1),
    }
    return params


# ---------------------------------------------------------------------------
# Pure-JAX reference (same bf16-stored weights, f32 math) for validation.
# ---------------------------------------------------------------------------
def gru2_reference(feats, params):
    B, T, _ = feats.shape
    H = params["w0_hh_t"].shape[0]
    w0_ih = params["w0_ih_t"].astype(jnp.float32)
    w0_hh = params["w0_hh_t"].astype(jnp.float32)
    w1_cat = params["w1_cat_t"].astype(jnp.float32)
    w1_ih, w1_hh = w1_cat[:, :3 * H], w1_cat[:, 3 * H:]

    def cell(h, gi, gh):
        r = jax.nn.sigmoid(gi[:, :H] + gh[:, :H])
        z = jax.nn.sigmoid(gi[:, H:2 * H] + gh[:, H:2 * H])
        n = jnp.tanh(gi[:, 2 * H:] + r * gh[:, 2 * H:])
        return (1.0 - z) * n + z * h

    h0 = jnp.zeros((B, H), jnp.float32)
    h1 = jnp.zeros((B, H), jnp.float32)
    outs = []
    for t in range(T):
        gi0 = feats[:, t, :] @ w0_ih + params["b0_i"]
        gh0 = h0 @ w0_hh + params["b0_h"]
        h0 = cell(h0, gi0, gh0)
        gi1 = h0 @ w1_ih + params["b1_i"]
        gh1 = h1 @ w1_hh + params["b1_h"]
        h1 = cell(h1, gi1, gh1)
        outs.append(h1)
    return jnp.stack(outs, axis=1)


if __name__ == "__main__":
    B, T = 4, 16                       # small demo; T=16 exercises 2 chunks
    INPUT_SIZE, HIDDEN = 1024, 128     # module defaults

    params = init_feat_aggregate_params(
        jax.random.PRNGKey(0), input_size=INPUT_SIZE, hidden_size=HIDDEN)

    feats = jax.random.normal(jax.random.PRNGKey(0), (B, T, INPUT_SIZE),
                              jnp.float32)

    fwd = jax.jit(feat_aggregate)
    out = fwd(feats, params)
    jax.block_until_ready(out)

    assert out.shape == (B, T, HIDDEN)
    assert bool(jnp.all(jnp.isfinite(out)))

    # Loose tolerance: kernel casts matmul activations to bf16 (f32 accumulate).
    ref = gru2_reference(feats, params)
    max_err = float(jnp.max(jnp.abs(out - ref)))
    assert max_err < 5e-2, f"max abs error {max_err}"

    print("KERNEL_OK")
</pallas_src>

<mosaic_0001>
module attributes {stable_mosaic.version = 11 : i64} {
  func.func @gru2_kernel(%arg0: i32, %arg1: memref<64x1024xbf16, #tpu.memory_space<vmem>>, %arg2: memref<1024x384xbf16, #tpu.memory_space<vmem>>, %arg3: memref<128x384xbf16, #tpu.memory_space<vmem>>, %arg4: memref<1x384xf32, #tpu.memory_space<vmem>>, %arg5: memref<1x384xf32, #tpu.memory_space<vmem>>, %arg6: memref<128x768xbf16, #tpu.memory_space<vmem>>, %arg7: memref<1x384xf32, #tpu.memory_space<vmem>>, %arg8: memref<1x384xf32, #tpu.memory_space<vmem>>, %arg9: memref<64x128xf32, #tpu.memory_space<vmem>>, %arg10: memref<64x384xf32, #tpu.memory_space<vmem>>, %arg11: memref<16x128xf32, #tpu.memory_space<vmem>>) attributes {dimension_semantics = [#tpu.dimension_semantics<arbitrary>], iteration_bounds = array<i64: 2>, scalar_prefetch = 0 : i64, scratch_operands = 2 : i64, tpu.core_type = #tpu.core_type<tc>, window_params = [{transform_indices = @transform_0, window_bounds = array<i64: 64, 1024>}, {pipeline_mode = #tpu.pipeline_mode<synchronous>, transform_indices = @transform_1, window_bounds = array<i64: 1024, 384>}, {pipeline_mode = #tpu.pipeline_mode<synchronous>, transform_indices = @transform_2, window_bounds = array<i64: 128, 384>}, {pipeline_mode = #tpu.pipeline_mode<synchronous>, transform_indices = @transform_3, window_bounds = array<i64: 1, 384>}, {pipeline_mode = #tpu.pipeline_mode<synchronous>, transform_indices = @transform_4, window_bounds = array<i64: 1, 384>}, {pipeline_mode = #tpu.pipeline_mode<synchronous>, transform_indices = @transform_5, window_bounds = array<i64: 128, 768>}, {pipeline_mode = #tpu.pipeline_mode<synchronous>, transform_indices = @transform_6, window_bounds = array<i64: 1, 384>}, {pipeline_mode = #tpu.pipeline_mode<synchronous>, transform_indices = @transform_7, window_bounds = array<i64: 1, 384>}, {transform_indices = @transform_8, window_bounds = array<i64: 64, 128>}]} {
    %c0_i32 = arith.constant 0 : i32
    %0 = arith.cmpi eq, %arg0, %c0_i32 : i32
    %1 = arith.extui %0 : i1 to i32
    %c0_i32_0 = arith.constant 0 : i32
    %2 = arith.cmpi ne, %1, %c0_i32_0 : i32
    scf.if %2 {
      %cst_114 = arith.constant 0.000000e+00 : f32
      %569 = vector.broadcast %cst_114 : f32 to vector<16x128xf32>
      %c0_115 = arith.constant 0 : index
      %c0_116 = arith.constant 0 : index
      %570 = vector.load %arg11[%c0_115, %c0_116] : memref<16x128xf32, #tpu.memory_space<vmem>>, vector<16x128xf32>
      tpu.vector_store %arg11[%c0_115, %c0_116], %569 {strides = array<i32>} : memref<16x128xf32, #tpu.memory_space<vmem>>, vector<16x128xf32>,
    } else {
    }
    %c0 = arith.constant 0 : index
    %c0_1 = arith.constant 0 : index
    %3 = vector.load %arg1[%c0, %c0_1] : memref<64x1024xbf16, #tpu.memory_space<vmem>>, vector<64x1024xbf16>
    %c0_2 = arith.constant 0 : index
    %c0_3 = arith.constant 0 : index
    %4 = vector.load %arg2[%c0_2, %c0_3] : memref<1024x384xbf16, #tpu.memory_space<vmem>>, vector<1024x384xbf16>
    %cst = arith.constant dense<0.000000e+00> : vector<64x384xf32>
    %5 = tpu.matmul %3, %4, %cst {dimension_numbers = #tpu.dot_dimension_numbers<[1], [0], [0], [1], [0, 0, 1, 1], [], []>} : vector<64x1024xbf16>, vector<1024x384xbf16>, vector<64x384xf32> -> vector<64x384xf32>
    %c0_4 = arith.constant 0 : index
    %c0_5 = arith.constant 0 : index
    %6 = vector.load %arg4[%c0_4, %c0_5] : memref<1x384xf32, #tpu.memory_space<vmem>>, vector<1x384xf32>
    %7 = vector.broadcast %6 : vector<1x384xf32> to vector<64x384xf32>
    %8 = arith.addf %5, %7 : vector<64x384xf32>
    %c0_6 = arith.constant 0 : index
    %c0_7 = arith.constant 0 : index
    %9 = vector.load %arg10[%c0_6, %c0_7] : memref<64x384xf32, #tpu.memory_space<vmem>>, vector<64x384xf32>
    tpu.vector_store %arg10[%c0_6, %c0_7], %8 {strides = array<i32>} : memref<64x384xf32, #tpu.memory_space<vmem>>, vector<64x384xf32>,
    %c0_8 = arith.constant 0 : index
    %c0_9 = arith.constant 0 : index
    %10 = vector.load %arg3[%c0_8, %c0_9] : memref<128x384xbf16, #tpu.memory_space<vmem>>, vector<128x384xbf16>
    %c0_10 = arith.constant 0 : index
    %c0_11 = arith.constant 0 : index
    %11 = vector.load %arg6[%c0_10, %c0_11] : memref<128x768xbf16, #tpu.memory_space<vmem>>, vector<128x768xbf16>
    %c0_12 = arith.constant 0 : index
    %c0_13 = arith.constant 0 : index
    %12 = vector.load %arg5[%c0_12, %c0_13] : memref<1x384xf32, #tpu.memory_space<vmem>>, vector<1x384xf32>
    %13 = vector.shape_cast %12 : vector<1x384xf32> to vector<1x384xf32>
    %14 = vector.broadcast %13 : vector<1x384xf32> to vector<8x384xf32>
    %c0_14 = arith.constant 0 : index
    %c0_15 = arith.constant 0 : index
    %15 = vector.load %arg7[%c0_14, %c0_15] : memref<1x384xf32, #tpu.memory_space<vmem>>, vector<1x384xf32>
    %16 = vector.shape_cast %15 : vector<1x384xf32> to vector<1x384xf32>
    %17 = vector.broadcast %16 : vector<1x384xf32> to vector<8x384xf32>
    %c0_16 = arith.constant 0 : index
    %c0_17 = arith.constant 0 : index
    %18 = vector.load %arg8[%c0_16, %c0_17] : memref<1x384xf32, #tpu.memory_space<vmem>>, vector<1x384xf32>
    %19 = vector.shape_cast %18 : vector<1x384xf32> to vector<1x384xf32>
    %20 = vector.broadcast %19 : vector<1x384xf32> to vector<8x384xf32>
    %c0_18 = arith.constant 0 : index
    %c0_19 = arith.constant 0 : index
    %21 = vector.load %arg11[%c0_18, %c0_19] : memref<16x128xf32, #tpu.memory_space<vmem>>, vector<8x128xf32>
    %c8 = arith.constant 8 : index
    %c0_20 = arith.constant 0 : index
    %22 = vector.load %arg11[%c8, %c0_20] : memref<16x128xf32, #tpu.memory_space<vmem>>, vector<8x128xf32>
    %c0_i32_21 = arith.constant 0 : i32
    %c8_i32 = arith.constant 8 : i32
    %23 = arith.muli %c0_i32_21, %c8_i32 : i32
    %24 = tpu.assume_multiple %23, 8 : i32
    %25 = arith.index_cast %24 : i32 to index
    %c0_22 = arith.constant 0 : index
    %26 = vector.load %arg10[%25, %c0_22] : memref<64x384xf32, #tpu.memory_space<vmem>>, vector<8x384xf32>
    %27 = arith.truncf %21 : vector<8x128xf32> to vector<8x128xbf16>
    %cst_23 = arith.constant dense<0.000000e+00> : vector<8x384xf32>
    %28 = tpu.matmul %27, %10, %cst_23 {dimension_numbers = #tpu.dot_dimension_numbers<[1], [0], [0], [1], [0, 0, 1, 1], [], []>} : vector<8x128xbf16>, vector<128x384xbf16>, vector<8x384xf32> -> vector<8x384xf32>
    %29 = arith.addf %28, %14 : vector<8x384xf32>
    %30 = vector.extract_strided_slice %26 {offsets = [0, 0], sizes = [8, 128], strides = [1, 1]} : vector<8x384xf32> to vector<8x128xf32>
    %31 = vector.extract_strided_slice %29 {offsets = [0, 0], sizes = [8, 128], strides = [1, 1]} : vector<8x384xf32> to vector<8x128xf32>
    %32 = arith.addf %30, %31 : vector<8x128xf32>
    %33 = arith.negf %32 : vector<8x128xf32>
    %34 = math.exp %33 : vector<8x128xf32>
    %cst_24 = arith.constant 1.000000e+00 : f32
    %35 = vector.broadcast %cst_24 : f32 to vector<8x128xf32>
    %36 = arith.addf %35, %34 : vector<8x128xf32>
    %37 = arith.divf %35, %36 : vector<8x128xf32>
    %38 = vector.extract_strided_slice %26 {offsets = [0, 128], sizes = [8, 128], strides = [1, 1]} : vector<8x384xf32> to vector<8x128xf32>
    %39 = vector.extract_strided_slice %29 {offsets = [0, 128], sizes = [8, 128], strides = [1, 1]} : vector<8x384xf32> to vector<8x128xf32>
    %40 = arith.addf %38, %39 : vector<8x128xf32>
    %41 = arith.negf %40 : vector<8x128xf32>
    %42 = math.exp %41 : vector<8x128xf32>
    %cst_25 = arith.constant 1.000000e+00 : f32
    %43 = vector.broadcast %cst_25 : f32 to vector<8x128xf32>
    %44 = arith.addf %43, %42 : vector<8x128xf32>
    %45 = arith.divf %43, %44 : vector<8x128xf32>
    %46 = vector.extract_strided_slice %26 {offsets = [0, 256], sizes = [8, 128], strides = [1, 1]} : vector<8x384xf32> to vector<8x128xf32>
    %47 = vector.extract_strided_slice %29 {offsets = [0, 256], sizes = [8, 128], strides = [1, 1]} : vector<8x384xf32> to vector<8x128xf32>
    %48 = arith.mulf %37, %47 : vector<8x128xf32>
    %49 = arith.addf %46, %48 : vector<8x128xf32>
    %50 = math.tanh %49 : vector<8x128xf32>
    %cst_26 = arith.constant 1.000000e+00 : f32
    %51 = vector.broadcast %cst_26 : f32 to vector<8x128xf32>
    %52 = arith.subf %51, %45 : vector<8x128xf32>
    %53 = arith.mulf %52, %50 : vector<8x128xf32>
    %54 = arith.mulf %45, %21 : vector<8x128xf32>
    %55 = arith.addf %53, %54 : vector<8x128xf32>
    %56 = tpu.concatenate %55, %22 in 0 : vector<8x128xf32>, vector<8x128xf32> -> vector<16x128xf32>
    %57 = arith.truncf %56 : vector<16x128xf32> to vector<16x128xbf16>
    %cst_27 = arith.constant dense<0.000000e+00> : vector<16x768xf32>
    %58 = tpu.matmul %57, %11, %cst_27 {dimension_numbers = #tpu.dot_dimension_numbers<[1], [0], [0], [1], [0, 0, 1, 1], [], []>} : vector<16x128xbf16>, vector<128x768xbf16>, vector<16x768xf32> -> vector<16x768xf32>
    %59 = vector.extract_strided_slice %58 {offsets = [0, 0], sizes = [8, 384], strides = [1, 1]} : vector<16x768xf32> to vector<8x384xf32>
    %60 = arith.addf %59, %17 : vector<8x384xf32>
    %61 = vector.extract_strided_slice %58 {offsets = [8, 384], sizes = [8, 384], strides = [1, 1]} : vector<16x768xf32> to vector<8x384xf32>
    %62 = arith.addf %61, %20 : vector<8x384xf32>
    %63 = vector.extract_strided_slice %60 {offsets = [0, 0], sizes = [8, 128], strides = [1, 1]} : vector<8x384xf32> to vector<8x128xf32>
    %64 = vector.extract_strided_slice %62 {offsets = [0, 0], sizes = [8, 128], strides = [1, 1]} : vector<8x384xf32> to vector<8x128xf32>
    %65 = arith.addf %63, %64 : vector<8x128xf32>
    %66 = arith.negf %65 : vector<8x128xf32>
    %67 = math.exp %66 : vector<8x128xf32>
    %cst_28 = arith.constant 1.000000e+00 : f32
    %68 = vector.broadcast %cst_28 : f32 to vector<8x128xf32>
    %69 = arith.addf %68, %67 : vector<8x128xf32>
    %70 = arith.divf %68, %69 : vector<8x128xf32>
    %71 = vector.extract_strided_slice %60 {offsets = [0, 128], sizes = [8, 128], strides = [1, 1]} : vector<8x384xf32> to vector<8x128xf32>
    %72 = vector.extract_strided_slice %62 {offsets = [0, 128], sizes = [8, 128], strides = [1, 1]} : vector<8x384xf32> to vector<8x128xf32>
    %73 = arith.addf %71, %72 : vector<8x128xf32>
    %74 = arith.negf %73 : vector<8x128xf32>
    %75 = math.exp %74 : vector<8x128xf32>
    %cst_29 = arith.constant 1.000000e+00 : f32
    %76 = vector.broadcast %cst_29 : f32 to vector<8x128xf32>
    %77 = arith.addf %76, %75 : vector<8x128xf32>
    %78 = arith.divf %76, %77 : vector<8x128xf32>
    %79 = vector.extract_strided_slice %60 {offsets = [0, 256], sizes = [8, 128], strides = [1, 1]} : vector<8x384xf32> to vector<8x128xf32>
    %80 = vector.extract_strided_slice %62 {offsets = [0, 256], sizes = [8, 128], strides = [1, 1]} : vector<8x384xf32> to vector<8x128xf32>
    %81 = arith.mulf %70, %80 : vector<8x128xf32>
    %82 = arith.addf %79, %81 : vector<8x128xf32>
    %83 = math.tanh %82 : vector<8x128xf32>
    %cst_30 = arith.constant 1.000000e+00 : f32
    %84 = vector.broadcast %cst_30 : f32 to vector<8x128xf32>
    %85 = arith.subf %84, %78 : vector<8x128xf32>
    %86 = arith.mulf %85, %83 : vector<8x128xf32>
    %87 = arith.mulf %78, %22 : vector<8x128xf32>
    %88 = arith.addf %86, %87 : vector<8x128xf32>
    %89 = arith.index_cast %24 : i32 to index
    %c0_31 = arith.constant 0 : index
    %90 = vector.load %arg9[%89, %c0_31] : memref<64x128xf32, #tpu.memory_space<vmem>>, vector<8x128xf32>
    tpu.vector_store %arg9[%89, %c0_31], %88 {strides = array<i32>} : memref<64x128xf32, #tpu.memory_space<vmem>>, vector<8x128xf32>,
    %c1_i32 = arith.constant 1 : i32
    %c8_i32_32 = arith.constant 8 : i32
    %91 = arith.muli %c1_i32, %c8_i32_32 : i32
    %92 = tpu.assume_multiple %91, 8 : i32
    %93 = arith.index_cast %92 : i32 to index
    %c0_33 = arith.constant 0 : index
    %94 = vector.load %arg10[%93, %c0_33] : memref<64x384xf32, #tpu.memory_space<vmem>>, vector<8x384xf32>
    %95 = arith.truncf %55 : vector<8x128xf32> to vector<8x128xbf16>
    %cst_34 = arith.constant dense<0.000000e+00> : vector<8x384xf32>
    %96 = tpu.matmul %95, %10, %cst_34 {dimension_numbers = #tpu.dot_dimension_numbers<[1], [0], [0], [1], [0, 0, 1, 1], [], []>} : vector<8x128xbf16>, vector<128x384xbf16>, vector<8x384xf32> -> vector<8x384xf32>
    %97 = arith.addf %96, %14 : vector<8x384xf32>
    %98 = vector.extract_strided_slice %94 {offsets = [0, 0], sizes = [8, 128], strides = [1, 1]} : vector<8x384xf32> to vector<8x128xf32>
    %99 = vector.extract_strided_slice %97 {offsets = [0, 0], sizes = [8, 128], strides = [1, 1]} : vector<8x384xf32> to vector<8x128xf32>
    %100 = arith.addf %98, %99 : vector<8x128xf32>
    %101 = arith.negf %100 : vector<8x128xf32>
    %102 = math.exp %101 : vector<8x128xf32>
    %cst_35 = arith.constant 1.000000e+00 : f32
    %103 = vector.broadcast %cst_35 : f32 to vector<8x128xf32>
    %104 = arith.addf %103, %102 : vector<8x128xf32>
    %105 = arith.divf %103, %104 : vector<8x128xf32>
    %106 = vector.extract_strided_slice %94 {offsets = [0, 128], sizes = [8, 128], strides = [1, 1]} : vector<8x384xf32> to vector<8x128xf32>
    %107 = vector.extract_strided_slice %97 {offsets = [0, 128], sizes = [8, 128], strides = [1, 1]} : vector<8x384xf32> to vector<8x128xf32>
    %108 = arith.addf %106, %107 : vector<8x128xf32>
    %109 = arith.negf %108 : vector<8x128xf32>
    %110 = math.exp %109 : vector<8x128xf32>
    %cst_36 = arith.constant 1.000000e+00 : f32
    %111 = vector.broadcast %cst_36 : f32 to vector<8x128xf32>
    %112 = arith.addf %111, %110 : vector<8x128xf32>
    %113 = arith.divf %111, %112 : vector<8x128xf32>
    %114 = vector.extract_strided_slice %94 {offsets = [0, 256], sizes = [8, 128], strides = [1, 1]} : vector<8x384xf32> to vector<8x128xf32>
    %115 = vector.extract_strided_slice %97 {offsets = [0, 256], sizes = [8, 128], strides = [1, 1]} : vector<8x384xf32> to vector<8x128xf32>
    %116 = arith.mulf %105, %115 : vector<8x128xf32>
    %117 = arith.addf %114, %116 : vector<8x128xf32>
    %118 = math.tanh %117 : vector<8x128xf32>
    %cst_37 = arith.constant 1.000000e+00 : f32
    %119 = vector.broadcast %cst_37 : f32 to vector<8x128xf32>
    %120 = arith.subf %119, %113 : vector<8x128xf32>
    %121 = arith.mulf %120, %118 : vector<8x128xf32>
    %122 = arith.mulf %113, %55 : vector<8x128xf32>
    %123 = arith.addf %121, %122 : vector<8x128xf32>
    %124 = tpu.concatenate %123, %88 in 0 : vector<8x128xf32>, vector<8x128xf32> -> vector<16x128xf32>
    %125 = arith.truncf %124 : vector<16x128xf32> to vector<16x128xbf16>
    %cst_38 = arith.constant dense<0.000000e+00> : vector<16x768xf32>
    %126 = tpu.matmul %125, %11, %cst_38 {dimension_numbers = #tpu.dot_dimension_numbers<[1], [0], [0], [1], [0, 0, 1, 1], [], []>} : vector<16x128xbf16>, vector<128x768xbf16>, vector<16x768xf32> -> vector<16x768xf32>
    %127 = vector.extract_strided_slice %126 {offsets = [0, 0], sizes = [8, 384], strides = [1, 1]} : vector<16x768xf32> to vector<8x384xf32>
    %128 = arith.addf %127, %17 : vector<8x384xf32>
    %129 = vector.extract_strided_slice %126 {offsets = [8, 384], sizes = [8, 384], strides = [1, 1]} : vector<16x768xf32> to vector<8x384xf32>
    %130 = arith.addf %129, %20 : vector<8x384xf32>
    %131 = vector.extract_strided_slice %128 {offsets = [0, 0], sizes = [8, 128], strides = [1, 1]} : vector<8x384xf32> to vector<8x128xf32>
    %132 = vector.extract_strided_slice %130 {offsets = [0, 0], sizes = [8, 128], strides = [1, 1]} : vector<8x384xf32> to vector<8x128xf32>
    %133 = arith.addf %131, %132 : vector<8x128xf32>
    %134 = arith.negf %133 : vector<8x128xf32>
    %135 = math.exp %134 : vector<8x128xf32>
    %cst_39 = arith.constant 1.000000e+00 : f32
    %136 = vector.broadcast %cst_39 : f32 to vector<8x128xf32>
    %137 = arith.addf %136, %135 : vector<8x128xf32>
    %138 = arith.divf %136, %137 : vector<8x128xf32>
    %139 = vector.extract_strided_slice %128 {offsets = [0, 128], sizes = [8, 128], strides = [1, 1]} : vector<8x384xf32> to vector<8x128xf32>
    %140 = vector.extract_strided_slice %130 {offsets = [0, 128], sizes = [8, 128], strides = [1, 1]} : vector<8x384xf32> to vector<8x128xf32>
    %141 = arith.addf %139, %140 : vector<8x128xf32>
    %142 = arith.negf %141 : vector<8x128xf32>
    %143 = math.exp %142 : vector<8x128xf32>
    %cst_40 = arith.constant 1.000000e+00 : f32
    %144 = vector.broadcast %cst_40 : f32 to vector<8x128xf32>
    %145 = arith.addf %144, %143 : vector<8x128xf32>
    %146 = arith.divf %144, %145 : vector<8x128xf32>
    %147 = vector.extract_strided_slice %128 {offsets = [0, 256], sizes = [8, 128], strides = [1, 1]} : vector<8x384xf32> to vector<8x128xf32>
    %148 = vector.extract_strided_slice %130 {offsets = [0, 256], sizes = [8, 128], strides = [1, 1]} : vector<8x384xf32> to vector<8x128xf32>
    %149 = arith.mulf %138, %148 : vector<8x128xf32>
    %150 = arith.addf %147, %149 : vector<8x128xf32>
    %151 = math.tanh %150 : vector<8x128xf32>
    %cst_41 = arith.constant 1.000000e+00 : f32
    %152 = vector.broadcast %cst_41 : f32 to vector<8x128xf32>
    %153 = arith.subf %152, %146 : vector<8x128xf32>
    %154 = arith.mulf %153, %151 : vector<8x128xf32>
    %155 = arith.mulf %146, %88 : vector<8x128xf32>
    %156 = arith.addf %154, %155 : vector<8x128xf32>
    %157 = arith.index_cast %92 : i32 to index
    %c0_42 = arith.constant 0 : index
    %158 = vector.load %arg9[%157, %c0_42] : memref<64x128xf32, #tpu.memory_space<vmem>>, vector<8x128xf32>
    tpu.vector_store %arg9[%157, %c0_42], %156 {strides = array<i32>} : memref<64x128xf32, #tpu.memory_space<vmem>>, vector<8x128xf32>,
    %c2_i32 = arith.constant 2 : i32
    %c8_i32_43 = arith.constant 8 : i32
    %159 = arith.muli %c2_i32, %c8_i32_43 : i32
    %160 = tpu.assume_multiple %159, 8 : i32
    %161 = arith.index_cast %160 : i32 to index
    %c0_44 = arith.constant 0 : index
    %162 = vector.load %arg10[%161, %c0_44] : memref<64x384xf32, #tpu.memory_space<vmem>>, vector<8x384xf32>
    %163 = arith.truncf %123 : vector<8x128xf32> to vector<8x128xbf16>
    %cst_45 = arith.constant dense<0.000000e+00> : vector<8x384xf32>
    %164 = tpu.matmul %163, %10, %cst_45 {dimension_numbers = #tpu.dot_dimension_numbers<[1], [0], [0], [1], [0, 0, 1, 1], [], []>} : vector<8x128xbf16>, vector<128x384xbf16>, vector<8x384xf32> -> vector<8x384xf32>
    %165 = arith.addf %164, %14 : vector<8x384xf32>
    %166 = vector.extract_strided_slice %162 {offsets = [0, 0], sizes = [8, 128], strides = [1, 1]} : vector<8x384xf32> to vector<8x128xf32>
    %167 = vector.extract_strided_slice %165 {offsets = [0, 0], sizes = [8, 128], strides = [1, 1]} : vector<8x384xf32> to vector<8x128xf32>
    %168 = arith.addf %166, %167 : vector<8x128xf32>
    %169 = arith.negf %168 : vector<8x128xf32>
    %170 = math.exp %169 : vector<8x128xf32>
    %cst_46 = arith.constant 1.000000e+00 : f32
    %171 = vector.broadcast %cst_46 : f32 to vector<8x128xf32>
    %172 = arith.addf %171, %170 : vector<8x128xf32>
    %173 = arith.divf %171, %172 : vector<8x128xf32>
    %174 = vector.extract_strided_slice %162 {offsets = [0, 128], sizes = [8, 128], strides = [1, 1]} : vector<8x384xf32> to vector<8x128xf32>
    %175 = vector.extract_strided_slice %165 {offsets = [0, 128], sizes = [8, 128], strides = [1, 1]} : vector<8x384xf32> to vector<8x128xf32>
    %176 = arith.addf %174, %175 : vector<8x128xf32>
    %177 = arith.negf %176 : vector<8x128xf32>
    %178 = math.exp %177 : vector<8x128xf32>
    %cst_47 = arith.constant 1.000000e+00 : f32
    %179 = vector.broadcast %cst_47 : f32 to vector<8x128xf32>
    %180 = arith.addf %179, %178 : vector<8x128xf32>
    %181 = arith.divf %179, %180 : vector<8x128xf32>
    %182 = vector.extract_strided_slice %162 {offsets = [0, 256], sizes = [8, 128], strides = [1, 1]} : vector<8x384xf32> to vector<8x128xf32>
    %183 = vector.extract_strided_slice %165 {offsets = [0, 256], sizes = [8, 128], strides = [1, 1]} : vector<8x384xf32> to vector<8x128xf32>
    %184 = arith.mulf %173, %183 : vector<8x128xf32>
    %185 = arith.addf %182, %184 : vector<8x128xf32>
    %186 = math.tanh %185 : vector<8x128xf32>
    %cst_48 = arith.constant 1.000000e+00 : f32
    %187 = vector.broadcast %cst_48 : f32 to vector<8x128xf32>
    %188 = arith.subf %187, %181 : vector<8x128xf32>
    %189 = arith.mulf %188, %186 : vector<8x128xf32>
    %190 = arith.mulf %181, %123 : vector<8x128xf32>
    %191 = arith.addf %189, %190 : vector<8x128xf32>
    %192 = tpu.concatenate %191, %156 in 0 : vector<8x128xf32>, vector<8x128xf32> -> vector<16x128xf32>
    %193 = arith.truncf %192 : vector<16x128xf32> to vector<16x128xbf16>
    %cst_49 = arith.constant dense<0.000000e+00> : vector<16x768xf32>
    %194 = tpu.matmul %193, %11, %cst_49 {dimension_numbers = #tpu.dot_dimension_numbers<[1], [0], [0], [1], [0, 0, 1, 1], [], []>} : vector<16x128xbf16>, vector<128x768xbf16>, vector<16x768xf32> -> vector<16x768xf32>
    %195 = vector.extract_strided_slice %194 {offsets = [0, 0], sizes = [8, 384], strides = [1, 1]} : vector<16x768xf32> to vector<8x384xf32>
    %196 = arith.addf %195, %17 : vector<8x384xf32>
    %197 = vector.extract_strided_slice %194 {offsets = [8, 384], sizes = [8, 384], strides = [1, 1]} : vector<16x768xf32> to vector<8x384xf32>
    %198 = arith.addf %197, %20 : vector<8x384xf32>
    %199 = vector.extract_strided_slice %196 {offsets = [0, 0], sizes = [8, 128], strides = [1, 1]} : vector<8x384xf32> to vector<8x128xf32>
    %200 = vector.extract_strided_slice %198 {offsets = [0, 0], sizes = [8, 128], strides = [1, 1]} : vector<8x384xf32> to vector<8x128xf32>
    %201 = arith.addf %199, %200 : vector<8x128xf32>
    %202 = arith.negf %201 : vector<8x128xf32>
    %203 = math.exp %202 : vector<8x128xf32>
    %cst_50 = arith.constant 1.000000e+00 : f32
    %204 = vector.broadcast %cst_50 : f32 to vector<8x128xf32>
    %205 = arith.addf %204, %203 : vector<8x128xf32>
    %206 = arith.divf %204, %205 : vector<8x128xf32>
    %207 = vector.extract_strided_slice %196 {offsets = [0, 128], sizes = [8, 128], strides = [1, 1]} : vector<8x384xf32> to vector<8x128xf32>
    %208 = vector.extract_strided_slice %198 {offsets = [0, 128], sizes = [8, 128], strides = [1, 1]} : vector<8x384xf32> to vector<8x128xf32>
    %209 = arith.addf %207, %208 : vector<8x128xf32>
    %210 = arith.negf %209 : vector<8x128xf32>
    %211 = math.exp %210 : vector<8x128xf32>
    %cst_51 = arith.constant 1.000000e+00 : f32
    %212 = vector.broadcast %cst_51 : f32 to vector<8x128xf32>
    %213 = arith.addf %212, %211 : vector<8x128xf32>
    %214 = arith.divf %212, %213 : vector<8x128xf32>
    %215 = vector.extract_strided_slice %196 {offsets = [0, 256], sizes = [8, 128], strides = [1, 1]} : vector<8x384xf32> to vector<8x128xf32>
    %216 = vector.extract_strided_slice %198 {offsets = [0, 256], sizes = [8, 128], strides = [1, 1]} : vector<8x384xf32> to vector<8x128xf32>
    %217 = arith.mulf %206, %216 : vector<8x128xf32>
    %218 = arith.addf %215, %217 : vector<8x128xf32>
    %219 = math.tanh %218 : vector<8x128xf32>
    %cst_52 = arith.constant 1.000000e+00 : f32
    %220 = vector.broadcast %cst_52 : f32 to vector<8x128xf32>
    %221 = arith.subf %220, %214 : vector<8x128xf32>
    %222 = arith.mulf %221, %219 : vector<8x128xf32>
    %223 = arith.mulf %214, %156 : vector<8x128xf32>
    %224 = arith.addf %222, %223 : vector<8x128xf32>
    %225 = arith.index_cast %160 : i32 to index
    %c0_53 = arith.constant 0 : index
    %226 = vector.load %arg9[%225, %c0_53] : memref<64x128xf32, #tpu.memory_space<vmem>>, vector<8x128xf32>
    tpu.vector_store %arg9[%225, %c0_53], %224 {strides = array<i32>} : memref<64x128xf32, #tpu.memory_space<vmem>>, vector<8x128xf32>,
    %c3_i32 = arith.constant 3 : i32
    %c8_i32_54 = arith.constant 8 : i32
    %227 = arith.muli %c3_i32, %c8_i32_54 : i32
    %228 = tpu.assume_multiple %227, 8 : i32
    %229 = arith.index_cast %228 : i32 to index
    %c0_55 = arith.constant 0 : index
    %230 = vector.load %arg10[%229, %c0_55] : memref<64x384xf32, #tpu.memory_space<vmem>>, vector<8x384xf32>
    %231 = arith.truncf %191 : vector<8x128xf32> to vector<8x128xbf16>
    %cst_56 = arith.constant dense<0.000000e+00> : vector<8x384xf32>
    %232 = tpu.matmul %231, %10, %cst_56 {dimension_numbers = #tpu.dot_dimension_numbers<[1], [0], [0], [1], [0, 0, 1, 1], [], []>} : vector<8x128xbf16>, vector<128x384xbf16>, vector<8x384xf32> -> vector<8x384xf32>
    %233 = arith.addf %232, %14 : vector<8x384xf32>
    %234 = vector.extract_strided_slice %230 {offsets = [0, 0], sizes = [8, 128], strides = [1, 1]} : vector<8x384xf32> to vector<8x128xf32>
    %235 = vector.extract_strided_slice %233 {offsets = [0, 0], sizes = [8, 128], strides = [1, 1]} : vector<8x384xf32> to vector<8x128xf32>
    %236 = arith.addf %234, %235 : vector<8x128xf32>
    %237 = arith.negf %236 : vector<8x128xf32>
    %238 = math.exp %237 : vector<8x128xf32>
    %cst_57 = arith.constant 1.000000e+00 : f32
    %239 = vector.broadcast %cst_57 : f32 to vector<8x128xf32>
    %240 = arith.addf %239, %238 : vector<8x128xf32>
    %241 = arith.divf %239, %240 : vector<8x128xf32>
    %242 = vector.extract_strided_slice %230 {offsets = [0, 128], sizes = [8, 128], strides = [1, 1]} : vector<8x384xf32> to vector<8x128xf32>
    %243 = vector.extract_strided_slice %233 {offsets = [0, 128], sizes = [8, 128], strides = [1, 1]} : vector<8x384xf32> to vector<8x128xf32>
    %244 = arith.addf %242, %243 : vector<8x128xf32>
    %245 = arith.negf %244 : vector<8x128xf32>
    %246 = math.exp %245 : vector<8x128xf32>
    %cst_58 = arith.constant 1.000000e+00 : f32
    %247 = vector.broadcast %cst_58 : f32 to vector<8x128xf32>
    %248 = arith.addf %247, %246 : vector<8x128xf32>
    %249 = arith.divf %247, %248 : vector<8x128xf32>
    %250 = vector.extract_strided_slice %230 {offsets = [0, 256], sizes = [8, 128], strides = [1, 1]} : vector<8x384xf32> to vector<8x128xf32>
    %251 = vector.extract_strided_slice %233 {offsets = [0, 256], sizes = [8, 128], strides = [1, 1]} : vector<8x384xf32> to vector<8x128xf32>
    %252 = arith.mulf %241, %251 : vector<8x128xf32>
    %253 = arith.addf %250, %252 : vector<8x128xf32>
    %254 = math.tanh %253 : vector<8x128xf32>
    %cst_59 = arith.constant 1.000000e+00 : f32
    %255 = vector.broadcast %cst_59 : f32 to vector<8x128xf32>
    %256 = arith.subf %255, %249 : vector<8x128xf32>
    %257 = arith.mulf %256, %254 : vector<8x128xf32>
    %258 = arith.mulf %249, %191 : vector<8x128xf32>
    %259 = arith.addf %257, %258 : vector<8x128xf32>
    %260 = tpu.concatenate %259, %224 in 0 : vector<8x128xf32>, vector<8x128xf32> -> vector<16x128xf32>
    %261 = arith.truncf %260 : vector<16x128xf32> to vector<16x128xbf16>
    %cst_60 = arith.constant dense<0.000000e+00> : vector<16x768xf32>
    %262 = tpu.matmul %261, %11, %cst_60 {dimension_numbers = #tpu.dot_dimension_numbers<[1], [0], [0], [1], [0, 0, 1, 1], [], []>} : vector<16x128xbf16>, vector<128x768xbf16>, vector<16x768xf32> -> vector<16x768xf32>
    %263 = vector.extract_strided_slice %262 {offsets = [0, 0], sizes = [8, 384], strides = [1, 1]} : vector<16x768xf32> to vector<8x384xf32>
    %264 = arith.addf %263, %17 : vector<8x384xf32>
    %265 = vector.extract_strided_slice %262 {offsets = [8, 384], sizes = [8, 384], strides = [1, 1]} : vector<16x768xf32> to vector<8x384xf32>
    %266 = arith.addf %265, %20 : vector<8x384xf32>
    %267 = vector.extract_strided_slice %264 {offsets = [0, 0], sizes = [8, 128], strides = [1, 1]} : vector<8x384xf32> to vector<8x128xf32>
    %268 = vector.extract_strided_slice %266 {offsets = [0, 0], sizes = [8, 128], strides = [1, 1]} : vector<8x384xf32> to vector<8x128xf32>
    %269 = arith.addf %267, %268 : vector<8x128xf32>
    %270 = arith.negf %269 : vector<8x128xf32>
    %271 = math.exp %270 : vector<8x128xf32>
    %cst_61 = arith.constant 1.000000e+00 : f32
    %272 = vector.broadcast %cst_61 : f32 to vector<8x128xf32>
    %273 = arith.addf %272, %271 : vector<8x128xf32>
    %274 = arith.divf %272, %273 : vector<8x128xf32>
    %275 = vector.extract_strided_slice %264 {offsets = [0, 128], sizes = [8, 128], strides = [1, 1]} : vector<8x384xf32> to vector<8x128xf32>
    %276 = vector.extract_strided_slice %266 {offsets = [0, 128], sizes = [8, 128], strides = [1, 1]} : vector<8x384xf32> to vector<8x128xf32>
    %277 = arith.addf %275, %276 : vector<8x128xf32>
    %278 = arith.negf %277 : vector<8x128xf32>
    %279 = math.exp %278 : vector<8x128xf32>
    %cst_62 = arith.constant 1.000000e+00 : f32
    %280 = vector.broadcast %cst_62 : f32 to vector<8x128xf32>
    %281 = arith.addf %280, %279 : vector<8x128xf32>
    %282 = arith.divf %280, %281 : vector<8x128xf32>
    %283 = vector.extract_strided_slice %264 {offsets = [0, 256], sizes = [8, 128], strides = [1, 1]} : vector<8x384xf32> to vector<8x128xf32>
    %284 = vector.extract_strided_slice %266 {offsets = [0, 256], sizes = [8, 128], strides = [1, 1]} : vector<8x384xf32> to vector<8x128xf32>
    %285 = arith.mulf %274, %284 : vector<8x128xf32>
    %286 = arith.addf %283, %285 : vector<8x128xf32>
    %287 = math.tanh %286 : vector<8x128xf32>
    %cst_63 = arith.constant 1.000000e+00 : f32
    %288 = vector.broadcast %cst_63 : f32 to vector<8x128xf32>
    %289 = arith.subf %288, %282 : vector<8x128xf32>
    %290 = arith.mulf %289, %287 : vector<8x128xf32>
    %291 = arith.mulf %282, %224 : vector<8x128xf32>
    %292 = arith.addf %290, %291 : vector<8x128xf32>
    %293 = arith.index_cast %228 : i32 to index
    %c0_64 = arith.constant 0 : index
    %294 = vector.load %arg9[%293, %c0_64] : memref<64x128xf32, #tpu.memory_space<vmem>>, vector<8x128xf32>
    tpu.vector_store %arg9[%293, %c0_64], %292 {strides = array<i32>} : memref<64x128xf32, #tpu.memory_space<vmem>>, vector<8x128xf32>,
    %c4_i32 = arith.constant 4 : i32
    %c8_i32_65 = arith.constant 8 : i32
    %295 = arith.muli %c4_i32, %c8_i32_65 : i32
    %296 = tpu.assume_multiple %295, 8 : i32
    %297 = arith.index_cast %296 : i32 to index
    %c0_66 = arith.constant 0 : index
    %298 = vector.load %arg10[%297, %c0_66] : memref<64x384xf32, #tpu.memory_space<vmem>>, vector<8x384xf32>
    %299 = arith.truncf %259 : vector<8x128xf32> to vector<8x128xbf16>
    %cst_67 = arith.constant dense<0.000000e+00> : vector<8x384xf32>
    %300 = tpu.matmul %299, %10, %cst_67 {dimension_numbers = #tpu.dot_dimension_numbers<[1], [0], [0], [1], [0, 0, 1, 1], [], []>} : vector<8x128xbf16>, vector<128x384xbf16>, vector<8x384xf32> -> vector<8x384xf32>
    %301 = arith.addf %300, %14 : vector<8x384xf32>
    %302 = vector.extract_strided_slice %298 {offsets = [0, 0], sizes = [8, 128], strides = [1, 1]} : vector<8x384xf32> to vector<8x128xf32>
    %303 = vector.extract_strided_slice %301 {offsets = [0, 0], sizes = [8, 128], strides = [1, 1]} : vector<8x384xf32> to vector<8x128xf32>
    %304 = arith.addf %302, %303 : vector<8x128xf32>
    %305 = arith.negf %304 : vector<8x128xf32>
    %306 = math.exp %305 : vector<8x128xf32>
    %cst_68 = arith.constant 1.000000e+00 : f32
    %307 = vector.broadcast %cst_68 : f32 to vector<8x128xf32>
    %308 = arith.addf %307, %306 : vector<8x128xf32>
    %309 = arith.divf %307, %308 : vector<8x128xf32>
    %310 = vector.extract_strided_slice %298 {offsets = [0, 128], sizes = [8, 128], strides = [1, 1]} : vector<8x384xf32> to vector<8x128xf32>
    %311 = vector.extract_strided_slice %301 {offsets = [0, 128], sizes = [8, 128], strides = [1, 1]} : vector<8x384xf32> to vector<8x128xf32>
    %312 = arith.addf %310, %311 : vector<8x128xf32>
    %313 = arith.negf %312 : vector<8x128xf32>
    %314 = math.exp %313 : vector<8x128xf32>
    %cst_69 = arith.constant 1.000000e+00 : f32
    %315 = vector.broadcast %cst_69 : f32 to vector<8x128xf32>
    %316 = arith.addf %315, %314 : vector<8x128xf32>
    %317 = arith.divf %315, %316 : vector<8x128xf32>
    %318 = vector.extract_strided_slice %298 {offsets = [0, 256], sizes = [8, 128], strides = [1, 1]} : vector<8x384xf32> to vector<8x128xf32>
    %319 = vector.extract_strided_slice %301 {offsets = [0, 256], sizes = [8, 128], strides = [1, 1]} : vector<8x384xf32> to vector<8x128xf32>
    %320 = arith.mulf %309, %319 : vector<8x128xf32>
    %321 = arith.addf %318, %320 : vector<8x128xf32>
    %322 = math.tanh %321 : vector<8x128xf32>
    %cst_70 = arith.constant 1.000000e+00 : f32
    %323 = vector.broadcast %cst_70 : f32 to vector<8x128xf32>
    %324 = arith.subf %323, %317 : vector<8x128xf32>
    %325 = arith.mulf %324, %322 : vector<8x128xf32>
    %326 = arith.mulf %317, %259 : vector<8x128xf32>
    %327 = arith.addf %325, %326 : vector<8x128xf32>
    %328 = tpu.concatenate %327, %292 in 0 : vector<8x128xf32>, vector<8x128xf32> -> vector<16x128xf32>
    %329 = arith.truncf %328 : vector<16x128xf32> to vector<16x128xbf16>
    %cst_71 = arith.constant dense<0.000000e+00> : vector<16x768xf32>
    %330 = tpu.matmul %329, %11, %cst_71 {dimension_numbers = #tpu.dot_dimension_numbers<[1], [0], [0], [1], [0, 0, 1, 1], [], []>} : vector<16x128xbf16>, vector<128x768xbf16>, vector<16x768xf32> -> vector<16x768xf32>
    %331 = vector.extract_strided_slice %330 {offsets = [0, 0], sizes = [8, 384], strides = [1, 1]} : vector<16x768xf32> to vector<8x384xf32>
    %332 = arith.addf %331, %17 : vector<8x384xf32>
    %333 = vector.extract_strided_slice %330 {offsets = [8, 384], sizes = [8, 384], strides = [1, 1]} : vector<16x768xf32> to vector<8x384xf32>
    %334 = arith.addf %333, %20 : vector<8x384xf32>
    %335 = vector.extract_strided_slice %332 {offsets = [0, 0], sizes = [8, 128], strides = [1, 1]} : vector<8x384xf32> to vector<8x128xf32>
    %336 = vector.extract_strided_slice %334 {offsets = [0, 0], sizes = [8, 128], strides = [1, 1]} : vector<8x384xf32> to vector<8x128xf32>
    %337 = arith.addf %335, %336 : vector<8x128xf32>
    %338 = arith.negf %337 : vector<8x128xf32>
    %339 = math.exp %338 : vector<8x128xf32>
    %cst_72 = arith.constant 1.000000e+00 : f32
    %340 = vector.broadcast %cst_72 : f32 to vector<8x128xf32>
    %341 = arith.addf %340, %339 : vector<8x128xf32>
    %342 = arith.divf %340, %341 : vector<8x128xf32>
    %343 = vector.extract_strided_slice %332 {offsets = [0, 128], sizes = [8, 128], strides = [1, 1]} : vector<8x384xf32> to vector<8x128xf32>
    %344 = vector.extract_strided_slice %334 {offsets = [0, 128], sizes = [8, 128], strides = [1, 1]} : vector<8x384xf32> to vector<8x128xf32>
    %345 = arith.addf %343, %344 : vector<8x128xf32>
    %346 = arith.negf %345 : vector<8x128xf32>
    %347 = math.exp %346 : vector<8x128xf32>
    %cst_73 = arith.constant 1.000000e+00 : f32
    %348 = vector.broadcast %cst_73 : f32 to vector<8x128xf32>
    %349 = arith.addf %348, %347 : vector<8x128xf32>
    %350 = arith.divf %348, %349 : vector<8x128xf32>
    %351 = vector.extract_strided_slice %332 {offsets = [0, 256], sizes = [8, 128], strides = [1, 1]} : vector<8x384xf32> to vector<8x128xf32>
    %352 = vector.extract_strided_slice %334 {offsets = [0, 256], sizes = [8, 128], strides = [1, 1]} : vector<8x384xf32> to vector<8x128xf32>
    %353 = arith.mulf %342, %352 : vector<8x128xf32>
    %354 = arith.addf %351, %353 : vector<8x128xf32>
    %355 = math.tanh %354 : vector<8x128xf32>
    %cst_74 = arith.constant 1.000000e+00 : f32
    %356 = vector.broadcast %cst_74 : f32 to vector<8x128xf32>
    %357 = arith.subf %356, %350 : vector<8x128xf32>
    %358 = arith.mulf %357, %355 : vector<8x128xf32>
    %359 = arith.mulf %350, %292 : vector<8x128xf32>
    %360 = arith.addf %358, %359 : vector<8x128xf32>
    %361 = arith.index_cast %296 : i32 to index
    %c0_75 = arith.constant 0 : index
    %362 = vector.load %arg9[%361, %c0_75] : memref<64x128xf32, #tpu.memory_space<vmem>>, vector<8x128xf32>
    tpu.vector_store %arg9[%361, %c0_75], %360 {strides = array<i32>} : memref<64x128xf32, #tpu.memory_space<vmem>>, vector<8x128xf32>,
    %c5_i32 = arith.constant 5 : i32
    %c8_i32_76 = arith.constant 8 : i32
    %363 = arith.muli %c5_i32, %c8_i32_76 : i32
    %364 = tpu.assume_multiple %363, 8 : i32
    %365 = arith.index_cast %364 : i32 to index
    %c0_77 = arith.constant 0 : index
    %366 = vector.load %arg10[%365, %c0_77] : memref<64x384xf32, #tpu.memory_space<vmem>>, vector<8x384xf32>
    %367 = arith.truncf %327 : vector<8x128xf32> to vector<8x128xbf16>
    %cst_78 = arith.constant dense<0.000000e+00> : vector<8x384xf32>
    %368 = tpu.matmul %367, %10, %cst_78 {dimension_numbers = #tpu.dot_dimension_numbers<[1], [0], [0], [1], [0, 0, 1, 1], [], []>} : vector<8x128xbf16>, vector<128x384xbf16>, vector<8x384xf32> -> vector<8x384xf32>
    %369 = arith.addf %368, %14 : vector<8x384xf32>
    %370 = vector.extract_strided_slice %366 {offsets = [0, 0], sizes = [8, 128], strides = [1, 1]} : vector<8x384xf32> to vector<8x128xf32>
    %371 = vector.extract_strided_slice %369 {offsets = [0, 0], sizes = [8, 128], strides = [1, 1]} : vector<8x384xf32> to vector<8x128xf32>
    %372 = arith.addf %370, %371 : vector<8x128xf32>
    %373 = arith.negf %372 : vector<8x128xf32>
    %374 = math.exp %373 : vector<8x128xf32>
    %cst_79 = arith.constant 1.000000e+00 : f32
    %375 = vector.broadcast %cst_79 : f32 to vector<8x128xf32>
    %376 = arith.addf %375, %374 : vector<8x128xf32>
    %377 = arith.divf %375, %376 : vector<8x128xf32>
    %378 = vector.extract_strided_slice %366 {offsets = [0, 128], sizes = [8, 128], strides = [1, 1]} : vector<8x384xf32> to vector<8x128xf32>
    %379 = vector.extract_strided_slice %369 {offsets = [0, 128], sizes = [8, 128], strides = [1, 1]} : vector<8x384xf32> to vector<8x128xf32>
    %380 = arith.addf %378, %379 : vector<8x128xf32>
    %381 = arith.negf %380 : vector<8x128xf32>
    %382 = math.exp %381 : vector<8x128xf32>
    %cst_80 = arith.constant 1.000000e+00 : f32
    %383 = vector.broadcast %cst_80 : f32 to vector<8x128xf32>
    %384 = arith.addf %383, %382 : vector<8x128xf32>
    %385 = arith.divf %383, %384 : vector<8x128xf32>
    %386 = vector.extract_strided_slice %366 {offsets = [0, 256], sizes = [8, 128], strides = [1, 1]} : vector<8x384xf32> to vector<8x128xf32>
    %387 = vector.extract_strided_slice %369 {offsets = [0, 256], sizes = [8, 128], strides = [1, 1]} : vector<8x384xf32> to vector<8x128xf32>
    %388 = arith.mulf %377, %387 : vector<8x128xf32>
    %389 = arith.addf %386, %388 : vector<8x128xf32>
    %390 = math.tanh %389 : vector<8x128xf32>
    %cst_81 = arith.constant 1.000000e+00 : f32
    %391 = vector.broadcast %cst_81 : f32 to vector<8x128xf32>
    %392 = arith.subf %391, %385 : vector<8x128xf32>
    %393 = arith.mulf %392, %390 : vector<8x128xf32>
    %394 = arith.mulf %385, %327 : vector<8x128xf32>
    %395 = arith.addf %393, %394 : vector<8x128xf32>
    %396 = tpu.concatenate %395, %360 in 0 : vector<8x128xf32>, vector<8x128xf32> -> vector<16x128xf32>
    %397 = arith.truncf %396 : vector<16x128xf32> to vector<16x128xbf16>
    %cst_82 = arith.constant dense<0.000000e+00> : vector<16x768xf32>
    %398 = tpu.matmul %397, %11, %cst_82 {dimension_numbers = #tpu.dot_dimension_numbers<[1], [0], [0], [1], [0, 0, 1, 1], [], []>} : vector<16x128xbf16>, vector<128x768xbf16>, vector<16x768xf32> -> vector<16x768xf32>
    %399 = vector.extract_strided_slice %398 {offsets = [0, 0], sizes = [8, 384], strides = [1, 1]} : vector<16x768xf32> to vector<8x384xf32>
    %400 = arith.addf %399, %17 : vector<8x384xf32>
    %401 = vector.extract_strided_slice %398 {offsets = [8, 384], sizes = [8, 384], strides = [1, 1]} : vector<16x768xf32> to vector<8x384xf32>
    %402 = arith.addf %401, %20 : vector<8x384xf32>
    %403 = vector.extract_strided_slice %400 {offsets = [0, 0], sizes = [8, 128], strides = [1, 1]} : vector<8x384xf32> to vector<8x128xf32>
    %404 = vector.extract_strided_slice %402 {offsets = [0, 0], sizes = [8, 128], strides = [1, 1]} : vector<8x384xf32> to vector<8x128xf32>
    %405 = arith.addf %403, %404 : vector<8x128xf32>
    %406 = arith.negf %405 : vector<8x128xf32>
    %407 = math.exp %406 : vector<8x128xf32>
    %cst_83 = arith.constant 1.000000e+00 : f32
    %408 = vector.broadcast %cst_83 : f32 to vector<8x128xf32>
    %409 = arith.addf %408, %407 : vector<8x128xf32>
    %410 = arith.divf %408, %409 : vector<8x128xf32>
    %411 = vector.extract_strided_slice %400 {offsets = [0, 128], sizes = [8, 128], strides = [1, 1]} : vector<8x384xf32> to vector<8x128xf32>
    %412 = vector.extract_strided_slice %402 {offsets = [0, 128], sizes = [8, 128], strides = [1, 1]} : vector<8x384xf32> to vector<8x128xf32>
    %413 = arith.addf %411, %412 : vector<8x128xf32>
    %414 = arith.negf %413 : vector<8x128xf32>
    %415 = math.exp %414 : vector<8x128xf32>
    %cst_84 = arith.constant 1.000000e+00 : f32
    %416 = vector.broadcast %cst_84 : f32 to vector<8x128xf32>
    %417 = arith.addf %416, %415 : vector<8x128xf32>
    %418 = arith.divf %416, %417 : vector<8x128xf32>
    %419 = vector.extract_strided_slice %400 {offsets = [0, 256], sizes = [8, 128], strides = [1, 1]} : vector<8x384xf32> to vector<8x128xf32>
    %420 = vector.extract_strided_slice %402 {offsets = [0, 256], sizes = [8, 128], strides = [1, 1]} : vector<8x384xf32> to vector<8x128xf32>
    %421 = arith.mulf %410, %420 : vector<8x128xf32>
    %422 = arith.addf %419, %421 : vector<8x128xf32>
    %423 = math.tanh %422 : vector<8x128xf32>
    %cst_85 = arith.constant 1.000000e+00 : f32
    %424 = vector.broadcast %cst_85 : f32 to vector<8x128xf32>
    %425 = arith.subf %424, %418 : vector<8x128xf32>
    %426 = arith.mulf %425, %423 : vector<8x128xf32>
    %427 = arith.mulf %418, %360 : vector<8x128xf32>
    %428 = arith.addf %426, %427 : vector<8x128xf32>
    %429 = arith.index_cast %364 : i32 to index
    %c0_86 = arith.constant 0 : index
    %430 = vector.load %arg9[%429, %c0_86] : memref<64x128xf32, #tpu.memory_space<vmem>>, vector<8x128xf32>
    tpu.vector_store %arg9[%429, %c0_86], %428 {strides = array<i32>} : memref<64x128xf32, #tpu.memory_space<vmem>>, vector<8x128xf32>,
    %c6_i32 = arith.constant 6 : i32
    %c8_i32_87 = arith.constant 8 : i32
    %431 = arith.muli %c6_i32, %c8_i32_87 : i32
    %432 = tpu.assume_multiple %431, 8 : i32
    %433 = arith.index_cast %432 : i32 to index
    %c0_88 = arith.constant 0 : index
    %434 = vector.load %arg10[%433, %c0_88] : memref<64x384xf32, #tpu.memory_space<vmem>>, vector<8x384xf32>
    %435 = arith.truncf %395 : vector<8x128xf32> to vector<8x128xbf16>
    %cst_89 = arith.constant dense<0.000000e+00> : vector<8x384xf32>
    %436 = tpu.matmul %435, %10, %cst_89 {dimension_numbers = #tpu.dot_dimension_numbers<[1], [0], [0], [1], [0, 0, 1, 1], [], []>} : vector<8x128xbf16>, vector<128x384xbf16>, vector<8x384xf32> -> vector<8x384xf32>
    %437 = arith.addf %436, %14 : vector<8x384xf32>
    %438 = vector.extract_strided_slice %434 {offsets = [0, 0], sizes = [8, 128], strides = [1, 1]} : vector<8x384xf32> to vector<8x128xf32>
    %439 = vector.extract_strided_slice %437 {offsets = [0, 0], sizes = [8, 128], strides = [1, 1]} : vector<8x384xf32> to vector<8x128xf32>
    %440 = arith.addf %438, %439 : vector<8x128xf32>
    %441 = arith.negf %440 : vector<8x128xf32>
    %442 = math.exp %441 : vector<8x128xf32>
    %cst_90 = arith.constant 1.000000e+00 : f32
    %443 = vector.broadcast %cst_90 : f32 to vector<8x128xf32>
    %444 = arith.addf %443, %442 : vector<8x128xf32>
    %445 = arith.divf %443, %444 : vector<8x128xf32>
    %446 = vector.extract_strided_slice %434 {offsets = [0, 128], sizes = [8, 128], strides = [1, 1]} : vector<8x384xf32> to vector<8x128xf32>
    %447 = vector.extract_strided_slice %437 {offsets = [0, 128], sizes = [8, 128], strides = [1, 1]} : vector<8x384xf32> to vector<8x128xf32>
    %448 = arith.addf %446, %447 : vector<8x128xf32>
    %449 = arith.negf %448 : vector<8x128xf32>
    %450 = math.exp %449 : vector<8x128xf32>
    %cst_91 = arith.constant 1.000000e+00 : f32
    %451 = vector.broadcast %cst_91 : f32 to vector<8x128xf32>
    %452 = arith.addf %451, %450 : vector<8x128xf32>
    %453 = arith.divf %451, %452 : vector<8x128xf32>
    %454 = vector.extract_strided_slice %434 {offsets = [0, 256], sizes = [8, 128], strides = [1, 1]} : vector<8x384xf32> to vector<8x128xf32>
    %455 = vector.extract_strided_slice %437 {offsets = [0, 256], sizes = [8, 128], strides = [1, 1]} : vector<8x384xf32> to vector<8x128xf32>
    %456 = arith.mulf %445, %455 : vector<8x128xf32>
    %457 = arith.addf %454, %456 : vector<8x128xf32>
    %458 = math.tanh %457 : vector<8x128xf32>
    %cst_92 = arith.constant 1.000000e+00 : f32
    %459 = vector.broadcast %cst_92 : f32 to vector<8x128xf32>
    %460 = arith.subf %459, %453 : vector<8x128xf32>
    %461 = arith.mulf %460, %458 : vector<8x128xf32>
    %462 = arith.mulf %453, %395 : vector<8x128xf32>
    %463 = arith.addf %461, %462 : vector<8x128xf32>
    %464 = tpu.concatenate %463, %428 in 0 : vector<8x128xf32>, vector<8x128xf32> -> vector<16x128xf32>
    %465 = arith.truncf %464 : vector<16x128xf32> to vector<16x128xbf16>
    %cst_93 = arith.constant dense<0.000000e+00> : vector<16x768xf32>
    %466 = tpu.matmul %465, %11, %cst_93 {dimension_numbers = #tpu.dot_dimension_numbers<[1], [0], [0], [1], [0, 0, 1, 1], [], []>} : vector<16x128xbf16>, vector<128x768xbf16>, vector<16x768xf32> -> vector<16x768xf32>
    %467 = vector.extract_strided_slice %466 {offsets = [0, 0], sizes = [8, 384], strides = [1, 1]} : vector<16x768xf32> to vector<8x384xf32>
    %468 = arith.addf %467, %17 : vector<8x384xf32>
    %469 = vector.extract_strided_slice %466 {offsets = [8, 384], sizes = [8, 384], strides = [1, 1]} : vector<16x768xf32> to vector<8x384xf32>
    %470 = arith.addf %469, %20 : vector<8x384xf32>
    %471 = vector.extract_strided_slice %468 {offsets = [0, 0], sizes = [8, 128], strides = [1, 1]} : vector<8x384xf32> to vector<8x128xf32>
    %472 = vector.extract_strided_slice %470 {offsets = [0, 0], sizes = [8, 128], strides = [1, 1]} : vector<8x384xf32> to vector<8x128xf32>
    %473 = arith.addf %471, %472 : vector<8x128xf32>
    %474 = arith.negf %473 : vector<8x128xf32>
    %475 = math.exp %474 : vector<8x128xf32>
    %cst_94 = arith.constant 1.000000e+00 : f32
    %476 = vector.broadcast %cst_94 : f32 to vector<8x128xf32>
    %477 = arith.addf %476, %475 : vector<8x128xf32>
    %478 = arith.divf %476, %477 : vector<8x128xf32>
    %479 = vector.extract_strided_slice %468 {offsets = [0, 128], sizes = [8, 128], strides = [1, 1]} : vector<8x384xf32> to vector<8x128xf32>
    %480 = vector.extract_strided_slice %470 {offsets = [0, 128], sizes = [8, 128], strides = [1, 1]} : vector<8x384xf32> to vector<8x128xf32>
    %481 = arith.addf %479, %480 : vector<8x128xf32>
    %482 = arith.negf %481 : vector<8x128xf32>
    %483 = math.exp %482 : vector<8x128xf32>
    %cst_95 = arith.constant 1.000000e+00 : f32
    %484 = vector.broadcast %cst_95 : f32 to vector<8x128xf32>
    %485 = arith.addf %484, %483 : vector<8x128xf32>
    %486 = arith.divf %484, %485 : vector<8x128xf32>
    %487 = vector.extract_strided_slice %468 {offsets = [0, 256], sizes = [8, 128], strides = [1, 1]} : vector<8x384xf32> to vector<8x128xf32>
    %488 = vector.extract_strided_slice %470 {offsets = [0, 256], sizes = [8, 128], strides = [1, 1]} : vector<8x384xf32> to vector<8x128xf32>
    %489 = arith.mulf %478, %488 : vector<8x128xf32>
    %490 = arith.addf %487, %489 : vector<8x128xf32>
    %491 = math.tanh %490 : vector<8x128xf32>
    %cst_96 = arith.constant 1.000000e+00 : f32
    %492 = vector.broadcast %cst_96 : f32 to vector<8x128xf32>
    %493 = arith.subf %492, %486 : vector<8x128xf32>
    %494 = arith.mulf %493, %491 : vector<8x128xf32>
    %495 = arith.mulf %486, %428 : vector<8x128xf32>
    %496 = arith.addf %494, %495 : vector<8x128xf32>
    %497 = arith.index_cast %432 : i32 to index
    %c0_97 = arith.constant 0 : index
    %498 = vector.load %arg9[%497, %c0_97] : memref<64x128xf32, #tpu.memory_space<vmem>>, vector<8x128xf32>
    tpu.vector_store %arg9[%497, %c0_97], %496 {strides = array<i32>} : memref<64x128xf32, #tpu.memory_space<vmem>>, vector<8x128xf32>,
    %c7_i32 = arith.constant 7 : i32
    %c8_i32_98 = arith.constant 8 : i32
    %499 = arith.muli %c7_i32, %c8_i32_98 : i32
    %500 = tpu.assume_multiple %499, 8 : i32
    %501 = arith.index_cast %500 : i32 to index
    %c0_99 = arith.constant 0 : index
    %502 = vector.load %arg10[%501, %c0_99] : memref<64x384xf32, #tpu.memory_space<vmem>>, vector<8x384xf32>
    %503 = arith.truncf %463 : vector<8x128xf32> to vector<8x128xbf16>
    %cst_100 = arith.constant dense<0.000000e+00> : vector<8x384xf32>
    %504 = tpu.matmul %503, %10, %cst_100 {dimension_numbers = #tpu.dot_dimension_numbers<[1], [0], [0], [1], [0, 0, 1, 1], [], []>} : vector<8x128xbf16>, vector<128x384xbf16>, vector<8x384xf32> -> vector<8x384xf32>
    %505 = arith.addf %504, %14 : vector<8x384xf32>
    %506 = vector.extract_strided_slice %502 {offsets = [0, 0], sizes = [8, 128], strides = [1, 1]} : vector<8x384xf32> to vector<8x128xf32>
    %507 = vector.extract_strided_slice %505 {offsets = [0, 0], sizes = [8, 128], strides = [1, 1]} : vector<8x384xf32> to vector<8x128xf32>
    %508 = arith.addf %506, %507 : vector<8x128xf32>
    %509 = arith.negf %508 : vector<8x128xf32>
    %510 = math.exp %509 : vector<8x128xf32>
    %cst_101 = arith.constant 1.000000e+00 : f32
    %511 = vector.broadcast %cst_101 : f32 to vector<8x128xf32>
    %512 = arith.addf %511, %510 : vector<8x128xf32>
    %513 = arith.divf %511, %512 : vector<8x128xf32>
    %514 = vector.extract_strided_slice %502 {offsets = [0, 128], sizes = [8, 128], strides = [1, 1]} : vector<8x384xf32> to vector<8x128xf32>
    %515 = vector.extract_strided_slice %505 {offsets = [0, 128], sizes = [8, 128], strides = [1, 1]} : vector<8x384xf32> to vector<8x128xf32>
    %516 = arith.addf %514, %515 : vector<8x128xf32>
    %517 = arith.negf %516 : vector<8x128xf32>
    %518 = math.exp %517 : vector<8x128xf32>
    %cst_102 = arith.constant 1.000000e+00 : f32
    %519 = vector.broadcast %cst_102 : f32 to vector<8x128xf32>
    %520 = arith.addf %519, %518 : vector<8x128xf32>
    %521 = arith.divf %519, %520 : vector<8x128xf32>
    %522 = vector.extract_strided_slice %502 {offsets = [0, 256], sizes = [8, 128], strides = [1, 1]} : vector<8x384xf32> to vector<8x128xf32>
    %523 = vector.extract_strided_slice %505 {offsets = [0, 256], sizes = [8, 128], strides = [1, 1]} : vector<8x384xf32> to vector<8x128xf32>
    %524 = arith.mulf %513, %523 : vector<8x128xf32>
    %525 = arith.addf %522, %524 : vector<8x128xf32>
    %526 = math.tanh %525 : vector<8x128xf32>
    %cst_103 = arith.constant 1.000000e+00 : f32
    %527 = vector.broadcast %cst_103 : f32 to vector<8x128xf32>
    %528 = arith.subf %527, %521 : vector<8x128xf32>
    %529 = arith.mulf %528, %526 : vector<8x128xf32>
    %530 = arith.mulf %521, %463 : vector<8x128xf32>
    %531 = arith.addf %529, %530 : vector<8x128xf32>
    %532 = tpu.concatenate %531, %496 in 0 : vector<8x128xf32>, vector<8x128xf32> -> vector<16x128xf32>
    %533 = arith.truncf %532 : vector<16x128xf32> to vector<16x128xbf16>
    %cst_104 = arith.constant dense<0.000000e+00> : vector<16x768xf32>
    %534 = tpu.matmul %533, %11, %cst_104 {dimension_numbers = #tpu.dot_dimension_numbers<[1], [0], [0], [1], [0, 0, 1, 1], [], []>} : vector<16x128xbf16>, vector<128x768xbf16>, vector<16x768xf32> -> vector<16x768xf32>
    %535 = vector.extract_strided_slice %534 {offsets = [0, 0], sizes = [8, 384], strides = [1, 1]} : vector<16x768xf32> to vector<8x384xf32>
    %536 = arith.addf %535, %17 : vector<8x384xf32>
    %537 = vector.extract_strided_slice %534 {offsets = [8, 384], sizes = [8, 384], strides = [1, 1]} : vector<16x768xf32> to vector<8x384xf32>
    %538 = arith.addf %537, %20 : vector<8x384xf32>
    %539 = vector.extract_strided_slice %536 {offsets = [0, 0], sizes = [8, 128], strides = [1, 1]} : vector<8x384xf32> to vector<8x128xf32>
    %540 = vector.extract_strided_slice %538 {offsets = [0, 0], sizes = [8, 128], strides = [1, 1]} : vector<8x384xf32> to vector<8x128xf32>
    %541 = arith.addf %539, %540 : vector<8x128xf32>
    %542 = arith.negf %541 : vector<8x128xf32>
    %543 = math.exp %542 : vector<8x128xf32>
    %cst_105 = arith.constant 1.000000e+00 : f32
    %544 = vector.broadcast %cst_105 : f32 to vector<8x128xf32>
    %545 = arith.addf %544, %543 : vector<8x128xf32>
    %546 = arith.divf %544, %545 : vector<8x128xf32>
    %547 = vector.extract_strided_slice %536 {offsets = [0, 128], sizes = [8, 128], strides = [1, 1]} : vector<8x384xf32> to vector<8x128xf32>
    %548 = vector.extract_strided_slice %538 {offsets = [0, 128], sizes = [8, 128], strides = [1, 1]} : vector<8x384xf32> to vector<8x128xf32>
    %549 = arith.addf %547, %548 : vector<8x128xf32>
    %550 = arith.negf %549 : vector<8x128xf32>
    %551 = math.exp %550 : vector<8x128xf32>
    %cst_106 = arith.constant 1.000000e+00 : f32
    %552 = vector.broadcast %cst_106 : f32 to vector<8x128xf32>
    %553 = arith.addf %552, %551 : vector<8x128xf32>
    %554 = arith.divf %552, %553 : vector<8x128xf32>
    %555 = vector.extract_strided_slice %536 {offsets = [0, 256], sizes = [8, 128], strides = [1, 1]} : vector<8x384xf32> to vector<8x128xf32>
    %556 = vector.extract_strided_slice %538 {offsets = [0, 256], sizes = [8, 128], strides = [1, 1]} : vector<8x384xf32> to vector<8x128xf32>
    %557 = arith.mulf %546, %556 : vector<8x128xf32>
    %558 = arith.addf %555, %557 : vector<8x128xf32>
    %559 = math.tanh %558 : vector<8x128xf32>
    %cst_107 = arith.constant 1.000000e+00 : f32
    %560 = vector.broadcast %cst_107 : f32 to vector<8x128xf32>
    %561 = arith.subf %560, %554 : vector<8x128xf32>
    %562 = arith.mulf %561, %559 : vector<8x128xf32>
    %563 = arith.mulf %554, %496 : vector<8x128xf32>
    %564 = arith.addf %562, %563 : vector<8x128xf32>
    %565 = arith.index_cast %500 : i32 to index
    %c0_108 = arith.constant 0 : index
    %566 = vector.load %arg9[%565, %c0_108] : memref<64x128xf32, #tpu.memory_space<vmem>>, vector<8x128xf32>
    tpu.vector_store %arg9[%565, %c0_108], %564 {strides = array<i32>} : memref<64x128xf32, #tpu.memory_space<vmem>>, vector<8x128xf32>,
    %c8_i32_109 = arith.constant 8 : i32
    %c0_110 = arith.constant 0 : index
    %c0_111 = arith.constant 0 : index
    %567 = vector.load %arg11[%c0_110, %c0_111] : memref<16x128xf32, #tpu.memory_space<vmem>>, vector<8x128xf32>
    tpu.vector_store %arg11[%c0_110, %c0_111], %531 {strides = array<i32>} : memref<16x128xf32, #tpu.memory_space<vmem>>, vector<8x128xf32>,
    %c8_112 = arith.constant 8 : index
    %c0_113 = arith.constant 0 : index
    %568 = vector.load %arg11[%c8_112, %c0_113] : memref<16x128xf32, #tpu.memory_space<vmem>>, vector<8x128xf32>
    tpu.vector_store %arg11[%c8_112, %c0_113], %564 {strides = array<i32>} : memref<16x128xf32, #tpu.memory_space<vmem>>, vector<8x128xf32>,
    return
  }
  func.func @transform_0(%arg0: i32) -> (i32, i32) {
    %c0_i32 = arith.constant 0 : i32
    %c0_i32_0 = arith.constant 0 : i32
    return %arg0, %c0_i32 : i32, i32
  }
  func.func @transform_1(%arg0: i32) -> (i32, i32) {
    %c0_i32 = arith.constant 0 : i32
    %c0_i32_0 = arith.constant 0 : i32
    %c0_i32_1 = arith.constant 0 : i32
    return %c0_i32, %c0_i32_0 : i32, i32
  }
  func.func @transform_2(%arg0: i32) -> (i32, i32) {
    %c0_i32 = arith.constant 0 : i32
    %c0_i32_0 = arith.constant 0 : i32
    %c0_i32_1 = arith.constant 0 : i32
    return %c0_i32, %c0_i32_0 : i32, i32
  }
  func.func @transform_3(%arg0: i32) -> (i32, i32) {
    %c0_i32 = arith.constant 0 : i32
    %c0_i32_0 = arith.constant 0 : i32
    %c0_i32_1 = arith.constant 0 : i32
    return %c0_i32, %c0_i32_0 : i32, i32
  }
  func.func @transform_4(%arg0: i32) -> (i32, i32) {
    %c0_i32 = arith.constant 0 : i32
    %c0_i32_0 = arith.constant 0 : i32
    %c0_i32_1 = arith.constant 0 : i32
    return %c0_i32, %c0_i32_0 : i32, i32
  }
  func.func @transform_5(%arg0: i32) -> (i32, i32) {
    %c0_i32 = arith.constant 0 : i32
    %c0_i32_0 = arith.constant 0 : i32
    %c0_i32_1 = arith.constant 0 : i32
    return %c0_i32, %c0_i32_0 : i32, i32
  }
  func.func @transform_6(%arg0: i32) -> (i32, i32) {
    %c0_i32 = arith.constant 0 : i32
    %c0_i32_0 = arith.constant 0 : i32
    %c0_i32_1 = arith.constant 0 : i32
    return %c0_i32, %c0_i32_0 : i32, i32
  }
  func.func @transform_7(%arg0: i32) -> (i32, i32) {
    %c0_i32 = arith.constant 0 : i32
    %c0_i32_0 = arith.constant 0 : i32
    %c0_i32_1 = arith.constant 0 : i32
    return %c0_i32, %c0_i32_0 : i32, i32
  }
  func.func @transform_8(%arg0: i32) -> (i32, i32) {
    %c0_i32 = arith.constant 0 : i32
    %c0_i32_0 = arith.constant 0 : i32
    return %arg0, %c0_i32 : i32, i32
  }
}

</mosaic_0001>

<bundles_post_ra>
// kernel: feat_aggregate.1
= control target key start
LH: loop header
LB: loop body
LE: loop exit
PB: predicated region body
PF: predicated region fallthrough
CT: control target
= control target key end

     0   :  { %s6565_s27 = smov 0   ;;  %s9152_s0 = inlined_call_operand.vmem [shape: bf16[128,1024], index: 0, kind: input, shape index: {}]   ;;  %s9153_s1 = inlined_call_operand.vmem [shape: bf16[1024,384], index: 1, kind: input, shape index: {}]   ;;  %s9154_s2 = inlined_call_operand.vmem [shape: bf16[128,384], index: 2, kind: input, shape index: {}]   ;;  %s9155_s3 = inlined_call_operand.vmem [shape: f32[1,384], index: 3, kind: input, shape index: {}]   ;;  %s9156_s4 = inlined_call_operand.vmem [shape: f32[1,384], index: 4, kind: input, shape index: {}]   ;;  %s9157_s5 = inlined_call_operand.vmem [shape: bf16[128,768], index: 5, kind: input, shape index: {}]   ;;  %s9158_s6 = inlined_call_operand.vmem [shape: f32[1,384], index: 6, kind: input, shape index: {}]   ;;  %s9159_s7 = inlined_call_operand.vmem [shape: f32[1,384], index: 7, kind: input, shape index: {}]   ;;  %s9160_s8 = inlined_call_operand.vmem [shape: f32[128,128], index: 8, kind: output, shape index: {}]  }
   0x1 LB: > { %s5045_s28 = sadd.s32 4294967295, %s6514_s27   ;;  %p5049_p0 = scmp.ge.s32.totalorder %s6514_s27, 1  ;;  %s6514_s27 = sphi %s6565_s27, %s18_s27  }
   0x2   : > { %p264_p1 = scmp.lt.s32.totalorder %s6514_s27, 3 }
   0x4   : > { %p265_p2 = pnand %p5049_p0, %p264_p1 }
   0x6   : > { %268 = sbr.rel (%p265_p2) target bundleno = 2946 (0xb82), region = 52 }
   0xd   : > { %s5050_s29 = sshll.u32 %s5045_s28, 3  ;;  %p5055_p4 = scmp.ne.s32.totalorder %s5045_s28, 0 }
   0xe   : > { %p300_p3 = scmp.lt.s32.totalorder %s5050_s29, 15  ;;  %v6516_v0 = vmov (!%p5055_p4), 0.0  }
   0xf   : > { %316 = sbr.rel (%p5055_p4) target bundleno = 22 (0x16), region = 56  ;;  %317 = vst [vmem:[#allocation3] sm:$0xff] (!%p5055_p4), %v6516_v0  ;;  %318 = vst [vmem:[#allocation3 + $0x8] sm:$0xff] (!%p5055_p4), %v6516_v0 }
  0x10   : > { %s9581_s29 = smov (!%p300_p3, %s5050_s29), 15 }
  0x11   : > { %s5393_s30 = sshll.u32 %s9581_s29, 5  ;;  %s5054_s9 = sshll.u32 %s9581_s29, 3 }
  0x12   : > { %s6576_s12 = scalar_lea.vmem %s9152_s0, %s5393_s30  ;;  %s6581_s15 = scalar_lea.vmem %s9160_s8, %s5054_s9 }
  0x16 PF: > { %v5862_v1 = vld [vmem:[%s9153_s1 + $0x4] ss:$12 sps:$4 sm:$0xff]   ;;  %v5864_v2 = vld [vmem:[%s9153_s1 + $0xc8] ss:$12 sps:$4 sm:$0xff]   ;;  %v5865_v3 = vld [vmem:[%s9153_s1] ss:$12 sps:$4 sm:$0xff]  }
  0x17   : > { %1808 = vmatprep.subr.bf16.mxu0 %v5862_v1  ;;  %5394 = vmatprep.subr.bf16.mxu1 %v5864_v2  ;;  %v5866_v4 = vld [vmem:[%s9153_s1 + $0x8] ss:$12 sps:$4 sm:$0xff]   ;;  %v5869_v6 = vld [vmem:[%s9153_s1 + $0xe0] ss:$12 sps:$4 sm:$0xff]   ;;  %v5870_v7 = vld [vmem:[%s9153_s1 + $0x18] ss:$12 sps:$4 sm:$0xff]  }
  0x18   : > { %1809 = vmatpush1.bf16.msra.mxu0 %v5865_v3  ;;  %v5867_v5 = vld [vmem:[%s9153_s1 + $0x1c] ss:$12 sps:$4 sm:$0xff]   ;;  %5395 = vmatpush3.bf16.msra.mxu1 %v5866_v4  ;;  %v5871_v8 = vld [vmem:[%s9153_s1 + $0x20] ss:$12 sps:$4 sm:$0xff]   ;;  %v5874_v10 = vld [vmem:[%s9153_s1 + $0xf8] ss:$12 sps:$4 sm:$0xff]  }
  0x19   : > { %1810 = vmatprep.subr.bf16.mxu0 %v5867_v5  ;;  %5396 = vmatprep.subr.bf16.mxu1 %v5869_v6  ;;  %v5872_v9 = vld [vmem:[%s9153_s1 + $0x34] ss:$12 sps:$4 sm:$0xff]   ;;  %v5875_v11 = vld [vmem:[%s9153_s1 + $0x30] ss:$12 sps:$4 sm:$0xff]   ;;  %v5876_v12 = vld [vmem:[%s9153_s1 + $0x38] ss:$12 sps:$4 sm:$0xff]  }
  0x1a   : > { %v5877_v13 = vld [vmem:[%s9153_s1 + $0x4c] ss:$12 sps:$4 sm:$0xff]   ;;  %v5879_v14 = vld [vmem:[%s9153_s1 + $0x110] ss:$12 sps:$4 sm:$0xff]   ;;  %v5880_v15 = vld [vmem:[%s9153_s1 + $0x48] ss:$12 sps:$4 sm:$0xff]  }
  0x1b   : > { %v5881_v16 = vld [vmem:[%s9153_s1 + $0x50] ss:$12 sps:$4 sm:$0xff]   ;;  %v5884_v18 = vld [vmem:[%s9153_s1 + $0x128] ss:$12 sps:$4 sm:$0xff]   ;;  %v5885_v19 = vld [vmem:[%s9153_s1 + $0x60] ss:$12 sps:$4 sm:$0xff]  }
  0x1c   : > { %1811 = vmatpush1.bf16.msra.mxu0 %v5870_v7  ;;  %5397 = vmatpush3.bf16.msra.mxu1 %v5871_v8  ;;  %v5882_v17 = vld [vmem:[%s9153_s1 + $0x64] ss:$12 sps:$4 sm:$0xff]   ;;  %v5886_v20 = vld [vmem:[%s9153_s1 + $0x68] ss:$12 sps:$4 sm:$0xff]   ;;  %v5889_v22 = vld [vmem:[%s9153_s1 + $0x140] ss:$12 sps:$4 sm:$0xff]  }
  0x1d   : > { %1812 = vmatprep.subr.bf16.mxu0 %v5872_v9  ;;  %5398 = vmatprep.subr.bf16.mxu1 %v5874_v10  ;;  %v5887_v21 = vld [vmem:[%s9153_s1 + $0x7c] ss:$12 sps:$4 sm:$0xff]   ;;  %v5890_v23 = vld [vmem:[%s9153_s1 + $0x78] ss:$12 sps:$4 sm:$0xff]   ;;  %v5891_v24 = vld [vmem:[%s9153_s1 + $0x80] ss:$12 sps:$4 sm:$0xff]  }
  0x1e   : > { %v5892_v25 = vld [vmem:[%s9153_s1 + $0x94] ss:$12 sps:$4 sm:$0xff]   ;;  %v5894_v26 = vld [vmem:[%s9153_s1 + $0x158] ss:$12 sps:$4 sm:$0xff]   ;;  %v5895_v27 = vld [vmem:[%s9153_s1 + $0x90] ss:$12 sps:$4 sm:$0xff]  }
  0x1f   : > { %v5896_v28 = vld [vmem:[%s9153_s1 + $0x98] ss:$12 sps:$4 sm:$0xff]   ;;  %v5899_v30 = vld [vmem:[%s9153_s1 + $0x170] ss:$12 sps:$4 sm:$0xff]   ;;  %v5900_v33 = vld [vmem:[%s9153_s1 + $0xa8] ss:$12 sps:$4 sm:$0xff]  }
  0x20   : > { %1813 = vmatpush1.bf16.msra.mxu0 %v5875_v11  ;;  %5399 = vmatpush3.bf16.msra.mxu1 %v5876_v12  ;;  %v5897_v29 = vld [vmem:[%s9153_s1 + $0xac] ss:$12 sps:$4 sm:$0xff]   ;;  %v319_v31 = vld [vmem:[%s6576_s12] sm:$0xff]  ;;  %v5901_v35 = vld [vmem:[%s9153_s1 + $0xb0] ss:$12 sps:$4 sm:$0xff]   ;;  %vm6519_vm0 = vmmov 0  }
  0x21   : > { %1814 = vmatprep.subr.bf16.mxu0 %v5877_v13  ;;  %5400 = vmatprep.subr.bf16.mxu1 %v5879_v14  ;;  %v323_v32 = vld [vmem:[%s6576_s12 + $0x20] sm:$0xff]  ;;  %v5904_v37 = vld [vmem:[%s9153_s1 + $0x248] ss:$12 sps:$4 sm:$0xff]   ;;  %v5915_v50 = vld [vmem:[%s9153_s1 + $0xf0] ss:$12 sps:$4 sm:$0xff]  }
  0x22   : > { %v5057_v34 = vcombine.high %v319_v31, %v323_v32  ;;  %v5902_v36 = vld [vmem:[%s9153_s1 + $0xc4] ss:$12 sps:$4 sm:$0xff]   ;;  %v5905_v38 = vld [vmem:[%s9153_s1 + $0xc0] ss:$12 sps:$4 sm:$0xff]   ;;  %v6690_v39 = vcombine.low %v319_v31, %v323_v32  ;;  %v5906_v40 = vld [vmem:[%s9153_s1 + $0x188] ss:$12 sps:$4 sm:$0xff]  }
  0x23   : > { %v5907_v41 = vld [vmem:[%s9153_s1 + $0xdc] ss:$12 sps:$4 sm:$0xff]   ;;  %v5909_v42 = vld [vmem:[%s9153_s1 + $0x260] ss:$12 sps:$4 sm:$0xff]   ;;  %v5910_v46 = vld [vmem:[%s9153_s1 + $0xd8] ss:$12 sps:$4 sm:$0xff]  }
  0x24   : > { %1815 = vmatpush1.bf16.msra.mxu0 %v5880_v15  ;;  %5401 = vmatpush3.bf16.msra.mxu1 %v5881_v16  ;;  %v327_v43 = vld [vmem:[%s6576_s12 + $0x40] sm:$0xff]  ;;  %v5917_v53 = vld [vmem:[%s9153_s1 + $0x10c] ss:$12 sps:$4 sm:$0xff]   ;;  %v5919_v56 = vld [vmem:[%s9153_s1 + $0x290] ss:$12 sps:$4 sm:$0xff]  }
  0x25   : > { %1816 = vmatprep.subr.bf16.mxu0 %v5882_v17  ;;  %5402 = vmatprep.subr.bf16.mxu1 %v5884_v18  ;;  %v331_v44 = vld [vmem:[%s6576_s12 + $0x60] sm:$0xff]  ;;  %v5920_v58 = vld [vmem:[%s9153_s1 + $0x108] ss:$12 sps:$4 sm:$0xff]   ;;  %v5921_v59 = vld [vmem:[%s9153_s1 + $0x1d0] ss:$12 sps:$4 sm:$0xff]  }
  0x26   : > { %2132 = vmatprep.mubr.bf16.mxu1 %v5057_v34  ;;  %1840 = vmatprep.mubr.bf16.mxu0 %v5057_v34  ;;  %v6703_v45 = vcombine.high %v327_v43, %v331_v44  ;;  %v5911_v47 = vld [vmem:[%s9153_s1 + $0x1a0] ss:$12 sps:$4 sm:$0xff]   ;;  %v5914_v49 = vld [vmem:[%s9153_s1 + $0x278] ss:$12 sps:$4 sm:$0xff]   ;;  %v6722_v51 = vcombine.low %v327_v43, %v331_v44  ;;  %v5924_v61 = vld [vmem:[%s9153_s1 + $0x2a8] ss:$12 sps:$4 sm:$0xff]  }
  0x27   : > { %v5912_v48 = vld [vmem:[%s9153_s1 + $0xf4] ss:$12 sps:$4 sm:$0xff]   ;;  %v5916_v52 = vld [vmem:[%s9153_s1 + $0x1b8] ss:$12 sps:$4 sm:$0xff]   ;;  %v5927_v1 = vld [vmem:[%s9153_s1 + $0x13c] ss:$12 sps:$4 sm:$0xff]  }
  0x28   : > { %1817 = vmatpush1.bf16.msra.mxu0 %v5885_v19  ;;  %5403 = vmatpush3.bf16.msra.mxu1 %v5886_v20  ;;  %v335_v54 = vld [vmem:[%s6576_s12 + $0x80] sm:$0xff]  ;;  %v5926_v63 = vld [vmem:[%s9153_s1 + $0x1e8] ss:$12 sps:$4 sm:$0xff]   ;;  %v5935_v10 = vld [vmem:[%s9153_s1 + $0x150] ss:$12 sps:$4 sm:$0xff]  }
  0x29   : > { %1818 = vmatprep.subr.bf16.mxu0 %v5887_v21  ;;  %5404 = vmatprep.subr.bf16.mxu1 %v5889_v22  ;;  %v339_v55 = vld [vmem:[%s6576_s12 + $0xa0] sm:$0xff]  ;;  %v320_v12 = vld [vmem:[%s6576_s12 + $0x8] sm:$0xff]  ;;  %v5939_v16 = vld [vmem:[%s9153_s1 + $0x2f0] ss:$12 sps:$4 sm:$0xff]  }
  0x2a   : > { %v6735_v57 = vcombine.high %v335_v54, %v339_v55  ;;  %v5922_v60 = vld [vmem:[%s9153_s1 + $0x124] ss:$12 sps:$4 sm:$0xff]   ;;  %v5925_v62 = vld [vmem:[%s9153_s1 + $0x120] ss:$12 sps:$4 sm:$0xff]   ;;  %v6757_v0 = vcombine.low %v335_v54, %v339_v55  ;;  %v5940_v18 = vld [vmem:[%s9153_s1 + $0x168] ss:$12 sps:$4 sm:$0xff]  }
  0x2b   : > { %v343_v2 = vld [vmem:[%s6576_s12 + $0xc0] sm:$0xff]  ;;  %v324_v13 = vld [vmem:[%s6576_s12 + $0x28] sm:$0xff]  ;;  %v5941_v19 = vld [vmem:[%s9153_s1 + $0x230] ss:$12 sps:$4 sm:$0xff]  }
  0x2c   : > { %1819 = vmatpush1.bf16.msra.mxu0 %v5890_v23  ;;  %5405 = vmatpush3.bf16.msra.mxu1 %v5891_v24  ;;  %v347_v3 = vld [vmem:[%s6576_s12 + $0xe0] sm:$0xff]  ;;  %v5937_v15 = vld [vmem:[%s9153_s1 + $0x16c] ss:$12 sps:$4 sm:$0xff]   ;;  %v6799_v17 = vcombine.high %v320_v12, %v324_v13  ;;  %v5945_v21 = vld [vmem:[%s9153_s1 + $0x3c8] ss:$12 sps:$4 sm:$0xff]  }
  0x2d   : > { %1820 = vmatprep.subr.bf16.mxu0 %v5892_v25  ;;  %5406 = vmatprep.subr.bf16.mxu1 %v5894_v26  ;;  %v5929_v4 = vld [vmem:[%s9153_s1 + $0x2c0] ss:$12 sps:$4 sm:$0xff]   ;;  %v6767_v5 = vcombine.high %v343_v2, %v347_v3  ;;  %v5930_v6 = vld [vmem:[%s9153_s1 + $0x138] ss:$12 sps:$4 sm:$0xff]   ;;  %v6786_v11 = vcombine.low %v343_v2, %v347_v3  ;;  %v6820_v25 = vcombine.low %v320_v12, %v324_v13  ;;  %v5946_v26 = vld [vmem:[%s9153_s1 + $0x308] ss:$12 sps:$4 sm:$0xff]  }
  0x2e   : > { %v5931_v7 = vld [vmem:[%s9153_s1 + $0x200] ss:$12 sps:$4 sm:$0xff]   ;;  %v5934_v9 = vld [vmem:[%s9153_s1 + $0x2d8] ss:$12 sps:$4 sm:$0xff]   ;;  %v5961_v43 = vld [vmem:[%s9153_s1 + $0x350] ss:$12 sps:$4 sm:$0xff]  }
  0x2f   : > { %v5932_v8 = vld [vmem:[%s9153_s1 + $0x154] ss:$12 sps:$4 sm:$0xff]   ;;  %v5936_v14 = vld [vmem:[%s9153_s1 + $0x218] ss:$12 sps:$4 sm:$0xff]   ;;  %v328_v23 = vld [vmem:[%s6576_s12 + $0x48] sm:$0xff] }
  0x30   : > { %1821 = vmatpush1.bf16.msra.mxu0 %v5895_v27  ;;  %5407 = vmatpush3.bf16.msra.mxu1 %v5896_v28  ;;  %v5944_v20 = vld [vmem:[%s9153_s1 + $0x184] ss:$12 sps:$4 sm:$0xff]   ;;  %v5942_v22 = vld [vmem:[%s9153_s1 + $0x180] ss:$12 sps:$4 sm:$0xff]   ;;  %v5949_v27 = vld [vmem:[%s9153_s1 + $0x19c] ss:$12 sps:$4 sm:$0xff]  }
  0x31   : > { %1822 = vmatprep.subr.bf16.mxu0 %v5897_v29  ;;  %5408 = vmatprep.subr.bf16.mxu1 %v5899_v30  ;;  %v332_v24 = vld [vmem:[%s6576_s12 + $0x68] sm:$0xff]  ;;  %v5947_v30 = vld [vmem:[%s9153_s1 + $0x198] ss:$12 sps:$4 sm:$0xff]   ;;  %v5954_v32 = vld [vmem:[%s9153_s1 + $0x1b4] ss:$12 sps:$4 sm:$0xff]  }
  0x32   : > { %v5950_v28 = vld [vmem:[%s9153_s1 + $0x3e0] ss:$12 sps:$4 sm:$0xff]   ;;  %v6831_v29 = vcombine.high %v328_v23, %v332_v24  ;;  %v5964_v44 = vld [vmem:[%s9153_s1 + $0x1e4] ss:$12 sps:$4 sm:$0xff]   ;;  %v5977_v2 = vld [vmem:[%s9153_s1 + $0x228] ss:$12 sps:$4 sm:$0xff]  }
  0x33   : > { %v5951_v31 = vld [vmem:[%s9153_s1 + $0x320] ss:$12 sps:$4 sm:$0xff]   ;;  %v5967_v54 = vld [vmem:[%s9153_s1 + $0x1f8] ss:$12 sps:$4 sm:$0xff]   ;;  %v5981_v3 = vld [vmem:[%s9153_s1 + $0x3b0] ss:$12 sps:$4 sm:$0xff]  }
  0x34   : > { %1823 = vmatpush1.bf16.msra.mxu0 %v5900_v33  ;;  %5409 = vmatpush3.bf16.msra.mxu1 %v5901_v35  ;;  %v5955_v33 = vld [vmem:[%s9153_s1 + $0x3f8] ss:$12 sps:$4 sm:$0xff]   ;;  %v336_v34 = vld [vmem:[%s6576_s12 + $0x88] sm:$0xff] }
  0x35   : > { %1824 = vmatprep.subr.bf16.mxu0 %v5902_v36  ;;  %5434 = vmatprep.subr.bf16.mxu1 %v5904_v37  ;;  %v340_v35 = vld [vmem:[%s6576_s12 + $0xa8] sm:$0xff]  ;;  %v5952_v36 = vld [vmem:[%s9153_s1 + $0x1b0] ss:$12 sps:$4 sm:$0xff]   ;;  %v6854_v37 = vcombine.low %v328_v23, %v332_v24 }
  0x36   : > { %v5971_v55 = vld [vmem:[%s9153_s1 + $0x380] ss:$12 sps:$4 sm:$0xff]   ;;  %v6000_v24 = vld [vmem:[%s9153_s1 + $0x590] ss:$12 sps:$4 sm:$0xff]  }
  0x37   : > { %2133 = vmatmul.mubr.bf16.vlgmr.msra.gmra.mrb[0].mxu1 %v6690_v39  ;;  %v5990_v12 = vld [vmem:[%s9153_s1 + $0x560] ss:$12 sps:$4 sm:$0xff]  }
  0x38   : > { %1825 = vmatpush1.bf16.msra.mxu0 %v5905_v38  ;;  %5435 = vmatpush3.bf16.msra.mxu1 %v5906_v40  ;;  %v5956_v38 = vld [vmem:[%s9153_s1 + $0x338] ss:$12 sps:$4 sm:$0xff]   ;;  %v5960_v40 = vld [vmem:[%s9153_s1 + $0x410] ss:$12 sps:$4 sm:$0xff]  }
  0x39   : > { %1826 = vmatprep.subr.bf16.mxu0 %v5907_v41  ;;  %5436 = vmatprep.subr.bf16.mxu1 %v5909_v42  ;;  %v6865_v41 = vcombine.high %v336_v34, %v340_v35  ;;  %v5957_v42 = vld [vmem:[%s9153_s1 + $0x1c8] ss:$12 sps:$4 sm:$0xff]   ;;  %v5999_v23 = vld [vmem:[%s9153_s1 + $0x28c] ss:$12 sps:$4 sm:$0xff]  }
  0x3a   : > { %2140 = vmatprep.mubr.bf16.mxu1 %v6703_v45 }
  0x3c   : > { %1827 = vmatpush1.bf16.msra.mxu0 %v5910_v46  ;;  %5437 = vmatpush3.bf16.msra.mxu1 %v5911_v47  ;;  %v5965_v46 = vld [vmem:[%s9153_s1 + $0x428] ss:$12 sps:$4 sm:$0xff]  }
  0x3d   : > { %1828 = vmatprep.subr.bf16.mxu0 %v5912_v48  ;;  %5438 = vmatprep.subr.bf16.mxu1 %v5914_v49  ;;  %v344_v47 = vld [vmem:[%s6576_s12 + $0xc8] sm:$0xff]  ;;  %v6888_v49 = vcombine.low %v336_v34, %v340_v35 }
  0x3e   : > { %v348_v48 = vld [vmem:[%s6576_s12 + $0xe8] sm:$0xff] }
  0x3f   : > { %2141 = vmatmul.mubr.bf16.gmra.mrb[4].mxu1 %v6722_v51  ;;  %v6002_v34 = vld [vmem:[%s9153_s1 + $0x2a0] ss:$12 sps:$4 sm:$0xff]  }
  0x40   : > { %1829 = vmatpush1.bf16.msra.mxu0 %v5915_v50  ;;  %5439 = vmatpush3.bf16.msra.mxu1 %v5916_v52  ;;  %v5966_v50 = vld [vmem:[%s9153_s1 + $0x368] ss:$12 sps:$4 sm:$0xff]   ;;  %v5970_v52 = vld [vmem:[%s9153_s1 + $0x440] ss:$12 sps:$4 sm:$0xff]  }
  0x41   : > { %1830 = vmatprep.subr.bf16.mxu0 %v5917_v53  ;;  %5440 = vmatprep.subr.bf16.mxu1 %v5919_v56  ;;  %v6899_v53 = vcombine.high %v344_v47, %v348_v48  ;;  %v5974_v56 = vld [vmem:[%s9153_s1 + $0x214] ss:$12 sps:$4 sm:$0xff]  }
  0x42   : > { %2148 = vmatprep.mubr.bf16.mxu1 %v6735_v57 }
  0x44   : > { %1831 = vmatpush1.bf16.msra.mxu0 %v5920_v58  ;;  %5441 = vmatpush3.bf16.msra.mxu1 %v5921_v59  ;;  %v5972_v58 = vld [vmem:[%s9153_s1 + $0x210] ss:$12 sps:$4 sm:$0xff]  }
  0x45   : > { %1832 = vmatprep.subr.bf16.mxu0 %v5922_v60  ;;  %5442 = vmatprep.subr.bf16.mxu1 %v5924_v61  ;;  %v321_v59 = vld [vmem:[%s6576_s12 + $0x10] sm:$0xff]  ;;  %v6922_v61 = vcombine.low %v344_v47, %v348_v48  ;;  %v326_v47 = vld [vmem:[%s6576_s12 + $0x38] sm:$0xff] }
  0x46   : > { %v325_v60 = vld [vmem:[%s6576_s12 + $0x30] sm:$0xff] }
  0x47   : > { %2149 = vmatmul.mubr.bf16.gmra.mrb[8].mxu1 %v6757_v0  ;;  %v6012_v48 = vld [vmem:[%s9153_s1 + $0x2d0] ss:$12 sps:$4 sm:$0xff]  }
  0x48   : > { %1833 = vmatpush1.bf16.msra.mxu0 %v5925_v62  ;;  %5443 = vmatpush3.bf16.msra.mxu1 %v5926_v63  ;;  %v5976_v62 = vld [vmem:[%s9153_s1 + $0x398] ss:$12 sps:$4 sm:$0xff]  }
  0x49   : > { %1834 = vmatprep.subr.bf16.mxu0 %v5927_v1  ;;  %5444 = vmatprep.subr.bf16.mxu1 %v5929_v4  ;;  %v5979_v63 = vld [vmem:[%s9153_s1 + $0x22c] ss:$12 sps:$4 sm:$0xff]   ;;  %v6933_v1 = vcombine.high %v321_v59, %v325_v60  ;;  %v5984_v4 = vld [vmem:[%s9153_s1 + $0x244] ss:$12 sps:$4 sm:$0xff]  }
  0x4a   : > { %2156 = vmatprep.mubr.bf16.mxu1 %v6767_v5 }
  0x4c   : > { %1835 = vmatpush1.bf16.msra.mxu0 %v5930_v6  ;;  %5445 = vmatpush3.bf16.msra.mxu1 %v5931_v7  ;;  %v329_v6 = vld [vmem:[%s6576_s12 + $0x50] sm:$0xff] }
  0x4d   : > { %1836 = vmatprep.subr.bf16.mxu0 %v5932_v8  ;;  %5446 = vmatprep.subr.bf16.mxu1 %v5934_v9  ;;  %v333_v7 = vld [vmem:[%s6576_s12 + $0x70] sm:$0xff]  ;;  %v6953_v8 = vcombine.low %v321_v59, %v325_v60  ;;  %v5982_v9 = vld [vmem:[%s9153_s1 + $0x240] ss:$12 sps:$4 sm:$0xff]   ;;  %v330_v59 = vld [vmem:[%s6576_s12 + $0x58] sm:$0xff] }
  0x4e   : > { %v6967_v13 = vcombine.high %v329_v6, %v333_v7  ;;  %v334_v60 = vld [vmem:[%s6576_s12 + $0x78] sm:$0xff] }
  0x4f   : > { %2157 = vmatmul.mubr.bf16.gmra.mrb[12].mxu1 %v6786_v11 }
  0x50   : > { %1837 = vmatpush1.bf16.msra.mxu0 %v5935_v10  ;;  %5447 = vmatpush3.bf16.msra.mxu1 %v5936_v14  ;;  %v5986_v10 = vld [vmem:[%s9153_s1 + $0x488] ss:$12 sps:$4 sm:$0xff]   ;;  %v5987_v14 = vld [vmem:[%s9153_s1 + $0x258] ss:$12 sps:$4 sm:$0xff]  }
  0x51   : > { %1838 = vmatprep.subr.bf16.mxu0 %v5937_v15  ;;  %5448 = vmatprep.subr.bf16.mxu1 %v5939_v16  ;;  %v5991_v15 = vld [vmem:[%s9153_s1 + $0x4a0] ss:$12 sps:$4 sm:$0xff]  }
  0x52   : > { %2197 = vmatprep.mubr.bf16.mxu1 %v6799_v17  ;;  %v5994_v16 = vld [vmem:[%s9153_s1 + $0x274] ss:$12 sps:$4 sm:$0xff]  }
  0x54   : > { %1839 = vmatpush1.bf16.msra.mxu0 %v5940_v18  ;;  %5449 = vmatpush3.bf16.msra.mxu1 %v5941_v19  ;;  %v5992_v18 = vld [vmem:[%s9153_s1 + $0x270] ss:$12 sps:$4 sm:$0xff]  }
  0x55   : > { %1881 = vmatprep.subr.bf16.mxu0 %v5944_v20  ;;  %5474 = vmatprep.subr.bf16.mxu1 %v5945_v21  ;;  %v337_v19 = vld [vmem:[%s6576_s12 + $0x90] sm:$0xff]  ;;  %v6988_v21 = vcombine.low %v329_v6, %v333_v7  ;;  %v342_v6 = vld [vmem:[%s6576_s12 + $0xb8] sm:$0xff]  ;;  %v7103_v7 = vcombine.low %v330_v59, %v334_v60 }
  0x56   : > { %v341_v20 = vld [vmem:[%s6576_s12 + $0xb0] sm:$0xff] }
  0x57   : > { %1841 = vmatmul.mubr.bf16.vlgmr.msra.gmra.mrb[0].mxu0 %v6690_v39  ;;  %2198 = vmatmul.mubr.bf16.vlgmr.msra.gmra.mrb[16].mxu1 %v6820_v25  ;;  %v5959_v39 = vld [vmem:[%s9153_s1 + $0x1cc] ss:$12 sps:$4 sm:$0xff]   ;;  %v7020_v35 = vcombine.low %v337_v19, %v341_v20 }
  0x58   : > { %1882 = vmatpush1.bf16.msra.mxu0 %v5942_v22  ;;  %5475 = vmatpush3.bf16.msra.mxu1 %v5946_v26  ;;  %v5996_v22 = vld [vmem:[%s9153_s1 + $0x4b8] ss:$12 sps:$4 sm:$0xff]   ;;  %v6999_v26 = vcombine.high %v337_v19, %v341_v20  ;;  %v6093_v20 = vld [vmem:[%s9154_s2] ss:$12 sps:$4 sm:$0xff]  }
  0x59   : > { %1883 = vmatprep.subr.bf16.mxu0 %v5949_v27  ;;  %5476 = vmatprep.subr.bf16.mxu1 %v5950_v28  ;;  %v5997_v27 = vld [vmem:[%s9153_s1 + $0x288] ss:$12 sps:$4 sm:$0xff]   ;;  %v6001_v28 = vld [vmem:[%s9153_s1 + $0x4d0] ss:$12 sps:$4 sm:$0xff]  }
  0x5a   : > { %2205 = vmatprep.mubr.bf16.mxu1 %v6831_v29  ;;  %1850 = vmatprep.mubr.bf16.mxu0 %v6703_v45  ;;  %v5962_v45 = vld [vmem:[%s9153_s1 + $0x1e0] ss:$12 sps:$4 sm:$0xff]   ;;  %v6091_v19 = vld [vmem:[%s9154_s2 + $0x4] ss:$12 sps:$4 sm:$0xff]  }
  0x5c   : > { %1884 = vmatpush1.bf16.msra.mxu0 %v5947_v30  ;;  %5477 = vmatpush3.bf16.msra.mxu1 %v5951_v31  ;;  %v6004_v30 = vld [vmem:[%s9153_s1 + $0x2a4] ss:$12 sps:$4 sm:$0xff]   ;;  %v6005_v31 = vld [vmem:[%s9153_s1 + $0x5a8] ss:$12 sps:$4 sm:$0xff]  }
  0x5d   : > { %1885 = vmatprep.subr.bf16.mxu0 %v5954_v32  ;;  %5478 = vmatprep.subr.bf16.mxu1 %v5955_v33  ;;  %v345_v32 = vld [vmem:[%s6576_s12 + $0xd0] sm:$0xff] }
  0x5e   : > { %v349_v33 = vld [vmem:[%s6576_s12 + $0xf0] sm:$0xff] }
  0x5f   : > { %1851 = vmatmul.mubr.bf16.gmra.mrb[4].mxu0 %v6722_v51  ;;  %2206 = vmatmul.mubr.bf16.gmra.mrb[20].mxu1 %v6854_v37  ;;  %v5969_v51 = vld [vmem:[%s9153_s1 + $0x1fc] ss:$12 sps:$4 sm:$0xff]  }
  0x60   : > { %1886 = vmatpush1.bf16.msra.mxu0 %v5952_v36  ;;  %5479 = vmatpush3.bf16.msra.mxu1 %v5956_v38  ;;  %v6006_v36 = vld [vmem:[%s9153_s1 + $0x4e8] ss:$12 sps:$4 sm:$0xff]  }
  0x61   : > { %1887 = vmatprep.subr.bf16.mxu0 %v5959_v39  ;;  %5480 = vmatprep.subr.bf16.mxu1 %v5960_v40  ;;  %v6009_v38 = vld [vmem:[%s9153_s1 + $0x2bc] ss:$12 sps:$4 sm:$0xff]   ;;  %v6010_v39 = vld [vmem:[%s9153_s1 + $0x5c0] ss:$12 sps:$4 sm:$0xff]   ;;  %v7031_v40 = vcombine.high %v345_v32, %v349_v33 }
  0x62   : > { %2213 = vmatprep.mubr.bf16.mxu1 %v6865_v41  ;;  %1860 = vmatprep.mubr.bf16.mxu0 %v6735_v57  ;;  %v5975_v57 = vld [vmem:[%s9153_s1 + $0x458] ss:$12 sps:$4 sm:$0xff]  }
  0x64   : > { %1888 = vmatpush1.bf16.msra.mxu0 %v5957_v42  ;;  %5481 = vmatpush3.bf16.msra.mxu1 %v5961_v43  ;;  %v6007_v42 = vld [vmem:[%s9153_s1 + $0x2b8] ss:$12 sps:$4 sm:$0xff]   ;;  %v6011_v43 = vld [vmem:[%s9153_s1 + $0x500] ss:$12 sps:$4 sm:$0xff]  }
  0x65   : > { %1889 = vmatprep.subr.bf16.mxu0 %v5964_v44  ;;  %5482 = vmatprep.subr.bf16.mxu1 %v5965_v46  ;;  %v6014_v44 = vld [vmem:[%s9153_s1 + $0x2d4] ss:$12 sps:$4 sm:$0xff]   ;;  %v322_v46 = vld [vmem:[%s6576_s12 + $0x18] sm:$0xff] }
  0x67   : > { %1861 = vmatmul.mubr.bf16.gmra.mrb[8].mxu0 %v6757_v0  ;;  %2214 = vmatmul.mubr.bf16.gmra.mrb[24].mxu1 %v6888_v49  ;;  %v5980_v0 = vld [vmem:[%s9153_s1 + $0x470] ss:$12 sps:$4 sm:$0xff]  }
  0x68   : > { %1890 = vmatpush1.bf16.msra.mxu0 %v5962_v45  ;;  %5483 = vmatpush3.bf16.msra.mxu1 %v5966_v50  ;;  %v6015_v45 = vld [vmem:[%s9153_s1 + $0x5d8] ss:$12 sps:$4 sm:$0xff]   ;;  %v7052_v50 = vcombine.low %v345_v32, %v349_v33  ;;  %v6046_v33 = vld [vmem:[%s9153_s1 + $0x3c0] ss:$12 sps:$4 sm:$0xff]  }
  0x69   : > { %1891 = vmatprep.subr.bf16.mxu0 %v5969_v51  ;;  %5484 = vmatprep.subr.bf16.mxu1 %v5970_v52  ;;  %v6016_v51 = vld [vmem:[%s9153_s1 + $0x518] ss:$12 sps:$4 sm:$0xff]  }
  0x6a   : > { %2221 = vmatprep.mubr.bf16.mxu1 %v6899_v53  ;;  %1870 = vmatprep.mubr.bf16.mxu0 %v6767_v5  ;;  %v5985_v5 = vld [vmem:[%s9153_s1 + $0x548] ss:$12 sps:$4 sm:$0xff]   ;;  %v6019_v52 = vld [vmem:[%s9153_s1 + $0x2ec] ss:$12 sps:$4 sm:$0xff]   ;;  %v6048_v32 = vld [vmem:[%s9153_s1 + $0x3c4] ss:$12 sps:$4 sm:$0xff]  }
  0x6c   : > { %1892 = vmatpush1.bf16.msra.mxu0 %v5967_v54  ;;  %5485 = vmatpush3.bf16.msra.mxu1 %v5971_v55  ;;  %v6020_v54 = vld [vmem:[%s9153_s1 + $0x5f0] ss:$12 sps:$4 sm:$0xff]   ;;  %v7063_v55 = vcombine.high %v322_v46, %v326_v47 }
  0x6d   : > { %1893 = vmatprep.subr.bf16.mxu0 %v5974_v56  ;;  %5486 = vmatprep.subr.bf16.mxu1 %v5975_v57  ;;  %v6017_v56 = vld [vmem:[%s9153_s1 + $0x2e8] ss:$12 sps:$4 sm:$0xff]   ;;  %v6021_v57 = vld [vmem:[%s9153_s1 + $0x530] ss:$12 sps:$4 sm:$0xff]  }
  0x6f   : > { %1871 = vmatmul.mubr.bf16.gmra.mrb[12].mxu0 %v6786_v11  ;;  %2222 = vmatmul.mubr.bf16.gmra.mrb[28].mxu1 %v6922_v61  ;;  %v5989_v11 = vld [vmem:[%s9153_s1 + $0x25c] ss:$12 sps:$4 sm:$0xff]  }
  0x70   : > { %1894 = vmatpush1.bf16.msra.mxu0 %v5972_v58  ;;  %5487 = vmatpush3.bf16.msra.mxu1 %v5976_v62  ;;  %v6024_v58 = vld [vmem:[%s9153_s1 + $0x304] ss:$12 sps:$4 sm:$0xff]   ;;  %v7078_v62 = vcombine.low %v322_v46, %v326_v47  ;;  %v6127_v46 = vld [vmem:[%s9154_s2 + $0x94] ss:$12 sps:$4 sm:$0xff]   ;;  %v6057_v47 = vld [vmem:[%s9153_s1 + $0x40c] ss:$12 sps:$4 sm:$0xff]  }
  0x71   : > { %1895 = vmatprep.subr.bf16.mxu0 %v5979_v63  ;;  %5488 = vmatprep.subr.bf16.mxu1 %v5980_v0  ;;  %v6022_v63 = vld [vmem:[%s9153_s1 + $0x300] ss:$12 sps:$4 sm:$0xff]   ;;  %v6027_v0 = vld [vmem:[%s9153_s1 + $0x31c] ss:$12 sps:$4 sm:$0xff]  }
  0x72   : > { %2262 = vmatprep.mubr.bf16.mxu1 %v6933_v1  ;;  %1913 = vmatprep.mubr.bf16.mxu0 %v6799_v17  ;;  %v5995_v17 = vld [vmem:[%s9153_s1 + $0x578] ss:$12 sps:$4 sm:$0xff]  }
  0x74   : > { %1896 = vmatpush1.bf16.msra.mxu0 %v5977_v2  ;;  %5489 = vmatpush3.bf16.msra.mxu1 %v5981_v3  ;;  %v7086_v2 = vcombine.high %v330_v59, %v334_v60  ;;  %v6025_v3 = vld [vmem:[%s9153_s1 + $0x318] ss:$12 sps:$4 sm:$0xff]   ;;  %v6063_v59 = vld [vmem:[%s9153_s1 + $0x43c] ss:$12 sps:$4 sm:$0xff]  }
  0x75   : > { %1897 = vmatprep.subr.bf16.mxu0 %v5984_v4  ;;  %5514 = vmatprep.subr.bf16.mxu1 %v5985_v5  ;;  %v6030_v4 = vld [vmem:[%s9153_s1 + $0x334] ss:$12 sps:$4 sm:$0xff]   ;;  %v338_v5 = vld [vmem:[%s6576_s12 + $0x98] sm:$0xff] }
  0x76   : > { %v6061_v60 = vld [vmem:[%s9153_s1 + $0x438] ss:$12 sps:$4 sm:$0xff]  }
  0x77   : > { %2263 = vmatmul.mubr.bf16.vlgmr.msra.gmra.mrb[32].mxu1 %v6953_v8 }
  0x78   : > { %1898 = vmatpush1.bf16.msra.mxu0 %v5982_v9  ;;  %5515 = vmatpush3.bf16.msra.mxu1 %v5986_v10  ;;  %v6033_v9 = vld [vmem:[%s9153_s1 + $0x34c] ss:$12 sps:$4 sm:$0xff]   ;;  %v7108_v10 = vcombine.high %v338_v5, %v342_v6 }
  0x79   : > { %1899 = vmatprep.subr.bf16.mxu0 %v5989_v11  ;;  %5516 = vmatprep.subr.bf16.mxu1 %v5990_v12  ;;  %v6036_v11 = vld [vmem:[%s9153_s1 + $0x364] ss:$12 sps:$4 sm:$0xff]   ;;  %v346_v12 = vld [vmem:[%s6576_s12 + $0xd8] sm:$0xff] }
  0x7a   : > { %2270 = vmatprep.mubr.bf16.mxu1 %v6967_v13 }
  0x7c   : > { %1900 = vmatpush1.bf16.msra.mxu0 %v5987_v14  ;;  %5517 = vmatpush3.bf16.msra.mxu1 %v5991_v15  ;;  %v350_v14 = vld [vmem:[%s6576_s12 + $0xf8] sm:$0xff]  ;;  %v7125_v15 = vcombine.low %v338_v5, %v342_v6  ;;  %v7259_v5 = vld [vmem:[%s9154_s2 + $0x20] ss:$12 sps:$4 sm:$0xff]  }
  0x7d   : > { %1901 = vmatprep.subr.bf16.mxu0 %v5994_v16  ;;  %5518 = vmatprep.subr.bf16.mxu1 %v5995_v17  ;;  %v6039_v16 = vld [vmem:[%s9153_s1 + $0x37c] ss:$12 sps:$4 sm:$0xff]   ;;  %v7130_v17 = vcombine.high %v346_v12, %v350_v14 }
  0x7e   : > { %v6064_v6 = vld [vmem:[%s9153_s1 + $0x450] ss:$12 sps:$4 sm:$0xff]  }
  0x7f   : > { %2271 = vmatmul.mubr.bf16.gmra.mrb[36].mxu1 %v6988_v21 }
  0x80   : > { %1902 = vmatpush1.bf16.msra.mxu0 %v5992_v18  ;;  %5519 = vmatpush3.bf16.msra.mxu1 %v5996_v22  ;;  %v6037_v18 = vld [vmem:[%s9153_s1 + $0x378] ss:$12 sps:$4 sm:$0xff]  }
  0x81   : > { %1903 = vmatprep.subr.bf16.mxu0 %v5999_v23  ;;  %5520 = vmatprep.subr.bf16.mxu1 %v6000_v24  ;;  %v6099_v22 = vld [vmem:[%s9154_s2 + $0x18] ss:$12 sps:$4 sm:$0xff]   ;;  %v6040_v23 = vld [vmem:[%s9153_s1 + $0x390] ss:$12 sps:$4 sm:$0xff]   ;;  %v7157_v24 = vcombine.low %v346_v12, %v350_v14  ;;  %v6070_v14 = vld [vmem:[%s9153_s1 + $0x480] ss:$12 sps:$4 sm:$0xff]  }
  0x82   : > { %2278 = vmatprep.mubr.bf16.mxu1 %v6999_v26  ;;  %v7288_v12 = vld [vmem:[%s9154_s2 + $0x50] ss:$12 sps:$4 sm:$0xff]  }
  0x84   : > { %1904 = vmatpush1.bf16.msra.mxu0 %v5997_v27  ;;  %5521 = vmatpush3.bf16.msra.mxu1 %v6001_v28  ;;  %v6103_v27 = vld [vmem:[%s9154_s2 + $0x34] ss:$12 sps:$4 sm:$0xff]  }
  0x85   : > { %1905 = vmatprep.subr.bf16.mxu0 %v6004_v30  ;;  %5522 = vmatprep.subr.bf16.mxu1 %v6005_v31  ;;  %v6043_v28 = vld [vmem:[%s9153_s1 + $0x3a8] ss:$12 sps:$4 sm:$0xff]   ;;  %v6105_v30 = vld [vmem:[%s9154_s2 + $0x30] ss:$12 sps:$4 sm:$0xff]   ;;  %v6109_v31 = vld [vmem:[%s9154_s2 + $0x4c] ss:$12 sps:$4 sm:$0xff]  }
  0x87   : > { %2279 = vmatmul.mubr.bf16.gmra.mrb[40].mxu1 %v7020_v35 }
  0x88   : > { %1906 = vmatpush1.bf16.msra.mxu0 %v6002_v34  ;;  %5523 = vmatpush3.bf16.msra.mxu1 %v6006_v36  ;;  %v6111_v34 = vld [vmem:[%s9154_s2 + $0x48] ss:$12 sps:$4 sm:$0xff]   ;;  %v6115_v36 = vld [vmem:[%s9154_s2 + $0x64] ss:$12 sps:$4 sm:$0xff]  }
  0x89   : > { %1907 = vmatprep.subr.bf16.mxu0 %v6009_v38  ;;  %5524 = vmatprep.subr.bf16.mxu1 %v6010_v39  ;;  %v6049_v38 = vld [vmem:[%s9153_s1 + $0x3d8] ss:$12 sps:$4 sm:$0xff]   ;;  %v6117_v39 = vld [vmem:[%s9154_s2 + $0x60] ss:$12 sps:$4 sm:$0xff]  }
  0x8a   : > { %2286 = vmatprep.mubr.bf16.mxu1 %v7031_v40 }
  0x8c   : > { %1908 = vmatpush1.bf16.msra.mxu0 %v6007_v42  ;;  %5525 = vmatpush3.bf16.msra.mxu1 %v6011_v43  ;;  %v6121_v42 = vld [vmem:[%s9154_s2 + $0x7c] ss:$12 sps:$4 sm:$0xff]   ;;  %v6054_v43 = vld [vmem:[%s9153_s1 + $0x3f4] ss:$12 sps:$4 sm:$0xff]  }
  0x8d   : > { %1909 = vmatprep.subr.bf16.mxu0 %v6014_v44  ;;  %5526 = vmatprep.subr.bf16.mxu1 %v6015_v45  ;;  %v6052_v44 = vld [vmem:[%s9153_s1 + $0x3f0] ss:$12 sps:$4 sm:$0xff]   ;;  %v6123_v45 = vld [vmem:[%s9154_s2 + $0x78] ss:$12 sps:$4 sm:$0xff]  }
  0x8f   : > { %2287 = vmatmul.mubr.bf16.gmra.mrb[44].mxu1 %v7052_v50 }
  0x90   : > { %1910 = vmatpush1.bf16.msra.mxu0 %v6012_v48  ;;  %5527 = vmatpush3.bf16.msra.mxu1 %v6016_v51  ;;  %v6055_v48 = vld [vmem:[%s9153_s1 + $0x408] ss:$12 sps:$4 sm:$0xff]   ;;  %v6129_v51 = vld [vmem:[%s9154_s2 + $0x90] ss:$12 sps:$4 sm:$0xff]  }
  0x91   : > { %1911 = vmatprep.subr.bf16.mxu0 %v6019_v52  ;;  %5528 = vmatprep.subr.bf16.mxu1 %v6020_v54  ;;  %v6133_v52 = vld [vmem:[%s9154_s2 + $0xac] ss:$12 sps:$4 sm:$0xff]   ;;  %v6060_v54 = vld [vmem:[%s9153_s1 + $0x424] ss:$12 sps:$4 sm:$0xff]  }
  0x92   : > { %2327 = vmatprep.mubr.bf16.mxu1 %v7063_v55 }
  0x94   : > { %1912 = vmatpush1.bf16.msra.mxu0 %v6017_v56  ;;  %5529 = vmatpush3.bf16.msra.mxu1 %v6021_v57  ;;  %v6135_v56 = vld [vmem:[%s9154_s2 + $0xa8] ss:$12 sps:$4 sm:$0xff]   ;;  %v7232_v57 = vld [vmem:[#allocation3] sm:$0xff] }
  0x95   : > { %1954 = vmatprep.subr.bf16.mxu0 %v6024_v58  ;;  %2652 = vmatprep.subr.bf16.mxu1 %v6091_v19  ;;  %v6058_v58 = vld [vmem:[%s9153_s1 + $0x420] ss:$12 sps:$4 sm:$0xff]   ;;  %v6076_v19 = vld [vmem:[%s9153_s1 + $0x4b0] ss:$12 sps:$4 sm:$0xff]  }
  0x97   : > { %1914 = vmatmul.mubr.bf16.vlgmr.msra.gmra.mrb[0].mxu0 %v6820_v25  ;;  %2328 = vmatmul.mubr.bf16.vlgmr.msra.gmra.mrb[48].mxu1 %v7078_v62  ;;  %v6028_v25 = vld [vmem:[%s9153_s1 + $0x330] ss:$12 sps:$4 sm:$0xff]  }
  0x98   : > { %1955 = vmatpush1.bf16.msra.mxu0 %v6022_v63  ;;  %2335 = vmatprep.mubr.bf16.mxu1 %v7086_v2  ;;  %v7245_v63 = vpack.c.bf16 %v7232_v57, %v7232_v57 }
  0x99   : > { %1956 = vmatprep.subr.bf16.mxu0 %v6027_v0  ;;  %1923 = vmatprep.mubr.bf16.mxu0 %v6831_v29  ;;  %v6031_v29 = vld [vmem:[%s9153_s1 + $0x348] ss:$12 sps:$4 sm:$0xff]  }
  0x9a   : > { %2653 = vmatpush1.bf16.msra.mxu1 %v6093_v20  ;;  %v6066_v0 = vld [vmem:[%s9153_s1 + $0x454] ss:$12 sps:$4 sm:$0xff]   ;;  %v7331_v20 = vld [vmem:[%s9154_s2 + $0x98] ss:$12 sps:$4 sm:$0xff]  }
  0x9c   : > { %1957 = vmatpush1.bf16.msra.mxu0 %v6025_v3  ;;  %v7253_v3 = vld [vmem:[%s9154_s2 + $0x8] ss:$12 sps:$4 sm:$0xff]  }
  0x9d   : > { %1958 = vmatprep.subr.bf16.mxu0 %v6030_v4  ;;  %v9163_v4 = vmov 0.0  }
  0x9f   : > { %1924 = vmatmul.mubr.bf16.gmra.mrb[4].mxu0 %v6854_v37  ;;  %2336 = vmatmul.mubr.bf16.gmra.mrb[52].mxu1 %v7103_v7  ;;  %v6034_v37 = vld [vmem:[%s9153_s1 + $0x360] ss:$12 sps:$4 sm:$0xff]  }
  0xa0   : > { %1959 = vmatpush1.bf16.msra.mxu0 %v6028_v25  ;;  %2343 = vmatprep.mubr.bf16.mxu1 %v7108_v10  ;;  %v6069_v25 = vld [vmem:[%s9153_s1 + $0x46c] ss:$12 sps:$4 sm:$0xff]  }
  0xa1   : > { %1960 = vmatprep.subr.bf16.mxu0 %v6033_v9  ;;  %1933 = vmatprep.mubr.bf16.mxu0 %v6865_v41  ;;  %v6042_v41 = vld [vmem:[%s9153_s1 + $0x394] ss:$12 sps:$4 sm:$0xff]   ;;  %v7275_v9 = vld [vmem:[%s9154_s2 + $0x38] ss:$12 sps:$4 sm:$0xff]  }
  0xa4   : > { %1961 = vmatpush1.bf16.msra.mxu0 %v6031_v29  ;;  %v6067_v29 = vld [vmem:[%s9153_s1 + $0x468] ss:$12 sps:$4 sm:$0xff]  }
  0xa5   : > { %1962 = vmatprep.subr.bf16.mxu0 %v6036_v11  ;;  %v6072_v11 = vld [vmem:[%s9153_s1 + $0x484] ss:$12 sps:$4 sm:$0xff]  }
  0xa7   : > { %1934 = vmatmul.mubr.bf16.gmra.mrb[8].mxu0 %v6888_v49  ;;  %2344 = vmatmul.mubr.bf16.gmra.mrb[56].mxu1 %v7125_v15  ;;  %v6097_v49 = vld [vmem:[%s9154_s2 + $0x1c] ss:$12 sps:$4 sm:$0xff]  }
  0xa8   : > { %1963 = vmatpush1.bf16.msra.mxu0 %v6034_v37  ;;  %2351 = vmatprep.mubr.bf16.mxu1 %v7130_v17  ;;  %v6075_v37 = vld [vmem:[%s9153_s1 + $0x49c] ss:$12 sps:$4 sm:$0xff]  }
  0xa9   : > { %1964 = vmatprep.subr.bf16.mxu0 %v6039_v16  ;;  %1943 = vmatprep.mubr.bf16.mxu0 %v6899_v53  ;;  %v6045_v53 = vld [vmem:[%s9153_s1 + $0x3ac] ss:$12 sps:$4 sm:$0xff]   ;;  %v7303_v16 = vld [vmem:[%s9154_s2 + $0x68] ss:$12 sps:$4 sm:$0xff]  }
  0xaa   : > { %2654 = vmatprep.subr.bf16.mxu1 %v6097_v49  ;;  %v6079_v49 = vld [vmem:[%s9153_s1 + $0x4c8] ss:$12 sps:$4 sm:$0xff]  }
  0xab   : > { %2655 = vmatpush1.bf16.msra.mxu1 %v6099_v22  ;;  %v6084_v22 = vld [vmem:[%s9153_s1 + $0x4e4] ss:$12 sps:$4 sm:$0xff]  }
  0xac   : > { %1965 = vmatpush1.bf16.msra.mxu0 %v6037_v18  ;;  %2656 = vmatprep.subr.bf16.mxu1 %v6103_v27  ;;  %v6073_v18 = vld [vmem:[%s9153_s1 + $0x498] ss:$12 sps:$4 sm:$0xff]   ;;  %v6090_v27 = vld [vmem:[%s9153_s1 + $0x514] ss:$12 sps:$4 sm:$0xff]  }
  0xad   : > { %1966 = vmatprep.subr.bf16.mxu0 %v6042_v41  ;;  %v6078_v41 = vld [vmem:[%s9153_s1 + $0x4b4] ss:$12 sps:$4 sm:$0xff]  }
  0xaf   : > { %1944 = vmatmul.mubr.bf16.gmra.mrb[12].mxu0 %v6922_v61  ;;  %2352 = vmatmul.mubr.bf16.gmra.mrb[60].mxu1 %v7157_v24  ;;  %v9161_v61 = vmov 0  }
  0xb0   : > { %1967 = vmatpush1.bf16.msra.mxu0 %v6040_v23  ;;  %1986 = vmatprep.mubr.bf16.mxu0 %v6933_v1  ;;  %v6051_v1 = vld [vmem:[%s9153_s1 + $0x3dc] ss:$12 sps:$4 sm:$0xff]   ;;  %v6082_v23 = vld [vmem:[%s9153_s1 + $0x4e0] ss:$12 sps:$4 sm:$0xff]  }
  0xb1   : > { %1968 = vmatprep.subr.bf16.mxu0 %v6045_v53  ;;  %2684 = vmatprep.mubr.bf16.mxu1 %v9161_v61  ;;  %v6085_v53 = vld [vmem:[%s9153_s1 + $0x4f8] ss:$12 sps:$4 sm:$0xff]  }
  0xb2   : > { %2657 = vmatpush1.bf16.msra.mxu1 %v6105_v30  ;;  %v6102_v30 = vld [vmem:[%s9153_s1 + $0x544] ss:$12 sps:$4 sm:$0xff]  }
  0xb3   : > { %2658 = vmatprep.subr.bf16.mxu1 %v6109_v31  ;;  %v6100_v31 = vld [vmem:[%s9153_s1 + $0x540] ss:$12 sps:$4 sm:$0xff]  }
  0xb4   : > { %1969 = vmatpush1.bf16.msra.mxu0 %v6043_v28  ;;  %v6096_v28 = vld [vmem:[%s9153_s1 + $0x52c] ss:$12 sps:$4 sm:$0xff]  }
  0xb5   : > { %1970 = vmatprep.subr.bf16.mxu0 %v6048_v32  ;;  %v6114_v32 = vld [vmem:[%s9153_s1 + $0x574] ss:$12 sps:$4 sm:$0xff]  }
  0xb6   : > { %2659 = vmatpush1.bf16.msra.mxu1 %v6111_v34  ;;  %v6120_v34 = vld [vmem:[%s9153_s1 + $0x58c] ss:$12 sps:$4 sm:$0xff]  }
  0xb7   : > { %2660 = vmatprep.subr.bf16.mxu1 %v6115_v36  ;;  %v6118_v36 = vld [vmem:[%s9153_s1 + $0x588] ss:$12 sps:$4 sm:$0xff]  }
  0xb8   : > { %1971 = vmatpush1.bf16.msra.mxu0 %v6046_v33  ;;  %v6112_v33 = vld [vmem:[%s9153_s1 + $0x570] ss:$12 sps:$4 sm:$0xff]  }
  0xb9   : > { %1972 = vmatprep.subr.bf16.mxu0 %v6051_v1  ;;  %v6126_v1 = vld [vmem:[%s9153_s1 + $0x5a4] ss:$12 sps:$4 sm:$0xff]  }
  0xba   : > { %2661 = vmatpush1.bf16.msra.mxu1 %v6117_v39  ;;  %v6124_v39 = vld [vmem:[%s9153_s1 + $0x5a0] ss:$12 sps:$4 sm:$0xff]  }
  0xbb   : > { %2662 = vmatprep.subr.bf16.mxu1 %v6121_v42  ;;  %v6132_v42 = vld [vmem:[%s9153_s1 + $0x5bc] ss:$12 sps:$4 sm:$0xff]  }
  0xbc   : > { %1973 = vmatpush1.bf16.msra.mxu0 %v6049_v38  ;;  %v609_v38 = vlaneseq }
  0xbd   : > { %1974 = vmatprep.subr.bf16.mxu0 %v6054_v43 }
  0xbe   : > { %2663 = vmatpush1.bf16.msra.mxu1 %v6123_v45  ;;  %v7409_v43 = vshrl.u32 %v609_v38, 7  ;;  %v6138_v45 = vld [vmem:[%s9153_s1 + $0x5d4] ss:$12 sps:$4 sm:$0xff]  }
  0xbf   : > { %2664 = vmatprep.subr.bf16.mxu1 %v6127_v46 }
  0xc0   : > { %1975 = vmatpush1.bf16.msra.mxu0 %v6052_v44  ;;  %v6130_v44 = vld [vmem:[%s9153_s1 + $0x5b8] ss:$12 sps:$4 sm:$0xff]   ;;  %v7418_v46 = vsub.s32 2, %v7409_v43 }
  0xc1   : > { %1976 = vmatprep.subr.bf16.mxu0 %v6057_v47  ;;  %v7423_v47 = vld [vmem:[%s9155_s3] sm:$0x7] }
  0xc2   : > { %2665 = vmatpush1.bf16.msra.mxu1 %v6129_v51  ;;  %v6136_v51 = vld [vmem:[%s9153_s1 + $0x5d0] ss:$12 sps:$4 sm:$0xff]  }
  0xc3   : > { %2666 = vmatprep.subr.bf16.mxu1 %v6133_v52 }
  0xc4   : > { %1977 = vmatpush1.bf16.msra.mxu0 %v6055_v48 }
  0xc5   : > { %1978 = vmatprep.subr.bf16.mxu0 %v6060_v54  ;;  %v6142_v54 = vld [vmem:[%s9153_s1 + $0x5ec] ss:$12 sps:$4 sm:$0xff]  }
  0xc6   : > { %2667 = vmatpush1.bf16.msra.mxu1 %v6135_v56  ;;  %v620_v56 = vrot.slane %v7423_v47, %v7418_v46 }
  0xc7   : > { %5626 = vmatprep.subr.bf16.mxu1 %v9163_v4 }
  0xc8   : > { %1979 = vmatpush1.bf16.msra.mxu0 %v6058_v58 }
  0xc9   : > { %1980 = vmatprep.subr.bf16.mxu0 %v6063_v59  ;;  %2685 = vmatmul.mubr.bf16.vlgmr.msra.gmra.mrb[64].mxu1 %v7245_v63 }
  0xca   : > { %5627 = vmatpush3.bf16.msra.mxu1 %v7253_v3  ;;  %5642 = vmatprep.mubr.msk.bf16.mxu1 %vm6519_vm0, %v9163_v4 }
  0xcb   : > { %5628 = vmatprep.subr.bf16.mxu1 %v9163_v4 }
  0xcc   : > { %1981 = vmatpush1.bf16.msra.mxu0 %v6061_v60 }
  0xcd   : > { %1982 = vmatprep.subr.bf16.mxu0 %v6066_v0  ;;  %v6140_v0 = vld [vmem:[%s9153_s1 + $0x5e8] ss:$12 sps:$4 sm:$0xff]  }
  0xce   : > { %5629 = vmatpush3.bf16.msra.mxu1 %v7259_v5 }
  0xcf   : > { %5630 = vmatprep.subr.bf16.mxu1 %v9163_v4 }
  0xd0   : > { %1983 = vmatpush1.bf16.msra.mxu0 %v6064_v6 }
  0xd1   : > { %1984 = vmatprep.subr.bf16.mxu0 %v6069_v25 }
  0xd2   : > { %5631 = vmatpush3.bf16.msra.mxu1 %v7275_v9 }
  0xd3   : > { %5632 = vmatprep.subr.bf16.mxu1 %v9163_v4 }
  0xd4   : > { %1985 = vmatpush1.bf16.msra.mxu0 %v6067_v29 }
  0xd5   : > { %2027 = vmatprep.subr.bf16.mxu0 %v6072_v11 }
  0xd6   : > { %5633 = vmatpush3.bf16.msra.mxu1 %v7288_v12 }
  0xd7   : > { %1987 = vmatmul.mubr.bf16.vlgmr.msra.gmra.mrb[0].mxu0 %v6953_v8  ;;  %5634 = vmatprep.subr.bf16.mxu1 %v9163_v4  ;;  %v7317_v8 = vld [vmem:[%s9154_s2 + $0x80] ss:$12 sps:$4 sm:$0xff]  }
  0xd8   : > { %2028 = vmatpush1.bf16.msra.mxu0 %v6070_v14  ;;  %1996 = vmatprep.mubr.bf16.mxu0 %v6967_v13  ;;  %v6081_v13 = vld [vmem:[%s9153_s1 + $0x4cc] ss:$12 sps:$4 sm:$0xff]  }
  0xd9   : > { %2029 = vmatprep.subr.bf16.mxu0 %v6075_v37 }
  0xda   : > { %5635 = vmatpush3.bf16.msra.mxu1 %v7303_v16 }
  0xdb   : > { %5636 = vmatprep.subr.bf16.mxu1 %v9163_v4 }
  0xdc   : > { %2030 = vmatpush1.bf16.msra.mxu0 %v6073_v18 }
  0xdd   : > { %2031 = vmatprep.subr.bf16.mxu0 %v6078_v41 }
  0xde   : > { %5637 = vmatpush3.bf16.msra.mxu1 %v7317_v8 }
  0xdf   : > { %1997 = vmatmul.mubr.bf16.gmra.mrb[4].mxu0 %v6988_v21  ;;  %5638 = vmatprep.subr.bf16.mxu1 %v9163_v4  ;;  %v7345_v21 = vld [vmem:[%s9154_s2 + $0xb0] ss:$12 sps:$4 sm:$0xff]  }
  0xe0   : > { %2032 = vmatpush1.bf16.msra.mxu0 %v6076_v19  ;;  %2006 = vmatprep.mubr.bf16.mxu0 %v6999_v26  ;;  %v6087_v26 = vld [vmem:[%s9153_s1 + $0x4fc] ss:$12 sps:$4 sm:$0xff]  }
  0xe1   : > { %2033 = vmatprep.subr.bf16.mxu0 %v6081_v13 }
  0xe2   : > { %5639 = vmatpush3.bf16.msra.mxu1 %v7331_v20 }
  0xe3   : > { %5640 = vmatprep.subr.bf16.mxu1 %v9163_v4 }
  0xe4   : > { %2034 = vmatpush1.bf16.msra.mxu0 %v6079_v49 }
  0xe5   : > { %2035 = vmatprep.subr.bf16.mxu0 %v6084_v22 }
  0xe6   : > { %5641 = vmatpush3.bf16.msra.mxu1 %v7345_v21 }
  0xe7   : > { %2007 = vmatmul.mubr.bf16.gmra.mrb[8].mxu0 %v7020_v35  ;;  %v6088_v35 = vld [vmem:[%s9153_s1 + $0x510] ss:$12 sps:$4 sm:$0xff]  }
  0xe8   : > { %2036 = vmatpush1.bf16.msra.mxu0 %v6082_v23  ;;  %2016 = vmatprep.mubr.bf16.mxu0 %v7031_v40  ;;  %v6094_v40 = vld [vmem:[%s9153_s1 + $0x528] ss:$12 sps:$4 sm:$0xff]  }
  0xe9   : > { %2037 = vmatprep.subr.bf16.mxu0 %v6087_v26  ;;  %5643 = vmatmul.mubr.bf16.vlgmr.msra.gmra.mrb[68].mxu1 %v7245_v63 }
  0xea   : > { %3027 = vmatprep.mubr.bf16.mxu1 %v9161_v61 }
  0xec   : > { %2038 = vmatpush1.bf16.msra.mxu0 %v6085_v53 }
  0xed   : > { %2039 = vmatprep.subr.bf16.mxu0 %v6090_v27 }
  0xef   : > { %2017 = vmatmul.mubr.bf16.gmra.mrb[12].mxu0 %v7052_v50  ;;  %v6108_v50 = vld [vmem:[%s9153_s1 + $0x55c] ss:$12 sps:$4 sm:$0xff]  }
  0xf0   : > { %2040 = vmatpush1.bf16.msra.mxu0 %v6088_v35  ;;  %2059 = vmatprep.mubr.bf16.mxu0 %v7063_v55  ;;  %v6106_v55 = vld [vmem:[%s9153_s1 + $0x558] ss:$12 sps:$4 sm:$0xff]  }
  0xf1   : > { %2041 = vmatprep.subr.bf16.mxu0 %v6096_v28 }
  0xf4   : > { %2042 = vmatpush1.bf16.msra.mxu0 %v6094_v40 }
  0xf5   : > { %2043 = vmatprep.subr.bf16.mxu0 %v6102_v30 }
  0xf8   : > { %2044 = vmatpush1.bf16.msra.mxu0 %v6100_v31 }
  0xf9   : > { %2045 = vmatprep.subr.bf16.mxu0 %v6108_v50 }
  0xfc   : > { %2046 = vmatpush1.bf16.msra.mxu0 %v6106_v55 }
  0xfd   : > { %2047 = vmatprep.subr.bf16.mxu0 %v6114_v32 }
 0x100   : > { %2048 = vmatpush1.bf16.msra.mxu0 %v6112_v33 }
 0x101   : > { %2049 = vmatprep.subr.bf16.mxu0 %v6120_v34 }
 0x104   : > { %2050 = vmatpush1.bf16.msra.mxu0 %v6118_v36 }
 0x105   : > { %2051 = vmatprep.subr.bf16.mxu0 %v6126_v1 }
 0x108   : > { %2052 = vmatpush1.bf16.msra.mxu0 %v6124_v39 }
 0x109   : > { %2053 = vmatprep.subr.bf16.mxu0 %v6132_v42 }
 0x10a   : > { %v5410_v48 = vpop.f32.mrb[0].mxu1 }
 0x10b   : > { %v5411_v52 = vpop.f32.mrb[1].mxu1 }
 0x10c   : > { %2054 = vmatpush1.bf16.msra.mxu0 %v6130_v44  ;;  %v5412_v58 = vadd.f32 %v5411_v52, %v5410_v48  ;;  %v5413_v59 = vpop.f32.mrb[2].mxu1 }
 0x10d   : > { %2055 = vmatprep.subr.bf16.mxu0 %v6138_v45  ;;  %v5414_v60 = vpop.f32.mrb[3].mxu1 }
 0x10e   : > { %v5415_v63 = vadd.f32 %v5414_v60, %v5413_v59  ;;  %v2135_v32 = vadd.f32 %v5412_v58, %v620_v56 }
 0x110   : > { %2056 = vmatpush1.bf16.msra.mxu0 %v6136_v51  ;;  %v2138_v6 = vadd.f32 %v5415_v63, %v620_v56 }
 0x111   : > { %2057 = vmatprep.subr.bf16.mxu0 %v6142_v54 }
 0x112   : > { %v5416_v25 = vpop.f32.mrb[4].mxu1 }
 0x113   : > { %v5417_v29 = vpop.f32.mrb[5].mxu1 }
 0x114   : > { %2058 = vmatpush1.bf16.msra.mxu0 %v6140_v0  ;;  %v5418_v11 = vadd.f32 %v5417_v29, %v5416_v25  ;;  %v5419_v14 = vpop.f32.mrb[6].mxu1 }
 0x115   : > { %v5420_v37 = vpop.f32.mrb[7].mxu1 }
 0x116   : > { %v2143_v18 = vadd.f32 %v5418_v11, %v620_v56  ;;  %v5421_v41 = vadd.f32 %v5420_v37, %v5419_v14 }
 0x117   : > { %2060 = vmatmul.mubr.bf16.vlgmr.msra.gmra.mrb[0].mxu0 %v7078_v62 }
 0x118   : > { %2069 = vmatprep.mubr.bf16.mxu0 %v7086_v2  ;;  %v2146_v19 = vadd.f32 %v5421_v41, %v620_v56 }
 0x11a   : > { %v5422_v13 = vpop.f32.mrb[8].mxu1 }
 0x11b   : > { %v5423_v49 = vpop.f32.mrb[9].mxu1 }
 0x11c   : > { %v5424_v22 = vadd.f32 %v5423_v49, %v5422_v13  ;;  %v5425_v23 = vpop.f32.mrb[10].mxu1 }
 0x11d   : > { %v5426_v26 = vpop.f32.mrb[11].mxu1 }
 0x11e   : > { %v2151_v53 = vadd.f32 %v5424_v22, %v620_v56  ;;  %v5427_v27 = vadd.f32 %v5426_v26, %v5425_v23 }
 0x11f   : > { %2070 = vmatmul.mubr.bf16.gmra.mrb[4].mxu0 %v7103_v7 }
 0x120   : > { %2079 = vmatprep.mubr.bf16.mxu0 %v7108_v10  ;;  %v2154_v35 = vadd.f32 %v5427_v27, %v620_v56 }
 0x122   : > { %v5428_v28 = vpop.f32.mrb[12].mxu1 }
 0x123   : > { %v5429_v40 = vpop.f32.mrb[13].mxu1 }
 0x124   : > { %v5430_v62 = vadd.f32 %v5429_v40, %v5428_v28  ;;  %v5431_v30 = vpop.f32.mrb[14].mxu1 }
 0x125   : > { %v5432_v31 = vpop.f32.mrb[15].mxu1 }
 0x126   : > { %v2159_v2 = vadd.f32 %v5430_v62, %v620_v56  ;;  %v5433_v50 = vadd.f32 %v5432_v31, %v5431_v30 }
 0x127   : > { %2080 = vmatmul.mubr.bf16.gmra.mrb[8].mxu0 %v7125_v15 }
 0x128   : > { %2089 = vmatprep.mubr.bf16.mxu0 %v7130_v17  ;;  %v2162_v55 = vadd.f32 %v5433_v50, %v620_v56 }
 0x12a   : > { %v5450_v33 = vpop.f32.mrb[16].mxu1 }
 0x12b   : > { %v5451_v7 = vpop.f32.mrb[17].mxu1 }
 0x12c   : > { %v5452_v34 = vadd.f32 %v5451_v7, %v5450_v33  ;;  %v5453_v36 = vpop.f32.mrb[18].mxu1 }
 0x12d   : > { %v5454_v1 = vpop.f32.mrb[19].mxu1 }
 0x12e   : > { %v2200_v10 = vadd.f32 %v5452_v34, %v2135_v32  ;;  %v5455_v38 = vadd.f32 %v5454_v1, %v5453_v36 }
 0x12f   : > { %2090 = vmatmul.mubr.bf16.gmra.mrb[12].mxu0 %v7157_v24 }
 0x130   : > { %3109 = vmatprep.mubr.bf16.mxu0 %v9161_v61  ;;  %v2203_v39 = vadd.f32 %v5455_v38, %v2138_v6  ;;  %v2464_v61 = vld [vmem:[%s9156_s4] sm:$0x7] }
 0x132   : > { %v5456_v42 = vpop.f32.mrb[20].mxu1 }
 0x133   : > { %v5457_v15 = vpop.f32.mrb[21].mxu1 }
 0x134   : > { %v5458_v44 = vadd.f32 %v5457_v15, %v5456_v42  ;;  %v5459_v45 = vpop.f32.mrb[22].mxu1 }
 0x135   : > { %v5460_v48 = vpop.f32.mrb[23].mxu1 }
 0x136   : > { %v2208_v17 = vadd.f32 %v5458_v44, %v2143_v18  ;;  %v5461_v51 = vadd.f32 %v5460_v48, %v5459_v45 }
 0x138   : > { %v2211_v52 = vadd.f32 %v5461_v51, %v2146_v19 }
 0x13a   : > { %v5462_v54 = vpop.f32.mrb[24].mxu1 }
 0x13b   : > { %v5463_v56 = vpop.f32.mrb[25].mxu1 }
 0x13c   : > { %v5464_v58 = vadd.f32 %v5463_v56, %v5462_v54  ;;  %v5465_v59 = vpop.f32.mrb[26].mxu1 }
 0x13d   : > { %v5466_v60 = vpop.f32.mrb[27].mxu1 }
 0x13e   : > { %v2216_v63 = vadd.f32 %v5464_v58, %v2151_v53  ;;  %v5467_v24 = vadd.f32 %v5466_v60, %v5465_v59 }
 0x140   : > { %v2219_v0 = vadd.f32 %v5467_v24, %v2154_v35 }
 0x142   : > { %v5468_v25 = vpop.f32.mrb[28].mxu1 }
 0x143   : > { %v5469_v29 = vpop.f32.mrb[29].mxu1 }
 0x144   : > { %v5470_v11 = vadd.f32 %v5469_v29, %v5468_v25  ;;  %v5471_v6 = vpop.f32.mrb[30].mxu1 }
 0x145   : > { %v5472_v14 = vpop.f32.mrb[31].mxu1 }
 0x146   : > { %v2224_v37 = vadd.f32 %v5470_v11, %v2159_v2  ;;  %v5473_v41 = vadd.f32 %v5472_v14, %v5471_v6 }
 0x148   : > { %v2227_v13 = vadd.f32 %v5473_v41, %v2162_v55 }
 0x14a   : > { %v5490_v49 = vpop.f32.mrb[32].mxu1 }
 0x14b   : > { %v5491_v18 = vpop.f32.mrb[33].mxu1 }
 0x14c   : > { %v5492_v22 = vadd.f32 %v5491_v18, %v5490_v49  ;;  %v5493_v19 = vpop.f32.mrb[34].mxu1  ;;  %v7455_v49 = vld [vmem:[%s9157_s5 + $0x4] ss:$24 sps:$4 sm:$0xff]   ;;  %v7460_v18 = vld [vmem:[%s9157_s5 + $0x14] ss:$24 sps:$4 sm:$0xff]  }
 0x14d   : > { %v5494_v23 = vpop.f32.mrb[35].mxu1  ;;  %9306 = vst [vmem:[#allocation6_spill] sm:$0xff] %v7460_v18  ;;  %2995 = vmatprep.subr.bf16.mxu1 %v7455_v49  ;;  %3077 = vmatprep.subr.bf16.mxu0 %v7460_v18 }
 0x14e   : > { %v2265_v26 = vadd.f32 %v5492_v22, %v2200_v10  ;;  %v5495_v27 = vadd.f32 %v5494_v23, %v5493_v19  ;;  %v7465_v23 = vld [vmem:[%s9157_s5] ss:$24 sps:$4 sm:$0xff]  }
 0x14f   : > { %2996 = vmatpush1.bf16.msra.mxu1 %v7465_v23 }
 0x150   : > { %v2268_v28 = vadd.f32 %v5495_v27, %v2203_v39 }
 0x152   : > { %v5496_v40 = vpop.f32.mrb[36].mxu1 }
 0x153   : > { %v5497_v53 = vpop.f32.mrb[37].mxu1 }
 0x154   : > { %v5498_v62 = vadd.f32 %v5497_v53, %v5496_v40  ;;  %v5499_v35 = vpop.f32.mrb[38].mxu1  ;;  %v7481_v53 = vld [vmem:[%s9157_s5 + $0x34] ss:$24 sps:$4 sm:$0xff]  }
 0x155   : > { %v5500_v30 = vpop.f32.mrb[39].mxu1  ;;  %2997 = vmatprep.subr.bf16.mxu1 %v7481_v53 }
 0x156   : > { %v2273_v31 = vadd.f32 %v5498_v62, %v2208_v17  ;;  %v5501_v50 = vadd.f32 %v5500_v30, %v5499_v35  ;;  %v7486_v62 = vld [vmem:[%s9157_s5 + $0x44] ss:$24 sps:$4 sm:$0xff]   ;;  %v7495_v30 = vld [vmem:[%s9157_s5 + $0x30] ss:$24 sps:$4 sm:$0xff]  }
 0x157   : > { %2998 = vmatpush1.bf16.msra.mxu1 %v7495_v30 }
 0x158   : > { %v2276_v32 = vadd.f32 %v5501_v50, %v2211_v52 }
 0x15a   : > { %v5502_v33 = vpop.f32.mrb[40].mxu1 }
 0x15b   : > { %v5503_v2 = vpop.f32.mrb[41].mxu1 }
 0x15c   : > { %v5504_v7 = vadd.f32 %v5503_v2, %v5502_v33  ;;  %v5505_v55 = vpop.f32.mrb[42].mxu1  ;;  %v7507_v33 = vld [vmem:[%s9157_s5 + $0x64] ss:$24 sps:$4 sm:$0xff]   ;;  %v7512_v2 = vld [vmem:[%s9157_s5 + $0x74] ss:$24 sps:$4 sm:$0xff]  }
 0x15d   : > { %v5506_v34 = vpop.f32.mrb[43].mxu1  ;;  %2999 = vmatprep.subr.bf16.mxu1 %v7507_v33 }
 0x15e   : > { %v2281_v36 = vadd.f32 %v5504_v7, %v2216_v63  ;;  %v5507_v1 = vadd.f32 %v5506_v34, %v5505_v55  ;;  %v7517_v34 = vld [vmem:[%s9157_s5 + $0x60] ss:$24 sps:$4 sm:$0xff]  }
 0x15f   : > { %3000 = vmatpush1.bf16.msra.mxu1 %v7517_v34 }
 0x160   : > { %v2284_v38 = vadd.f32 %v5507_v1, %v2219_v0 }
 0x162   : > { %v5508_v42 = vpop.f32.mrb[44].mxu1 }
 0x163   : > { %v5509_v10 = vpop.f32.mrb[45].mxu1 }
 0x164   : > { %v5510_v15 = vadd.f32 %v5509_v10, %v5508_v42  ;;  %v5511_v39 = vpop.f32.mrb[46].mxu1  ;;  %v7533_v10 = vld [vmem:[%s9157_s5 + $0x94] ss:$24 sps:$4 sm:$0xff]  }
 0x165   : > { %v5512_v44 = vpop.f32.mrb[47].mxu1  ;;  %3001 = vmatprep.subr.bf16.mxu1 %v7533_v10 }
 0x166   : > { %v2289_v45 = vadd.f32 %v5510_v15, %v2224_v37  ;;  %v5513_v48 = vadd.f32 %v5512_v44, %v5511_v39  ;;  %v7538_v15 = vld [vmem:[%s9157_s5 + $0xa4] ss:$24 sps:$4 sm:$0xff]   ;;  %v7545_v44 = vld [vmem:[%s9157_s5 + $0x90] ss:$24 sps:$4 sm:$0xff]  }
 0x167   : > { %3002 = vmatpush1.bf16.msra.mxu1 %v7545_v44 }
 0x168   : > { %v2292_v51 = vadd.f32 %v5513_v48, %v2227_v13  ;;  %v7559_v48 = vld [vmem:[%s9157_s5 + $0xc4] ss:$24 sps:$4 sm:$0xff]  }
 0x169   : > { %9311 = vst [vmem:[#allocation11_spill] sm:$0xff] %v7559_v48  ;;  %3003 = vmatprep.subr.bf16.mxu1 %v7559_v48 }
 0x16a   : > { %v5530_v54 = vpop.f32.mrb[48].mxu1 }
 0x16b   : > { %v5531_v17 = vpop.f32.mrb[49].mxu1 }
 0x16c   : > { %v5532_v56 = vadd.f32 %v5531_v17, %v5530_v54  ;;  %v5533_v52 = vpop.f32.mrb[50].mxu1  ;;  %v7569_v54 = vld [vmem:[%s9157_s5 + $0xc0] ss:$24 sps:$4 sm:$0xff]   ;;  %v7574_v17 = vld [vmem:[%s9157_s5 + $0xd0] ss:$24 sps:$4 sm:$0xff]  }
 0x16d   : > { %v5534_v58 = vpop.f32.mrb[51].mxu1  ;;  %9313 = vst [vmem:[#allocation13_spill] sm:$0xff] %v7569_v54  ;;  %9314 = vst [vmem:[#allocation14_spill] sm:$0xff] %v7574_v17  ;;  %3004 = vmatpush1.bf16.msra.mxu1 %v7569_v54 }
 0x16e   : > { %v7444_v59 = vadd.f32 %v5532_v56, %v2265_v26  ;;  %v5535_v60 = vadd.f32 %v5534_v58, %v5533_v52  ;;  %v7470_v26 = vld [vmem:[%s9157_s5 + $0x10] ss:$24 sps:$4 sm:$0xff]   ;;  %v7579_v56 = vld [vmem:[%s9157_s5 + $0xf4] ss:$24 sps:$4 sm:$0xff]   ;;  %v7586_v52 = vld [vmem:[%s9157_s5 + $0x104] ss:$24 sps:$4 sm:$0xff]  }
 0x16f   : > { %3078 = vmatpush1.bf16.msra.mxu0 %v7470_v26  ;;  %9315 = vst [vmem:[#allocation15_spill] sm:$0xff] %v7579_v56  ;;  %9316 = vst [vmem:[#allocation16_spill] sm:$0xff] %v7586_v52  ;;  %v7593_v58 = vld [vmem:[%s9157_s5 + $0xf0] ss:$24 sps:$4 sm:$0xff]   ;;  %3005 = vmatprep.subr.bf16.mxu1 %v7579_v56 }
 0x170   : > { %v7446_v24 = vadd.f32 %v5535_v60, %v2268_v28  ;;  %3079 = vmatprep.subr.bf16.mxu0 %v7486_v62  ;;  %9317 = vst [vmem:[#allocation17_spill] sm:$0xff] %v7593_v58  ;;  %v7598_v60 = vld [vmem:[%s9157_s5 + $0x100] ss:$24 sps:$4 sm:$0xff]  }
 0x171   : > { %9318 = vst [vmem:[#allocation18_spill] sm:$0xff] %v7598_v60  ;;  %3006 = vmatpush1.bf16.msra.mxu1 %v7593_v58 }
 0x172   : > { %v5536_v63 = vpop.f32.mrb[52].mxu1 }
 0x173   : > { %v5537_v0 = vpop.f32.mrb[53].mxu1 }
 0x174   : > { %v5538_v25 = vadd.f32 %v5537_v0, %v5536_v63  ;;  %v5539_v29 = vpop.f32.mrb[54].mxu1  ;;  %v7605_v63 = vld [vmem:[%s9157_s5 + $0x124] ss:$24 sps:$4 sm:$0xff]   ;;  %v7610_v0 = vld [vmem:[%s9157_s5 + $0x134] ss:$24 sps:$4 sm:$0xff]  }
 0x175   : > { %v5540_v11 = vpop.f32.mrb[55].mxu1  ;;  %9319 = vst [vmem:[#allocation19_spill] sm:$0xff] %v7605_v63  ;;  %9320 = vst [vmem:[#allocation20_spill] sm:$0xff] %v7610_v0  ;;  %3007 = vmatprep.subr.bf16.mxu1 %v7605_v63 }
 0x176   : > { %v7448_v6 = vadd.f32 %v5538_v25, %v2273_v31  ;;  %v5541_v14 = vadd.f32 %v5540_v11, %v5539_v29  ;;  %v7500_v31 = vld [vmem:[%s9157_s5 + $0x40] ss:$24 sps:$4 sm:$0xff]   ;;  %v7622_v29 = vld [vmem:[%s9157_s5 + $0x130] ss:$24 sps:$4 sm:$0xff]   ;;  %v7629_v11 = vld [vmem:[%s9157_s5 + $0x154] ss:$24 sps:$4 sm:$0xff]  }
 0x177   : > { %3080 = vmatpush1.bf16.msra.mxu0 %v7500_v31  ;;  %v7617_v25 = vld [vmem:[%s9157_s5 + $0x120] ss:$24 sps:$4 sm:$0xff]   ;;  %9322 = vst [vmem:[#allocation22_spill] sm:$0xff] %v7622_v29  ;;  %9323 = vst [vmem:[#allocation23_spill] sm:$0xff] %v7629_v11 }
 0x178   : > { %9304 = vst [vmem:[#allocation4_spill] sm:$0xff] %v7448_v6  ;;  %v7450_v37 = vadd.f32 %v5541_v14, %v2276_v32  ;;  %3081 = vmatprep.subr.bf16.mxu0 %v7512_v2  ;;  %9321 = vst [vmem:[#allocation21_spill] sm:$0xff] %v7617_v25  ;;  %v7634_v14 = vld [vmem:[%s9157_s5 + $0x164] ss:$24 sps:$4 sm:$0xff]   ;;  %3008 = vmatpush1.bf16.msra.mxu1 %v7617_v25 }
 0x179   : > { %9324 = vst [vmem:[#allocation24_spill] sm:$0xff] %v7634_v14  ;;  %3009 = vmatprep.subr.bf16.mxu1 %v7629_v11 }
 0x17a   : > { %9305 = vst [vmem:[#allocation5_spill] sm:$0xff] %v7450_v37  ;;  %v5542_v41 = vpop.f32.mrb[56].mxu1 }
 0x17b   : > { %v5543_v13 = vpop.f32.mrb[57].mxu1 }
 0x17c   : > { %v5544_v22 = vadd.f32 %v5543_v13, %v5542_v41  ;;  %v5545_v19 = vpop.f32.mrb[58].mxu1  ;;  %v7641_v41 = vld [vmem:[%s9157_s5 + $0x150] ss:$24 sps:$4 sm:$0xff]   ;;  %v7646_v13 = vld [vmem:[%s9157_s5 + $0x160] ss:$24 sps:$4 sm:$0xff]  }
 0x17d   : > { %v5546_v27 = vpop.f32.mrb[59].mxu1  ;;  %9325 = vst [vmem:[#allocation25_spill] sm:$0xff] %v7641_v41  ;;  %9326 = vst [vmem:[#allocation26_spill] sm:$0xff] %v7646_v13  ;;  %3010 = vmatpush1.bf16.msra.mxu1 %v7641_v41 }
 0x17e   : > { %v7474_v28 = vadd.f32 %v5544_v22, %v2281_v36  ;;  %v5547_v40 = vadd.f32 %v5546_v27, %v5545_v19  ;;  %v7522_v36 = vld [vmem:[%s9157_s5 + $0x70] ss:$24 sps:$4 sm:$0xff]   ;;  %v7653_v22 = vld [vmem:[%s9157_s5 + $0xc] ss:$24 sps:$4 sm:$0xff]  }
 0x17f   : > { %3082 = vmatpush1.bf16.msra.mxu0 %v7522_v36  ;;  %9327 = vst [vmem:[#allocation27_spill] sm:$0xff] %v7653_v22  ;;  %3036 = vmatprep.subr.bf16.mxu1 %v7653_v22 }
 0x180   : > { %9307 = vst [vmem:[#allocation7_spill] sm:$0xff] %v7474_v28  ;;  %v7488_v35 = vadd.f32 %v5547_v40, %v2284_v38  ;;  %3083 = vmatprep.subr.bf16.mxu0 %v7538_v15 }
 0x182   : > { %9308 = vst [vmem:[#allocation8_spill] sm:$0xff] %v7488_v35  ;;  %v5548_v50 = vpop.f32.mrb[60].mxu1 }
 0x183   : > { %v5549_v32 = vpop.f32.mrb[61].mxu1 }
 0x184   : > { %v5550_v7 = vadd.f32 %v5549_v32, %v5548_v50  ;;  %v5551_v55 = vpop.f32.mrb[62].mxu1 }
 0x185   : > { %v5552_v1 = vpop.f32.mrb[63].mxu1 }
 0x186   : > { %v7526_v38 = vadd.f32 %v5550_v7, %v2289_v45  ;;  %v5553_v42 = vadd.f32 %v5552_v1, %v5551_v55  ;;  %v7550_v45 = vld [vmem:[%s9157_s5 + $0xa0] ss:$24 sps:$4 sm:$0xff]  }
 0x187   : > { %3084 = vmatpush1.bf16.msra.mxu0 %v7550_v45 }
 0x188   : > { %9309 = vst [vmem:[#allocation9_spill] sm:$0xff] %v7526_v38  ;;  %v7540_v39 = vadd.f32 %v5553_v42, %v2292_v51  ;;  %v7564_v51 = vld [vmem:[%s9157_s5 + $0xd4] ss:$24 sps:$4 sm:$0xff]   ;;  %v7660_v42 = vsub.s32 0, %v7409_v43 }
 0x189   : > { %9312 = vst [vmem:[#allocation12_spill] sm:$0xff] %v7564_v51  ;;  %3085 = vmatprep.subr.bf16.mxu0 %v7564_v51 }
 0x18a   : > { %9310 = vst [vmem:[#allocation10_spill] sm:$0xff] %v7540_v39  ;;  %v7666_v39 = vsub.s32 1, %v7409_v43 }
 0x18b   : > { %3086 = vmatpush1.bf16.msra.mxu0 %v7574_v17 }
 0x18c   : > { %3087 = vmatprep.subr.bf16.mxu0 %v7586_v52 }
 0x18f   : > { %3088 = vmatpush1.bf16.msra.mxu0 %v7598_v60 }
 0x190   : > { %3089 = vmatprep.subr.bf16.mxu0 %v7610_v0 }
 0x193   : > { %3090 = vmatpush1.bf16.msra.mxu0 %v7622_v29 }
 0x194   : > { %3091 = vmatprep.subr.bf16.mxu0 %v7634_v14 }
 0x197   : > { %3092 = vmatpush1.bf16.msra.mxu0 %v7646_v13 }
 0x198   : > { %5646 = vmatprep.subr.bf16.mxu0 %v9163_v4  ;;  %v7669_v4 = vrot.slane %v2464_v61, %v7660_v42 }
 0x19a   : > { %9328 = vst [vmem:[#allocation28_spill] sm:$0xff] %v7669_v4 }
 0x19c   : > { %v2686_v19 = vpop.f32.mrb[64].mxu1 }
 0x19d   : > { %v2688_v27 = vpop.f32.mrb[65].mxu1 }
 0x19e   : > { %v2690_v40 = vpop.f32.mrb[66].mxu1 }
 0x19f   : > { %v2691_v50 = vpop.f32.mrb[67].mxu1  ;;  %v612_v40 = vrot.slane %v7423_v47, %v7660_v42 }
 0x1a0   : > { %v7674_v50 = vrot.slane %v2464_v61, %v7666_v39 }
 0x1a2   : > { %9329 = vst [vmem:[#allocation29_spill] sm:$0xff] %v7674_v50  ;;  %v2689_v43 = vadd.f32 %v2688_v27, %v7674_v50 }
 0x1bc   : > { %v2727_v32 = vpop.f32.mrb[68].mxu1 }
 0x1bd   : > { %v5644_v7 = vpop.f32.mrb[69].mxu1 }
 0x1be   : > { %v2730_v55 = vpop.f32.mrb[70].mxu1  ;;  %v616_v7 = vrot.slane %v7423_v47, %v7666_v39 }
 0x1bf   : > { %v5645_v1 = vpop.f32.mrb[71].mxu1 }
 0x1c0   : > { %v2687_v1 = vadd.f32 %v2686_v19, %v7669_v4 }
 0x1ea   : > { %v2061_v55 = vpop.f32.mrb[0].mxu0 }
 0x1eb   : > { %v5786_v38 = vadd.f32 %v2061_v55, %v612_v40  ;;  %v2063_v35 = vpop.f32.mrb[1].mxu0 }
 0x1ec   : > { %v5787_v28 = vadd.f32 %v2063_v35, %v616_v7  ;;  %v2065_v37 = vpop.f32.mrb[2].mxu0 }
 0x1ed   : > { %v2733_v6 = vadd.f32 %v5786_v38, %v2687_v1  ;;  %v7680_v13 = vadd.f32 %v2065_v37, %v612_v40  ;;  %v2067_v14 = vpop.f32.mrb[3].mxu0 }
 0x1ee   : > { %v2740_v29 = vadd.f32 %v5787_v28, %v2689_v43  ;;  %v7682_v0 = vadd.f32 %v2067_v14, %v616_v7 }
 0x1ef   : > { %v5304_v60 = vmul.f32 -1.442695, %v2733_v6 }
 0x1f0   : > { %v5305_v19 = vmul.f32 -1.442695, %v2740_v29 }
 0x1f1   : > { %6222 = vpow2.f32 %v5304_v60 }
 0x1f2   : > { %v2071_v52 = vpop.f32.mrb[4].mxu0  ;;  %6224 = vpow2.f32 %v5305_v19 }
 0x1f3   : > { %v7684_v47 = vadd.f32 %v2071_v52, %v612_v40  ;;  %v2073_v17 = vpop.f32.mrb[5].mxu0 }
 0x1f4   : > { %v7686_v55 = vadd.f32 %v2073_v17, %v616_v7  ;;  %v2075_v51 = vpop.f32.mrb[6].mxu0 }
 0x1f5   : > { %9330 = vst [vmem:[#allocation30_spill] sm:$0xff] %v7684_v47  ;;  %v7688_v27 = vadd.f32 %v2075_v51, %v612_v40  ;;  %v2077_v35 = vpop.f32.mrb[7].mxu0  ;;  %v7701_v51 = vrot.slane %v2464_v61, %v7418_v46  ;;  %v7898_v47 = vld [vmem:[%s9154_s2 + $0x60] ss:$12 sps:$4 sm:$0xff]  }
 0x1f6   : > { %9331 = vst [vmem:[#allocation31_spill] sm:$0xff] %v7686_v55  ;;  %v7690_v38 = vadd.f32 %v2077_v35, %v616_v7  ;;  %v7890_v55 = vld [vmem:[%s9154_s2 + $0x64] ss:$12 sps:$4 sm:$0xff]  }
 0x1f7   : > { %9332 = vst [vmem:[#allocation32_spill] sm:$0xff] %v7688_v27 }
 0x1f8   : > { %9333 = vst [vmem:[#allocation33_spill] sm:$0xff] %v7690_v38 }
 0x1fa   : > { %v2081_v37 = vpop.f32.mrb[8].mxu0 }
 0x1fb   : > { %v6223_v28 = vpop.eup %6222  ;;  %v7692_v14 = vadd.f32 %v2081_v37, %v612_v40  ;;  %v2083_v6 = vpop.f32.mrb[9].mxu0 }
 0x1fc   : > { %v2737_v60 = vadd.f32 1.0, %v6223_v28  ;;  %v7694_v1 = vadd.f32 %v2083_v6, %v616_v7  ;;  %v2085_v52 = vpop.f32.mrb[10].mxu0  ;;  %v6225_v35 = vpop.eup %6224 }
 0x1fd   : > { %9334 = vst [vmem:[#allocation34_spill] sm:$0xff] %v7692_v14  ;;  %v7696_v43 = vadd.f32 %v2085_v52, %v612_v40  ;;  %v2087_v17 = vpop.f32.mrb[11].mxu0  ;;  %v2744_v6 = vadd.f32 1.0, %v6225_v35  ;;  %v7714_v35 = vld [vmem:[#allocation3 + $0x8] sm:$0xff] }
 0x1fe   : > { %9335 = vst [vmem:[#allocation35_spill] sm:$0xff] %v7694_v1  ;;  %6226 = vrcp.f32 %v2737_v60  ;;  %v7698_v29 = vadd.f32 %v2087_v17, %v616_v7  ;;  %v2728_v1 = vadd.f32 %v2727_v32, %v7701_v51 }
 0x1ff   : > { %9336 = vst [vmem:[#allocation36_spill] sm:$0xff] %v7696_v43  ;;  %6228 = vrcp.f32 %v2744_v6  ;;  %v7815_v6 = vld [vmem:[%s9157_s5 + $0x15c] ss:$24 sps:$4 sm:$0xff]  }
 0x200   : > { %9337 = vst [vmem:[#allocation37_spill] sm:$0xff] %v7698_v29  ;;  %9357 = vst [vmem:[#allocation55_spill] sm:$0xff] %v7815_v6 }
 0x202   : > { %v2091_v19 = vpop.f32.mrb[12].mxu0 }
 0x203   : > { %v7703_v38 = vadd.f32 %v2091_v19, %v612_v40  ;;  %v2093_v37 = vpop.f32.mrb[13].mxu0 }
 0x204   : > { %v7705_v14 = vadd.f32 %v2093_v37, %v616_v7  ;;  %v2095_v28 = vpop.f32.mrb[14].mxu0 }
 0x205   : > { %9338 = vst [vmem:[#allocation38_spill] sm:$0xff] %v7703_v38  ;;  %v7708_v52 = vadd.f32 %v2095_v28, %v612_v40  ;;  %v2097_v43 = vpop.f32.mrb[15].mxu0  ;;  %v7721_v40 = vld [vmem:[%s9157_s5 + $0x8] ss:$24 sps:$4 sm:$0xff]   ;;  %v7801_v28 = vld [vmem:[%s9157_s5 + $0x12c] ss:$24 sps:$4 sm:$0xff]  }
 0x206   : > { %9339 = vst [vmem:[#allocation39_spill] sm:$0xff] %v7705_v14  ;;  %v7710_v60 = vadd.f32 %v2097_v43, %v616_v7  ;;  %9342 = vst [vmem:[#allocation42_spill] sm:$0xff] %v7721_v40  ;;  %v7773_v43 = vld [vmem:[%s9157_s5 + $0xcc] ss:$24 sps:$4 sm:$0xff]  }
 0x207   : > { %9340 = vst [vmem:[#allocation40_spill] sm:$0xff] %v7708_v52  ;;  %9351 = vst [vmem:[#allocation49_spill] sm:$0xff] %v7773_v43  ;;  %v7884_v52 = vld [vmem:[%s9154_s2 + $0x48] ss:$12 sps:$4 sm:$0xff]  }
 0x208   : > { %9341 = vst [vmem:[#allocation41_spill] sm:$0xff] %v7710_v60  ;;  %v6227_v17 = vpop.eup %6226  ;;  %9355 = vst [vmem:[#allocation53_spill] sm:$0xff] %v7801_v28  ;;  %v7876_v60 = vld [vmem:[%s9154_s2 + $0x4c] ss:$12 sps:$4 sm:$0xff]  }
 0x209   : > { %v2747_v61 = vmul.f32 %v6227_v17, %v2728_v1  ;;  %v6229_v19 = vpop.eup %6228  ;;  %v7759_v1 = vld [vmem:[%s9157_s5 + $0x9c] ss:$24 sps:$4 sm:$0xff]   ;;  %v7831_v17 = vld [vmem:[%s9154_s2 + $0x4] ss:$12 sps:$4 sm:$0xff]  }
 0x20a   : > { %v2750_v38 = vsub.f32 1.0, %v6229_v19  ;;  %v2752_v14 = vmul.f32 %v6229_v19, %v7232_v57  ;;  %v7735_v57 = vld [vmem:[%s9157_s5 + $0x38] ss:$24 sps:$4 sm:$0xff]   ;;  %9349 = vst [vmem:[#allocation47_spill] sm:$0xff] %v7759_v1  ;;  %9359 = vst [vmem:[#allocation57_spill] sm:$0xff] %v7831_v17 }
 0x20b   : > { %v2748_v29 = vadd.f32 %v2747_v61, %v7444_v59  ;;  %v7728_v59 = vld [vmem:[%s9157_s5 + $0x3c] ss:$24 sps:$4 sm:$0xff]   ;;  %9344 = vst [vmem:[#allocation44_spill] sm:$0xff] %v7735_v57  ;;  %v7840_v61 = vld [vmem:[%s9154_s2] ss:$12 sps:$4 sm:$0xff]  }
 0x20c   : > { %9343 = vst [vmem:[#allocation43_spill] sm:$0xff] %v7728_v59  ;;  %v7856_v19 = vld [vmem:[%s9154_s2 + $0x18] ss:$12 sps:$4 sm:$0xff]  }
 0x20d   : > { %6230 = vtanh.f32 %v2748_v29  ;;  %v7787_v29 = vld [vmem:[%s9157_s5 + $0xfc] ss:$24 sps:$4 sm:$0xff]  }
 0x20e   : > { %9353 = vst [vmem:[#allocation51_spill] sm:$0xff] %v7787_v29 }
 0x217   : > { %v6231_v27 = vpop.eup %6230 }
 0x218   : > { %v2751_v37 = vmul.f32 %v6231_v27, %v2750_v38  ;;  %v9345_v27 = vmov 0.0   ;;  %v7742_v38 = vld [vmem:[%s9157_s5 + $0x6c] ss:$24 sps:$4 sm:$0xff]  }
 0x219   : > { %9346 = vst [vmem:[#allocation45_spill] sm:$0xff] %v7742_v38 }
 0x21a   : > { %v7716_v32 = vadd.f32 %v2752_v14, %v2751_v37  ;;  %v9347_v14 = vmov 0   ;;  %v7862_v37 = vld [vmem:[%s9154_s2 + $0x34] ss:$12 sps:$4 sm:$0xff]  }
 0x21c   : > { %v2754_v7 = vpack.c.bf16 %v7714_v35, %v7716_v32 }
 0x21e   : > { %3028 = vmatmul.mubr.bf16.vlgmr.msra.gmra.mrb[72].mxu1 %v2754_v7  ;;  %3110 = vmatmul.mubr.bf16.vlgmr.msra.gmra.mrb[16].mxu0 %v2754_v7 }
 0x21f   : > { %3037 = vmatpush1.bf16.msra.mxu1 %v7721_v40  ;;  %5647 = vmatpush3.bf16.msra.mxu0 %v7253_v3  ;;  %v7752_v3 = vld [vmem:[%s9157_s5 + $0x68] ss:$24 sps:$4 sm:$0xff]  }
 0x220   : > { %3038 = vmatprep.subr.bf16.mxu1 %v7728_v59  ;;  %5648 = vmatprep.subr.bf16.mxu0 %v9345_v27  ;;  %9348 = vst [vmem:[#allocation46_spill] sm:$0xff] %v7752_v3 }
 0x221   : > { %3068 = vmatprep.mubr.bf16.mxu1 %v9347_v14  ;;  %5662 = vmatprep.mubr.msk.bf16.mxu0 %vm6519_vm0, %v9345_v27 }
 0x223   : > { %3039 = vmatpush1.bf16.msra.mxu1 %v7735_v57  ;;  %5649 = vmatpush3.bf16.msra.mxu0 %v7259_v5  ;;  %v7766_v5 = vld [vmem:[%s9157_s5 + $0x98] ss:$24 sps:$4 sm:$0xff]  }
 0x224   : > { %3040 = vmatprep.subr.bf16.mxu1 %v7742_v38  ;;  %5650 = vmatprep.subr.bf16.mxu0 %v9345_v27  ;;  %9350 = vst [vmem:[#allocation48_spill] sm:$0xff] %v7766_v5 }
 0x227   : > { %3041 = vmatpush1.bf16.msra.mxu1 %v7752_v3  ;;  %5651 = vmatpush3.bf16.msra.mxu0 %v7275_v9  ;;  %v7780_v9 = vld [vmem:[%s9157_s5 + $0xc8] ss:$24 sps:$4 sm:$0xff]  }
 0x228   : > { %3042 = vmatprep.subr.bf16.mxu1 %v7759_v1  ;;  %5652 = vmatprep.subr.bf16.mxu0 %v9345_v27  ;;  %9352 = vst [vmem:[#allocation50_spill] sm:$0xff] %v7780_v9 }
 0x22b   : > { %3043 = vmatpush1.bf16.msra.mxu1 %v7766_v5  ;;  %5653 = vmatpush3.bf16.msra.mxu0 %v7288_v12  ;;  %v7794_v12 = vld [vmem:[%s9157_s5 + $0xf8] ss:$24 sps:$4 sm:$0xff]  }
 0x22c   : > { %3044 = vmatprep.subr.bf16.mxu1 %v7773_v43  ;;  %5654 = vmatprep.subr.bf16.mxu0 %v9345_v27  ;;  %9354 = vst [vmem:[#allocation52_spill] sm:$0xff] %v7794_v12 }
 0x22f   : > { %3045 = vmatpush1.bf16.msra.mxu1 %v7780_v9  ;;  %5655 = vmatpush3.bf16.msra.mxu0 %v7303_v16  ;;  %v7808_v16 = vld [vmem:[%s9157_s5 + $0x128] ss:$24 sps:$4 sm:$0xff]  }
 0x230   : > { %3046 = vmatprep.subr.bf16.mxu1 %v7787_v29  ;;  %5656 = vmatprep.subr.bf16.mxu0 %v9345_v27  ;;  %9356 = vst [vmem:[#allocation54_spill] sm:$0xff] %v7808_v16 }
 0x233   : > { %3047 = vmatpush1.bf16.msra.mxu1 %v7794_v12  ;;  %5657 = vmatpush3.bf16.msra.mxu0 %v7317_v8  ;;  %v7822_v8 = vld [vmem:[%s9157_s5 + $0x158] ss:$24 sps:$4 sm:$0xff]  }
 0x234   : > { %3048 = vmatprep.subr.bf16.mxu1 %v7801_v28  ;;  %5658 = vmatprep.subr.bf16.mxu0 %v9345_v27  ;;  %9358 = vst [vmem:[#allocation56_spill] sm:$0xff] %v7822_v8 }
 0x237   : > { %3049 = vmatpush1.bf16.msra.mxu1 %v7808_v16  ;;  %5659 = vmatpush3.bf16.msra.mxu0 %v7331_v20  ;;  %v3152_v20 = vpack.c.bf16 %v7716_v32, %v7716_v32 }
 0x238   : > { %3050 = vmatprep.subr.bf16.mxu1 %v7815_v6  ;;  %5660 = vmatprep.subr.bf16.mxu0 %v9345_v27 }
 0x23b   : > { %3051 = vmatpush1.bf16.msra.mxu1 %v7822_v8  ;;  %5661 = vmatpush3.bf16.msra.mxu0 %v7345_v21  ;;  %v7847_v21 = vld [vmem:[%s9154_s2 + $0x1c] ss:$12 sps:$4 sm:$0xff]  }
 0x23c   : > { %3153 = vmatprep.subr.bf16.mxu1 %v7831_v17  ;;  %3297 = vmatprep.subr.bf16.mxu0 %v7653_v22 }
 0x23e   : > { %3069 = vmatmul.mubr.bf16.vlgmr.msra.gmra.mrb[76].mxu1 %v2754_v7  ;;  %5663 = vmatmul.mubr.bf16.vlgmr.msra.gmra.mrb[20].mxu0 %v3152_v20  ;;  %v7870_v7 = vld [vmem:[%s9154_s2 + $0x30] ss:$12 sps:$4 sm:$0xff]  }
 0x23f   : > { %3154 = vmatpush1.bf16.msra.mxu1 %v7840_v61  ;;  %3185 = vmatprep.mubr.bf16.mxu1 %v9347_v14 }
 0x240   : > { %3155 = vmatprep.subr.bf16.mxu1 %v7847_v21  ;;  %3298 = vmatpush1.bf16.msra.mxu0 %v7721_v40 }
 0x241   : > { %3299 = vmatprep.subr.bf16.mxu0 %v7728_v59  ;;  %3329 = vmatprep.mubr.bf16.mxu0 %v9347_v14 }
 0x243   : > { %3156 = vmatpush1.bf16.msra.mxu1 %v7856_v19 }
 0x244   : > { %3157 = vmatprep.subr.bf16.mxu1 %v7862_v37  ;;  %3300 = vmatpush1.bf16.msra.mxu0 %v7735_v57 }
 0x245   : > { %3301 = vmatprep.subr.bf16.mxu0 %v7742_v38 }
 0x247   : > { %3158 = vmatpush1.bf16.msra.mxu1 %v7870_v7 }
 0x248   : > { %3159 = vmatprep.subr.bf16.mxu1 %v7876_v60  ;;  %3302 = vmatpush1.bf16.msra.mxu0 %v7752_v3 }
 0x249   : > { %3303 = vmatprep.subr.bf16.mxu0 %v7759_v1  ;;  %v7904_v1 = vld [vmem:[%s9154_s2 + $0x7c] ss:$12 sps:$4 sm:$0xff]  }
 0x24b   : > { %3160 = vmatpush1.bf16.msra.mxu1 %v7884_v52 }
 0x24c   : > { %3161 = vmatprep.subr.bf16.mxu1 %v7890_v55  ;;  %3304 = vmatpush1.bf16.msra.mxu0 %v7766_v5  ;;  %v7918_v5 = vld [vmem:[%s9154_s2 + $0x94] ss:$12 sps:$4 sm:$0xff]  }
 0x24d   : > { %3305 = vmatprep.subr.bf16.mxu0 %v7773_v43  ;;  %v7912_v43 = vld [vmem:[%s9154_s2 + $0x78] ss:$12 sps:$4 sm:$0xff]  }
 0x24f   : > { %3162 = vmatpush1.bf16.msra.mxu1 %v7898_v47 }
 0x250   : > { %3163 = vmatprep.subr.bf16.mxu1 %v7904_v1  ;;  %3306 = vmatpush1.bf16.msra.mxu0 %v7780_v9  ;;  %v7932_v9 = vld [vmem:[%s9154_s2 + $0xac] ss:$12 sps:$4 sm:$0xff]  }
 0x251   : > { %3307 = vmatprep.subr.bf16.mxu0 %v7787_v29  ;;  %v7926_v29 = vld [vmem:[%s9154_s2 + $0x90] ss:$12 sps:$4 sm:$0xff]  }
 0x253   : > { %3164 = vmatpush1.bf16.msra.mxu1 %v7912_v43 }
 0x254   : > { %3165 = vmatprep.subr.bf16.mxu1 %v7918_v5  ;;  %3308 = vmatpush1.bf16.msra.mxu0 %v7794_v12 }
 0x255   : > { %3309 = vmatprep.subr.bf16.mxu0 %v7801_v28  ;;  %v7940_v28 = vld [vmem:[%s9154_s2 + $0xa8] ss:$12 sps:$4 sm:$0xff]  }
 0x257   : > { %3166 = vmatpush1.bf16.msra.mxu1 %v7926_v29 }
 0x258   : > { %3167 = vmatprep.subr.bf16.mxu1 %v7932_v9  ;;  %3310 = vmatpush1.bf16.msra.mxu0 %v7808_v16 }
 0x259   : > { %3311 = vmatprep.subr.bf16.mxu0 %v7815_v6 }
 0x25b   : > { %3168 = vmatpush1.bf16.msra.mxu1 %v7940_v28 }
 0x25c   : > { %3256 = vmatprep.subr.bf16.mxu1 %v7455_v49  ;;  %3312 = vmatpush1.bf16.msra.mxu0 %v7822_v8 }
 0x25d   : > { %3415 = vmatprep.subr.bf16.mxu0 %v7831_v17  ;;  %v2498_v17 = vld [vmem:[%s9159_s7] sm:$0x7] }
 0x25e   : > { %3186 = vmatmul.mubr.bf16.vlgmr.msra.gmra.mrb[80].mxu1 %v3152_v20  ;;  %v2481_v20 = vld [vmem:[%s9158_s6] sm:$0x7]  ;;  %v7973_v6 = vrot.slane %v2498_v17, %v7666_v39 }
 0x25f   : > { %3257 = vmatpush1.bf16.msra.mxu1 %v7465_v23  ;;  %3288 = vmatprep.mubr.bf16.mxu1 %v9347_v14  ;;  %v7970_v8 = vrot.slane %v2481_v20, %v7666_v39  ;;  %v7981_v39 = vrot.slane %v2498_v17, %v7660_v42 }
 0x260   : > { %3258 = vmatprep.subr.bf16.mxu1 %v7481_v53  ;;  %9361 = vst [vmem:[#allocation59_spill] sm:$0xff] %v7973_v6 }
 0x261   : > { %9360 = vst [vmem:[#allocation58_spill] sm:$0xff] %v7970_v8  ;;  %9363 = vst [vmem:[#allocation61_spill] sm:$0xff] %v7981_v39 }
 0x263   : > { %3259 = vmatpush1.bf16.msra.mxu1 %v7495_v30 }
 0x264   : > { %3260 = vmatprep.subr.bf16.mxu1 %v7507_v33 }
 0x267   : > { %3261 = vmatpush1.bf16.msra.mxu1 %v7517_v34 }
 0x268   : > { %3262 = vmatprep.subr.bf16.mxu1 %v7533_v10 }
 0x26b   : > { %3263 = vmatpush1.bf16.msra.mxu1 %v7545_v44 }
 0x26c   : > { %3264 = vmatprep.subr.bf16.mxu1 %v7559_v48 }
 0x26f   : > { %3265 = vmatpush1.bf16.msra.mxu1 %v7569_v54 }
 0x270   : > { %3266 = vmatprep.subr.bf16.mxu1 %v7579_v56 }
 0x273   : > { %3267 = vmatpush1.bf16.msra.mxu1 %v7593_v58 }
 0x274   : > { %3268 = vmatprep.subr.bf16.mxu1 %v7605_v63 }
 0x277   : > { %3269 = vmatpush1.bf16.msra.mxu1 %v7617_v25  ;;  %v7978_v25 = vrot.slane %v2481_v20, %v7660_v42 }
 0x278   : > { %3270 = vmatprep.subr.bf16.mxu1 %v7629_v11 }
 0x279   : > { %9362 = vst [vmem:[#allocation60_spill] sm:$0xff] %v7978_v25 }
 0x27b   : > { %3271 = vmatpush1.bf16.msra.mxu1 %v7641_v41 }
 0x27c   : > { %3338 = vmatprep.subr.bf16.mxu1 %v7460_v18 }
 0x2f1   : > { %v3029_v16 = vpop.f32.mrb[72].mxu1  ;;  %v3111_v12 = vpop.f32.mrb[16].mxu0 }
 0x2f2   : > { %v3031_v3 = vpop.f32.mrb[73].mxu1  ;;  %v3112_v38 = vpop.f32.mrb[17].mxu0 }
 0x2f3   : > { %v3119_v57 = vadd.f32 %v3031_v3, %v7970_v8  ;;  %v3033_v59 = vpop.f32.mrb[74].mxu1  ;;  %v3113_v40 = vpop.f32.mrb[18].mxu0  ;;  %v3118_v8 = vadd.f32 %v3029_v16, %v7978_v25 }
 0x2f4   : > { %v3122_v18 = vadd.f32 %v3113_v40, %v7973_v6  ;;  %v3034_v41 = vpop.f32.mrb[75].mxu1  ;;  %v3115_v22 = vpop.f32.mrb[19].mxu0 }
 0x2f6   : > { %v3131_v11 = vadd.f32 %v3122_v18, %v3119_v57 }
 0x2f8   : > { %v5355_v57 = vmul.f32 -1.442695, %v3131_v11 }
 0x311   : > { %v3070_v63 = vpop.f32.mrb[76].mxu1  ;;  %v3228_v58 = vpop.f32.mrb[20].mxu0 }
 0x312   : > { %v3072_v12 = vpop.f32.mrb[77].mxu1  ;;  %v5664_v56 = vpop.f32.mrb[21].mxu0 }
 0x313   : > { %v3073_v38 = vpop.f32.mrb[78].mxu1  ;;  %v3231_v54 = vpop.f32.mrb[22].mxu0  ;;  %v7986_v12 = vrot.slane %v2498_v17, %v7418_v46 }
 0x314   : > { %v3074_v3 = vpop.f32.mrb[79].mxu1  ;;  %v5665_v59 = vpop.f32.mrb[23].mxu0  ;;  %v7989_v54 = vrot.slane %v2481_v20, %v7418_v46 }
 0x315   : > { %v3121_v41 = vadd.f32 %v3074_v3, %v7981_v39  ;;  %v3123_v16 = vadd.f32 %v3115_v22, %v7986_v12 }
 0x316   : > { %v3120_v11 = vadd.f32 %v3070_v63, %v7989_v54 }
 0x317   : > { %v3124_v40 = vadd.f32 %v3121_v41, %v3118_v8 }
 0x319   : > { %v5354_v18 = vmul.f32 -1.442695, %v3124_v40 }
 0x31b   : > { %6232 = vpow2.f32 %v5354_v18 }
 0x31c   : > { %6234 = vpow2.f32 %v5355_v57 }
 0x325   : > { %v6233_v6 = vpop.eup %6232 }
 0x326   : > { %v3128_v48 = vadd.f32 1.0, %v6233_v6  ;;  %v6235_v42 = vpop.eup %6234 }
 0x327   : > { %v3135_v56 = vadd.f32 1.0, %v6235_v42 }
 0x328   : > { %6236 = vrcp.f32 %v3128_v48 }
 0x329   : > { %6238 = vrcp.f32 %v3135_v56 }
 0x331   : > { %v3187_v38 = vpop.f32.mrb[80].mxu1 }
 0x332   : > { %v6237_v3 = vpop.eup %6236  ;;  %v3188_v8 = vadd.f32 %v3187_v38, %v7669_v4  ;;  %v3189_v59 = vpop.f32.mrb[81].mxu1 }
 0x333   : > { %v3138_v6 = vmul.f32 %v6237_v3, %v3123_v16  ;;  %v3190_v48 = vadd.f32 %v3189_v59, %v7674_v50  ;;  %v3191_v41 = vpop.f32.mrb[82].mxu1  ;;  %v6239_v57 = vpop.eup %6238 }
 0x334   : > { %v3234_v17 = vadd.f32 %v7680_v13, %v3188_v8  ;;  %v3192_v40 = vpop.f32.mrb[83].mxu1  ;;  %v3141_v42 = vsub.f32 1.0, %v6239_v57  ;;  %v3143_v38 = vmul.f32 %v6239_v57, %v7714_v35  ;;  %v3229_v8 = vadd.f32 %v3228_v58, %v7701_v51  ;;  %v9365_v58 = vld [vmem:[#allocation14_spill] sm:$0xff]  ;;  %v9368_v57 = vld [vmem:[#allocation20_spill] sm:$0xff] }
 0x335   : > { %v3139_v18 = vadd.f32 %v3138_v6, %v3120_v11  ;;  %v3241_v46 = vadd.f32 %v7682_v0, %v3190_v48 }
 0x336   : > { %v5356_v22 = vmul.f32 -1.442695, %v3234_v17 }
 0x337   : > { %6240 = vtanh.f32 %v3139_v18  ;;  %v5357_v20 = vmul.f32 -1.442695, %v3241_v46 }
 0x338   : > { %6242 = vpow2.f32 %v5356_v22 }
 0x339   : > { %6244 = vpow2.f32 %v5357_v20  ;;  %v9367_v20 = vld [vmem:[#allocation18_spill] sm:$0xff] }
 0x341   : > { %v6241_v56 = vpop.eup %6240 }
 0x342   : > { %v6243_v63 = vpop.eup %6242  ;;  %v3142_v16 = vmul.f32 %v6241_v56, %v3141_v42  ;;  %v9369_v42 = vld [vmem:[#allocation22_spill] sm:$0xff]  ;;  %v9370_v56 = vld [vmem:[#allocation24_spill] sm:$0xff] }
 0x343   : > { %v3238_v3 = vadd.f32 1.0, %v6243_v63  ;;  %v6245_v13 = vpop.eup %6244  ;;  %v9371_v63 = vld [vmem:[#allocation26_spill] sm:$0xff] }
 0x344   : > { %v7998_v59 = vadd.f32 %v3143_v38, %v3142_v16  ;;  %v3245_v0 = vadd.f32 1.0, %v6245_v13  ;;  %v8048_v38 = vld [vmem:[%s9154_s2 + $0x8] ss:$12 sps:$4 sm:$0xff]  }
 0x345   : > { %6246 = vrcp.f32 %v3238_v3  ;;  %v8096_v3 = vld [vmem:[%s9154_s2 + $0x80] ss:$12 sps:$4 sm:$0xff]  }
 0x346   : > { %3145 = vst [vmem:[%s6581_s15] sm:$0xff] %v7998_v59  ;;  %6248 = vrcp.f32 %v3245_v0  ;;  %9376 = vst [vmem:[#allocation14_spill] sm:$0xff] %v8096_v3  ;;  %v9378_v13 = vld [vmem:[#allocation19_spill] sm:$0xff]  ;;  %v8105_v0 = vld [vmem:[%s9154_s2 + $0x98] ss:$12 sps:$4 sm:$0xff]  }
 0x34f   : > { %v6247_v11 = vpop.eup %6246 }
 0x350   : > { %v3248_v6 = vmul.f32 %v6247_v11, %v3229_v8  ;;  %v6249_v41 = vpop.eup %6248  ;;  %v9380_v8 = vld [vmem:[#allocation21_spill] sm:$0xff]  ;;  %v9381_v11 = vld [vmem:[#allocation23_spill] sm:$0xff] }
 0x351   : > { %v3251_v17 = vsub.f32 1.0, %v6249_v41  ;;  %v3253_v18 = vmul.f32 %v6249_v41, %v7716_v32  ;;  %v9366_v32 = vld [vmem:[#allocation16_spill] sm:$0xff]  ;;  %v9384_v41 = vld [vmem:[#allocation25_spill] sm:$0xff] }
 0x352   : > { %v3249_v48 = vadd.f32 %v3248_v6, %v7446_v24  ;;  %v9364_v24 = vld [vmem:[#allocation12_spill] sm:$0xff]  ;;  %9379 = vst [vmem:[#allocation16_spill] sm:$0xff] %v8105_v0 }
 0x353   : > { %v8114_v6 = vld [vmem:[%s9154_s2 + $0xb0] ss:$12 sps:$4 sm:$0xff]  }
 0x354   : > { %6250 = vtanh.f32 %v3249_v48  ;;  %9382 = vst [vmem:[#allocation18_spill] sm:$0xff] %v8114_v6  ;;  %v9383_v48 = vld [vmem:[#allocation27_spill] sm:$0xff] }
 0x35e   : > { %v6251_v40 = vpop.eup %6250 }
 0x35f   : > { %v3252_v35 = vmul.f32 %v6251_v40, %v3251_v17  ;;  %v9385_v17 = vld [vmem:[#allocation6_spill] sm:$0xff] }
 0x360   : > { %v9386_v40 = vld [vmem:[#allocation42_spill] sm:$0xff] }
 0x361   : > { %v8005_v46 = vadd.f32 %v3253_v18, %v3252_v35  ;;  %v9387_v35 = vld [vmem:[#allocation43_spill] sm:$0xff]  ;;  %v9388_v18 = vld [vmem:[#allocation44_spill] sm:$0xff] }
 0x363   : > { %v3255_v22 = vpack.c.bf16 %v7998_v59, %v8005_v46  ;;  %v3414_v16 = vpack.c.bf16 %v8005_v46, %v8005_v46 }
 0x365   : > { %3289 = vmatmul.mubr.bf16.vlgmr.msra.gmra.mrb[84].mxu1 %v3255_v22  ;;  %3330 = vmatmul.mubr.bf16.vlgmr.msra.gmra.mrb[24].mxu0 %v3255_v22 }
 0x366   : > { %3339 = vmatpush1.bf16.msra.mxu1 %v7470_v26  ;;  %3416 = vmatpush1.bf16.msra.mxu0 %v7840_v61 }
 0x367   : > { %3340 = vmatprep.subr.bf16.mxu1 %v7486_v62  ;;  %3417 = vmatprep.subr.bf16.mxu0 %v7847_v21 }
 0x368   : > { %3370 = vmatprep.mubr.bf16.mxu1 %v9347_v14  ;;  %3447 = vmatprep.mubr.bf16.mxu0 %v9347_v14 }
 0x36a   : > { %3341 = vmatpush1.bf16.msra.mxu1 %v7500_v31  ;;  %3418 = vmatpush1.bf16.msra.mxu0 %v7856_v19 }
 0x36b   : > { %3342 = vmatprep.subr.bf16.mxu1 %v7512_v2  ;;  %3419 = vmatprep.subr.bf16.mxu0 %v7862_v37 }
 0x36e   : > { %3343 = vmatpush1.bf16.msra.mxu1 %v7522_v36  ;;  %3420 = vmatpush1.bf16.msra.mxu0 %v7870_v7 }
 0x36f   : > { %3344 = vmatprep.subr.bf16.mxu1 %v7538_v15  ;;  %3421 = vmatprep.subr.bf16.mxu0 %v7876_v60 }
 0x372   : > { %3345 = vmatpush1.bf16.msra.mxu1 %v7550_v45  ;;  %3422 = vmatpush1.bf16.msra.mxu0 %v7884_v52 }
 0x373   : > { %3346 = vmatprep.subr.bf16.mxu1 %v9364_v24  ;;  %3423 = vmatprep.subr.bf16.mxu0 %v7890_v55 }
 0x376   : > { %3347 = vmatpush1.bf16.msra.mxu1 %v9365_v58  ;;  %3424 = vmatpush1.bf16.msra.mxu0 %v7898_v47 }
 0x377   : > { %3348 = vmatprep.subr.bf16.mxu1 %v9366_v32  ;;  %3425 = vmatprep.subr.bf16.mxu0 %v7904_v1 }
 0x37a   : > { %3349 = vmatpush1.bf16.msra.mxu1 %v9367_v20  ;;  %3426 = vmatpush1.bf16.msra.mxu0 %v7912_v43 }
 0x37b   : > { %3350 = vmatprep.subr.bf16.mxu1 %v9368_v57  ;;  %3427 = vmatprep.subr.bf16.mxu0 %v7918_v5 }
 0x37e   : > { %3351 = vmatpush1.bf16.msra.mxu1 %v9369_v42  ;;  %3428 = vmatpush1.bf16.msra.mxu0 %v7926_v29 }
 0x37f   : > { %3352 = vmatprep.subr.bf16.mxu1 %v9370_v56  ;;  %3429 = vmatprep.subr.bf16.mxu0 %v7932_v9 }
 0x382   : > { %3353 = vmatpush1.bf16.msra.mxu1 %v9371_v63  ;;  %3430 = vmatpush1.bf16.msra.mxu0 %v7940_v28 }
 0x383   : > { %5666 = vmatprep.subr.bf16.mxu1 %v9345_v27  ;;  %3518 = vmatprep.subr.bf16.mxu0 %v7455_v49  ;;  %v8060_v49 = vld [vmem:[%s9154_s2 + $0x20] ss:$12 sps:$4 sm:$0xff]  }
 0x385   : > { %3371 = vmatmul.mubr.bf16.vlgmr.msra.gmra.mrb[88].mxu1 %v3255_v22  ;;  %3448 = vmatmul.mubr.bf16.vlgmr.msra.gmra.mrb[28].mxu0 %v3414_v16  ;;  %v9389_v22 = vld [vmem:[#allocation45_spill] sm:$0xff] }
 0x386   : > { %5667 = vmatpush3.bf16.msra.mxu1 %v8048_v38  ;;  %5682 = vmatprep.mubr.msk.bf16.mxu1 %vm6519_vm0, %v9345_v27 }
 0x387   : > { %5668 = vmatprep.subr.bf16.mxu1 %v9345_v27  ;;  %3519 = vmatpush1.bf16.msra.mxu0 %v7465_v23  ;;  %v8069_v23 = vld [vmem:[%s9154_s2 + $0x38] ss:$12 sps:$4 sm:$0xff]  }
 0x388   : > { %3520 = vmatprep.subr.bf16.mxu0 %v7481_v53  ;;  %3550 = vmatprep.mubr.bf16.mxu0 %v9347_v14  ;;  %v8078_v53 = vld [vmem:[%s9154_s2 + $0x50] ss:$12 sps:$4 sm:$0xff]  }
 0x38a   : > { %5669 = vmatpush3.bf16.msra.mxu1 %v8060_v49 }
 0x38b   : > { %5670 = vmatprep.subr.bf16.mxu1 %v9345_v27  ;;  %3521 = vmatpush1.bf16.msra.mxu0 %v7495_v30  ;;  %v9372_v30 = vld [vmem:[#allocation11_spill] sm:$0xff] }
 0x38c   : > { %3522 = vmatprep.subr.bf16.mxu0 %v7507_v33  ;;  %v8087_v33 = vld [vmem:[%s9154_s2 + $0x68] ss:$12 sps:$4 sm:$0xff]  }
 0x38d   : > { %9373 = vst [vmem:[#allocation12_spill] sm:$0xff] %v8087_v33 }
 0x38e   : > { %5671 = vmatpush3.bf16.msra.mxu1 %v8069_v23 }
 0x38f   : > { %5672 = vmatprep.subr.bf16.mxu1 %v9345_v27  ;;  %3523 = vmatpush1.bf16.msra.mxu0 %v7517_v34  ;;  %v9374_v34 = vld [vmem:[#allocation13_spill] sm:$0xff] }
 0x390   : > { %3524 = vmatprep.subr.bf16.mxu0 %v7533_v10  ;;  %v9375_v10 = vld [vmem:[#allocation15_spill] sm:$0xff] }
 0x392   : > { %5673 = vmatpush3.bf16.msra.mxu1 %v8078_v53 }
 0x393   : > { %5674 = vmatprep.subr.bf16.mxu1 %v9345_v27  ;;  %3525 = vmatpush1.bf16.msra.mxu0 %v7545_v44  ;;  %v9377_v44 = vld [vmem:[#allocation17_spill] sm:$0xff] }
 0x394   : > { %3526 = vmatprep.subr.bf16.mxu0 %v9372_v30  ;;  %v9390_v30 = vld [vmem:[#allocation46_spill] sm:$0xff] }
 0x396   : > { %5675 = vmatpush3.bf16.msra.mxu1 %v8087_v33  ;;  %v9402_v33 = vld [vmem:[#allocation58_spill] sm:$0xff] }
 0x397   : > { %5676 = vmatprep.subr.bf16.mxu1 %v9345_v27  ;;  %3527 = vmatpush1.bf16.msra.mxu0 %v9374_v34  ;;  %v9391_v34 = vld [vmem:[#allocation47_spill] sm:$0xff] }
 0x398   : > { %3528 = vmatprep.subr.bf16.mxu0 %v9375_v10  ;;  %v9392_v10 = vld [vmem:[#allocation48_spill] sm:$0xff] }
 0x39a   : > { %5677 = vmatpush3.bf16.msra.mxu1 %v8096_v3 }
 0x39b   : > { %5678 = vmatprep.subr.bf16.mxu1 %v9345_v27  ;;  %3529 = vmatpush1.bf16.msra.mxu0 %v9377_v44  ;;  %v9393_v44 = vld [vmem:[#allocation49_spill] sm:$0xff] }
 0x39c   : > { %3530 = vmatprep.subr.bf16.mxu0 %v9378_v13  ;;  %v9394_v13 = vld [vmem:[#allocation50_spill] sm:$0xff] }
 0x39e   : > { %5679 = vmatpush3.bf16.msra.mxu1 %v8105_v0 }
 0x39f   : > { %5680 = vmatprep.subr.bf16.mxu1 %v9345_v27  ;;  %3531 = vmatpush1.bf16.msra.mxu0 %v9380_v8  ;;  %v9396_v8 = vld [vmem:[#allocation52_spill] sm:$0xff] }
 0x3a0   : > { %3532 = vmatprep.subr.bf16.mxu0 %v9381_v11 }
 0x3a2   : > { %5681 = vmatpush3.bf16.msra.mxu1 %v8114_v6 }
 0x3a3   : > { %3559 = vmatprep.subr.bf16.mxu1 %v9383_v48  ;;  %3533 = vmatpush1.bf16.msra.mxu0 %v9384_v41 }
 0x3a4   : > { %3600 = vmatprep.subr.bf16.mxu0 %v9385_v17  ;;  %v9397_v17 = vld [vmem:[#allocation53_spill] sm:$0xff] }
 0x3a5   : > { %5683 = vmatmul.mubr.bf16.vlgmr.msra.gmra.mrb[92].mxu1 %v3414_v16  ;;  %v9395_v16 = vld [vmem:[#allocation51_spill] sm:$0xff] }
 0x3a6   : > { %3560 = vmatpush1.bf16.msra.mxu1 %v9386_v40  ;;  %3591 = vmatprep.mubr.bf16.mxu1 %v9347_v14 }
 0x3a7   : > { %3561 = vmatprep.subr.bf16.mxu1 %v9387_v35  ;;  %v9398_v35 = vld [vmem:[#allocation54_spill] sm:$0xff] }
 0x3aa   : > { %3562 = vmatpush1.bf16.msra.mxu1 %v9388_v18  ;;  %v9399_v18 = vld [vmem:[#allocation55_spill] sm:$0xff] }
 0x3ab   : > { %3563 = vmatprep.subr.bf16.mxu1 %v9389_v22  ;;  %v9400_v22 = vld [vmem:[#allocation56_spill] sm:$0xff] }
 0x3ae   : > { %3564 = vmatpush1.bf16.msra.mxu1 %v9390_v30  ;;  %v9401_v30 = vld [vmem:[#allocation57_spill] sm:$0xff] }
 0x3af   : > { %3565 = vmatprep.subr.bf16.mxu1 %v9391_v34 }
 0x3b2   : > { %3566 = vmatpush1.bf16.msra.mxu1 %v9392_v10 }
 0x3b3   : > { %3567 = vmatprep.subr.bf16.mxu1 %v9393_v44 }
 0x3b6   : > { %3568 = vmatpush1.bf16.msra.mxu1 %v9394_v13 }
 0x3b7   : > { %3569 = vmatprep.subr.bf16.mxu1 %v9395_v16 }
 0x3ba   : > { %3570 = vmatpush1.bf16.msra.mxu1 %v9396_v8 }
 0x3bb   : > { %3571 = vmatprep.subr.bf16.mxu1 %v9397_v17 }
 0x3be   : > { %3572 = vmatpush1.bf16.msra.mxu1 %v9398_v35 }
 0x3bf   : > { %3573 = vmatprep.subr.bf16.mxu1 %v9399_v18 }
 0x3c2   : > { %3574 = vmatpush1.bf16.msra.mxu1 %v9400_v22 }
 0x3c3   : > { %3677 = vmatprep.subr.bf16.mxu1 %v9401_v30 }
 0x438   : > { %v3290_v34 = vpop.f32.mrb[84].mxu1  ;;  %v3331_v10 = vpop.f32.mrb[24].mxu0 }
 0x439   : > { %v3292_v40 = vpop.f32.mrb[85].mxu1  ;;  %v3333_v44 = vpop.f32.mrb[25].mxu0  ;;  %v3379_v8 = vadd.f32 %v3290_v34, %v7978_v25  ;;  %v9403_v25 = vld [vmem:[#allocation30_spill] sm:$0xff] }
 0x43a   : > { %v3294_v41 = vpop.f32.mrb[86].mxu1  ;;  %v3334_v13 = vpop.f32.mrb[26].mxu0  ;;  %v3380_v34 = vadd.f32 %v3292_v40, %v9402_v33 }
 0x43b   : > { %v3295_v48 = vpop.f32.mrb[87].mxu1  ;;  %v3335_v16 = vpop.f32.mrb[27].mxu0 }
 0x43c   : > { %v3382_v17 = vadd.f32 %v3335_v16, %v7981_v39 }
 0x43e   : > { %v3385_v6 = vadd.f32 %v3382_v17, %v3379_v8  ;;  %v9404_v8 = vld [vmem:[#allocation59_spill] sm:$0xff] }
 0x440   : > { %v5358_v35 = vmul.f32 -1.442695, %v3385_v6 }
 0x442   : > { %6252 = vpow2.f32 %v5358_v35 }
 0x44c   : > { %v6253_v18 = vpop.eup %6252 }
 0x44d   : > { %v3389_v11 = vadd.f32 1.0, %v6253_v18  ;;  %v9405_v18 = vld [vmem:[#allocation31_spill] sm:$0xff] }
 0x44f   : > { %6254 = vrcp.f32 %v3389_v11 }
 0x458   : > { %v3372_v22 = vpop.f32.mrb[88].mxu1  ;;  %v3449_v30 = vpop.f32.mrb[28].mxu0 }
 0x459   : > { %v3450_v0 = vadd.f32 %v3449_v30, %v7669_v4  ;;  %v3373_v3 = vpop.f32.mrb[89].mxu1  ;;  %v3451_v44 = vpop.f32.mrb[29].mxu0  ;;  %v3381_v4 = vadd.f32 %v3331_v10, %v7989_v54 }
 0x45a   : > { %v3452_v41 = vadd.f32 %v3451_v44, %v7674_v50  ;;  %v3374_v48 = vpop.f32.mrb[90].mxu1  ;;  %v3453_v13 = vpop.f32.mrb[30].mxu0 }
 0x45b   : > { %v3496_v16 = vadd.f32 %v9403_v25, %v3450_v0  ;;  %v3383_v6 = vadd.f32 %v3374_v48, %v9404_v8  ;;  %v3376_v35 = vpop.f32.mrb[91].mxu1  ;;  %v3454_v17 = vpop.f32.mrb[31].mxu0 }
 0x45c   : > { %v3503_v11 = vadd.f32 %v9405_v18, %v3452_v41  ;;  %v3384_v22 = vadd.f32 %v3376_v35, %v7986_v12  ;;  %v6255_v39 = vpop.eup %6254 }
 0x45d   : > { %v5361_v30 = vmul.f32 -1.442695, %v3496_v16  ;;  %v3392_v3 = vadd.f32 %v3383_v6, %v3380_v34 }
 0x45e   : > { %v3399_v44 = vmul.f32 %v6255_v39, %v3384_v22  ;;  %v5362_v40 = vmul.f32 -1.442695, %v3503_v11 }
 0x45f   : > { %6256 = vpow2.f32 %v5361_v30  ;;  %v5359_v13 = vmul.f32 -1.442695, %v3392_v3 }
 0x460   : > { %v3400_v50 = vadd.f32 %v3399_v44, %v3381_v4 }
 0x461   : > { %6258 = vpow2.f32 %v5359_v13 }
 0x462   : > { %6260 = vpow2.f32 %v5362_v40 }
 0x469   : > { %v6257_v25 = vpop.eup %6256 }
 0x46a   : > { %v3500_v48 = vadd.f32 1.0, %v6257_v25 }
 0x46b   : > { %v6259_v0 = vpop.eup %6258 }
 0x46c   : > { %v3396_v17 = vadd.f32 1.0, %v6259_v0  ;;  %v6261_v41 = vpop.eup %6260 }
 0x46d   : > { %v3507_v35 = vadd.f32 1.0, %v6261_v41 }
 0x46e   : > { %6262 = vrcp.f32 %v3396_v17 }
 0x46f   : > { %6264 = vtanh.f32 %v3400_v50  ;;  %v9406_v50 = vld [vmem:[#allocation4_spill] sm:$0xff] }
 0x470   : > { %6266 = vrcp.f32 %v3500_v48 }
 0x471   : > { %6268 = vrcp.f32 %v3507_v35 }
 0x478   : > { %v6263_v16 = vpop.eup %6262  ;;  %v3490_v34 = vpop.f32.mrb[92].mxu1 }
 0x479   : > { %v6265_v10 = vpop.eup %6264  ;;  %v3491_v39 = vadd.f32 %v3490_v34, %v7701_v51  ;;  %v5684_v6 = vpop.f32.mrb[93].mxu1  ;;  %v3402_v4 = vsub.f32 1.0, %v6263_v16  ;;  %v3404_v44 = vmul.f32 %v6263_v16, %v7998_v59  ;;  %v8242_v59 = vld [vmem:[%s9157_s5 + $0x94] ss:$24 sps:$4 sm:$0xff]   ;;  %v8292_v16 = vld [vmem:[%s9157_s5 + $0x120] ss:$24 sps:$4 sm:$0xff]  }
 0x47a   : > { %v6267_v18 = vpop.eup %6266  ;;  %v3493_v11 = vpop.f32.mrb[94].mxu1  ;;  %9410 = vst [vmem:[#allocation26_spill] sm:$0xff] %v8242_v59  ;;  %9420 = vst [vmem:[#allocation6_spill] sm:$0xff] %v8292_v16  ;;  %v9423_v6 = vld [vmem:[#allocation27_spill] sm:$0xff] }
 0x47b   : > { %v3510_v22 = vmul.f32 %v6267_v18, %v3491_v39  ;;  %v5685_v30 = vpop.f32.mrb[95].mxu1  ;;  %v3403_v3 = vmul.f32 %v6265_v10, %v3402_v4  ;;  %v6269_v25 = vpop.eup %6268  ;;  %v9421_v10 = vld [vmem:[#allocation23_spill] sm:$0xff]  ;;  %v9422_v39 = vld [vmem:[#allocation18_spill] sm:$0xff]  ;;  %v9424_v4 = vld [vmem:[#allocation25_spill] sm:$0xff] }
 0x47c   : > { %v3513_v0 = vsub.f32 1.0, %v6269_v25  ;;  %v3515_v41 = vmul.f32 %v6269_v25, %v8005_v46  ;;  %v8250_v46 = vld [vmem:[%s9157_s5 + $0x90] ss:$24 sps:$4 sm:$0xff]   ;;  %v8302_v18 = vld [vmem:[%s9157_s5 + $0x14] ss:$24 sps:$4 sm:$0xff]   ;;  %v9426_v11 = vld [vmem:[#allocation42_spill] sm:$0xff] }
 0x47d   : > { %v3511_v13 = vadd.f32 %v3510_v22, %v9406_v50  ;;  %v8150_v40 = vadd.f32 %v3404_v44, %v3403_v3  ;;  %9411 = vst [vmem:[#allocation11_spill] sm:$0xff] %v8250_v46  ;;  %9425 = vst [vmem:[#allocation58_spill] sm:$0xff] %v8302_v18  ;;  %v9427_v22 = vld [vmem:[#allocation43_spill] sm:$0xff]  ;;  %v9428_v30 = vld [vmem:[#allocation44_spill] sm:$0xff] }
 0x47e   : > { %v9429_v3 = vld [vmem:[#allocation45_spill] sm:$0xff]  ;;  %v9430_v44 = vld [vmem:[#allocation46_spill] sm:$0xff]  ;;  %v9431_v50 = vld [vmem:[#allocation47_spill] sm:$0xff] }
 0x47f   : > { %6270 = vtanh.f32 %v3511_v13  ;;  %5360 = vst [vmem:[%s6581_s15 + $0x8] sm:$0xff] %v8150_v40  ;;  %v9432_v13 = vld [vmem:[#allocation48_spill] sm:$0xff]  ;;  %v9433_v25 = vld [vmem:[#allocation49_spill] sm:$0xff] }
 0x489   : > { %v6271_v48 = vpop.eup %6270 }
 0x48a   : > { %v3514_v17 = vmul.f32 %v6271_v48, %v3513_v0  ;;  %v9434_v0 = vld [vmem:[#allocation50_spill] sm:$0xff]  ;;  %v9435_v48 = vld [vmem:[#allocation51_spill] sm:$0xff] }
 0x48c   : > { %v8155_v34 = vadd.f32 %v3515_v41, %v3514_v17  ;;  %v9436_v17 = vld [vmem:[#allocation52_spill] sm:$0xff]  ;;  %v9437_v41 = vld [vmem:[#allocation53_spill] sm:$0xff] }
 0x48e   : > { %v3517_v35 = vpack.c.bf16 %v8150_v40, %v8155_v34 }
 0x490   : > { %3551 = vmatmul.mubr.bf16.vlgmr.msra.gmra.mrb[32].mxu0 %v3517_v35  ;;  %3592 = vmatmul.mubr.bf16.vlgmr.msra.gmra.mrb[96].mxu1 %v3517_v35 }
 0x491   : > { %3601 = vmatpush1.bf16.msra.mxu0 %v7470_v26  ;;  %3678 = vmatpush1.bf16.msra.mxu1 %v7840_v61  ;;  %v3676_v26 = vpack.c.bf16 %v8155_v34, %v8155_v34 }
 0x492   : > { %3602 = vmatprep.subr.bf16.mxu0 %v7486_v62  ;;  %3679 = vmatprep.subr.bf16.mxu1 %v7847_v21  ;;  %v8197_v62 = vld [vmem:[%s9157_s5 + $0x4] ss:$24 sps:$4 sm:$0xff]  }
 0x493   : > { %3632 = vmatprep.mubr.bf16.mxu0 %v9347_v14  ;;  %3709 = vmatprep.mubr.bf16.mxu1 %v9347_v14 }
 0x495   : > { %3603 = vmatpush1.bf16.msra.mxu0 %v7500_v31  ;;  %3680 = vmatpush1.bf16.msra.mxu1 %v7856_v19  ;;  %v8207_v31 = vld [vmem:[%s9157_s5] ss:$24 sps:$4 sm:$0xff]  }
 0x496   : > { %3604 = vmatprep.subr.bf16.mxu0 %v7512_v2  ;;  %3681 = vmatprep.subr.bf16.mxu1 %v7862_v37  ;;  %v8213_v2 = vld [vmem:[%s9157_s5 + $0x34] ss:$24 sps:$4 sm:$0xff]  }
 0x499   : > { %3605 = vmatpush1.bf16.msra.mxu0 %v7522_v36  ;;  %3682 = vmatpush1.bf16.msra.mxu1 %v7870_v7  ;;  %v8222_v36 = vld [vmem:[%s9157_s5 + $0x30] ss:$24 sps:$4 sm:$0xff]  }
 0x49a   : > { %3606 = vmatprep.subr.bf16.mxu0 %v7538_v15  ;;  %3683 = vmatprep.subr.bf16.mxu1 %v7876_v60  ;;  %9407 = vst [vmem:[#allocation20_spill] sm:$0xff] %v8222_v36  ;;  %v8228_v15 = vld [vmem:[%s9157_s5 + $0x64] ss:$24 sps:$4 sm:$0xff]  }
 0x49b   : > { %9408 = vst [vmem:[#allocation22_spill] sm:$0xff] %v8228_v15 }
 0x49d   : > { %3607 = vmatpush1.bf16.msra.mxu0 %v7550_v45  ;;  %3684 = vmatpush1.bf16.msra.mxu1 %v7884_v52  ;;  %v8236_v45 = vld [vmem:[%s9157_s5 + $0x60] ss:$24 sps:$4 sm:$0xff]  }
 0x49e   : > { %3608 = vmatprep.subr.bf16.mxu0 %v9364_v24  ;;  %3685 = vmatprep.subr.bf16.mxu1 %v7890_v55  ;;  %9409 = vst [vmem:[#allocation24_spill] sm:$0xff] %v8236_v45  ;;  %v8256_v24 = vld [vmem:[%s9157_s5 + $0xc4] ss:$24 sps:$4 sm:$0xff]  }
 0x49f   : > { %9412 = vst [vmem:[#allocation13_spill] sm:$0xff] %v8256_v24 }
 0x4a1   : > { %3609 = vmatpush1.bf16.msra.mxu0 %v9365_v58  ;;  %3686 = vmatpush1.bf16.msra.mxu1 %v7898_v47  ;;  %v9413_v58 = vld [vmem:[#allocation12_spill] sm:$0xff] }
 0x4a2   : > { %3610 = vmatprep.subr.bf16.mxu0 %v9366_v32  ;;  %3687 = vmatprep.subr.bf16.mxu1 %v7904_v1  ;;  %v8264_v32 = vld [vmem:[%s9157_s5 + $0xc0] ss:$24 sps:$4 sm:$0xff]  }
 0x4a3   : > { %9414 = vst [vmem:[#allocation15_spill] sm:$0xff] %v8264_v32 }
 0x4a5   : > { %3611 = vmatpush1.bf16.msra.mxu0 %v9367_v20  ;;  %3688 = vmatpush1.bf16.msra.mxu1 %v7912_v43  ;;  %v8270_v20 = vld [vmem:[%s9157_s5 + $0xf4] ss:$24 sps:$4 sm:$0xff]  }
 0x4a6   : > { %3612 = vmatprep.subr.bf16.mxu0 %v9368_v57  ;;  %3689 = vmatprep.subr.bf16.mxu1 %v7918_v5  ;;  %9415 = vst [vmem:[#allocation17_spill] sm:$0xff] %v8270_v20  ;;  %v9416_v57 = vld [vmem:[#allocation14_spill] sm:$0xff] }
 0x4a9   : > { %3613 = vmatpush1.bf16.msra.mxu0 %v9369_v42  ;;  %3690 = vmatpush1.bf16.msra.mxu1 %v7926_v29  ;;  %v8278_v42 = vld [vmem:[%s9157_s5 + $0xf0] ss:$24 sps:$4 sm:$0xff]  }
 0x4aa   : > { %3614 = vmatprep.subr.bf16.mxu0 %v9370_v56  ;;  %3691 = vmatprep.subr.bf16.mxu1 %v7932_v9  ;;  %9417 = vst [vmem:[#allocation19_spill] sm:$0xff] %v8278_v42  ;;  %v8284_v56 = vld [vmem:[%s9157_s5 + $0x124] ss:$24 sps:$4 sm:$0xff]  }
 0x4ab   : > { %9418 = vst [vmem:[#allocation21_spill] sm:$0xff] %v8284_v56 }
 0x4ad   : > { %3615 = vmatpush1.bf16.msra.mxu0 %v9371_v63  ;;  %3692 = vmatpush1.bf16.msra.mxu1 %v7940_v28  ;;  %v9419_v63 = vld [vmem:[#allocation16_spill] sm:$0xff] }
 0x4ae   : > { %5686 = vmatprep.subr.bf16.mxu0 %v9345_v27  ;;  %3780 = vmatprep.subr.bf16.mxu1 %v8197_v62 }
 0x4b0   : > { %3633 = vmatmul.mubr.bf16.vlgmr.msra.gmra.mrb[36].mxu0 %v3517_v35  ;;  %3710 = vmatmul.mubr.bf16.vlgmr.msra.gmra.mrb[100].mxu1 %v3676_v26  ;;  %v9438_v35 = vld [vmem:[#allocation54_spill] sm:$0xff] }
 0x4b1   : > { %5687 = vmatpush3.bf16.msra.mxu0 %v8048_v38  ;;  %5702 = vmatprep.mubr.msk.bf16.mxu0 %vm6519_vm0, %v9345_v27 }
 0x4b2   : > { %5688 = vmatprep.subr.bf16.mxu0 %v9345_v27  ;;  %3781 = vmatpush1.bf16.msra.mxu1 %v8207_v31 }
 0x4b3   : > { %3782 = vmatprep.subr.bf16.mxu1 %v8213_v2  ;;  %3812 = vmatprep.mubr.bf16.mxu1 %v9347_v14 }
 0x4b5   : > { %5689 = vmatpush3.bf16.msra.mxu0 %v8060_v49 }
 0x4b6   : > { %5690 = vmatprep.subr.bf16.mxu0 %v9345_v27  ;;  %3783 = vmatpush1.bf16.msra.mxu1 %v8222_v36 }
 0x4b7   : > { %3784 = vmatprep.subr.bf16.mxu1 %v8228_v15 }
 0x4b9   : > { %5691 = vmatpush3.bf16.msra.mxu0 %v8069_v23 }
 0x4ba   : > { %5692 = vmatprep.subr.bf16.mxu0 %v9345_v27  ;;  %3785 = vmatpush1.bf16.msra.mxu1 %v8236_v45 }
 0x4bb   : > { %3786 = vmatprep.subr.bf16.mxu1 %v8242_v59 }
 0x4bd   : > { %5693 = vmatpush3.bf16.msra.mxu0 %v8078_v53 }
 0x4be   : > { %5694 = vmatprep.subr.bf16.mxu0 %v9345_v27  ;;  %3787 = vmatpush1.bf16.msra.mxu1 %v8250_v46 }
 0x4bf   : > { %3788 = vmatprep.subr.bf16.mxu1 %v8256_v24 }
 0x4c1   : > { %5695 = vmatpush3.bf16.msra.mxu0 %v9413_v58 }
 0x4c2   : > { %5696 = vmatprep.subr.bf16.mxu0 %v9345_v27  ;;  %3789 = vmatpush1.bf16.msra.mxu1 %v8264_v32 }
 0x4c3   : > { %3790 = vmatprep.subr.bf16.mxu1 %v8270_v20 }
 0x4c5   : > { %5697 = vmatpush3.bf16.msra.mxu0 %v9416_v57 }
 0x4c6   : > { %5698 = vmatprep.subr.bf16.mxu0 %v9345_v27  ;;  %3791 = vmatpush1.bf16.msra.mxu1 %v8278_v42 }
 0x4c7   : > { %3792 = vmatprep.subr.bf16.mxu1 %v8284_v56 }
 0x4c9   : > { %5699 = vmatpush3.bf16.msra.mxu0 %v9419_v63 }
 0x4ca   : > { %5700 = vmatprep.subr.bf16.mxu0 %v9345_v27  ;;  %3793 = vmatpush1.bf16.msra.mxu1 %v8292_v16 }
 0x4cb   : > { %3794 = vmatprep.subr.bf16.mxu1 %v9421_v10  ;;  %v9440_v10 = vld [vmem:[#allocation56_spill] sm:$0xff] }
 0x4cd   : > { %5701 = vmatpush3.bf16.msra.mxu0 %v9422_v39  ;;  %v9444_v39 = vld [vmem:[#allocation28_spill] sm:$0xff] }
 0x4ce   : > { %3821 = vmatprep.subr.bf16.mxu0 %v9423_v6  ;;  %3795 = vmatpush1.bf16.msra.mxu1 %v9424_v4  ;;  %v9441_v6 = vld [vmem:[#allocation57_spill] sm:$0xff] }
 0x4cf   : > { %3862 = vmatprep.subr.bf16.mxu1 %v8302_v18 }
 0x4d0   : > { %5703 = vmatmul.mubr.bf16.vlgmr.msra.gmra.mrb[40].mxu0 %v3676_v26  ;;  %v9439_v26 = vld [vmem:[#allocation55_spill] sm:$0xff] }
 0x4d1   : > { %3822 = vmatpush1.bf16.msra.mxu0 %v9426_v11  ;;  %3853 = vmatprep.mubr.bf16.mxu0 %v9347_v14 }
 0x4d2   : > { %3823 = vmatprep.subr.bf16.mxu0 %v9427_v22 }
 0x4d5   : > { %3824 = vmatpush1.bf16.msra.mxu0 %v9428_v30 }
 0x4d6   : > { %3825 = vmatprep.subr.bf16.mxu0 %v9429_v3 }
 0x4d9   : > { %3826 = vmatpush1.bf16.msra.mxu0 %v9430_v44 }
 0x4da   : > { %3827 = vmatprep.subr.bf16.mxu0 %v9431_v50 }
 0x4dd   : > { %3828 = vmatpush1.bf16.msra.mxu0 %v9432_v13 }
 0x4de   : > { %3829 = vmatprep.subr.bf16.mxu0 %v9433_v25  ;;  %v9442_v25 = vld [vmem:[#allocation60_spill] sm:$0xff] }
 0x4e1   : > { %3830 = vmatpush1.bf16.msra.mxu0 %v9434_v0 }
 0x4e2   : > { %3831 = vmatprep.subr.bf16.mxu0 %v9435_v48  ;;  %v9443_v48 = vld [vmem:[#allocation61_spill] sm:$0xff] }
 0x4e5   : > { %3832 = vmatpush1.bf16.msra.mxu0 %v9436_v17 }
 0x4e6   : > { %3833 = vmatprep.subr.bf16.mxu0 %v9437_v41 }
 0x4e9   : > { %3834 = vmatpush1.bf16.msra.mxu0 %v9438_v35 }
 0x4ea   : > { %3835 = vmatprep.subr.bf16.mxu0 %v9439_v26 }
 0x4ed   : > { %3836 = vmatpush1.bf16.msra.mxu0 %v9440_v10 }
 0x4ee   : > { %3939 = vmatprep.subr.bf16.mxu0 %v9441_v6 }
 0x563   : > { %v3552_v4 = vpop.f32.mrb[32].mxu0  ;;  %v3593_v11 = vpop.f32.mrb[96].mxu1 }
 0x564   : > { %v3554_v22 = vpop.f32.mrb[33].mxu0  ;;  %v3595_v30 = vpop.f32.mrb[97].mxu1  ;;  %v3641_v0 = vadd.f32 %v3552_v4, %v9442_v25  ;;  %v9446_v25 = vld [vmem:[#allocation32_spill] sm:$0xff] }
 0x565   : > { %v3556_v3 = vpop.f32.mrb[34].mxu0  ;;  %v3596_v44 = vpop.f32.mrb[98].mxu1  ;;  %v3642_v4 = vadd.f32 %v3554_v22, %v9402_v33 }
 0x566   : > { %v3557_v50 = vpop.f32.mrb[35].mxu0  ;;  %v3597_v13 = vpop.f32.mrb[99].mxu1  ;;  %v9445_v3 = vld [vmem:[#allocation29_spill] sm:$0xff] }
 0x567   : > { %v3644_v17 = vadd.f32 %v3597_v13, %v9443_v48 }
 0x569   : > { %v3647_v41 = vadd.f32 %v3644_v17, %v3641_v0 }
 0x56b   : > { %v5363_v35 = vmul.f32 -1.442695, %v3647_v41 }
 0x56d   : > { %6272 = vpow2.f32 %v5363_v35  ;;  %v9447_v35 = vld [vmem:[#allocation33_spill] sm:$0xff] }
 0x577   : > { %v6273_v26 = vpop.eup %6272 }
 0x578   : > { %v3651_v18 = vadd.f32 1.0, %v6273_v26 }
 0x57a   : > { %6274 = vrcp.f32 %v3651_v18 }
 0x583   : > { %v3634_v10 = vpop.f32.mrb[36].mxu0  ;;  %v3711_v6 = vpop.f32.mrb[100].mxu1 }
 0x584   : > { %v3712_v16 = vadd.f32 %v3711_v6, %v9444_v39  ;;  %v3635_v63 = vpop.f32.mrb[37].mxu0  ;;  %v3713_v30 = vpop.f32.mrb[101].mxu1  ;;  %v3643_v39 = vadd.f32 %v3593_v11, %v7989_v54 }
 0x585   : > { %v3714_v44 = vadd.f32 %v3713_v30, %v9445_v3  ;;  %v3636_v50 = vpop.f32.mrb[38].mxu0  ;;  %v3715_v56 = vpop.f32.mrb[102].mxu1 }
 0x586   : > { %v3758_v13 = vadd.f32 %v9446_v25, %v3712_v16  ;;  %v3645_v0 = vadd.f32 %v3636_v50, %v9404_v8  ;;  %v3638_v17 = vpop.f32.mrb[39].mxu0  ;;  %v3716_v41 = vpop.f32.mrb[103].mxu1 }
 0x587   : > { %v3765_v18 = vadd.f32 %v9447_v35, %v3714_v44  ;;  %v3646_v26 = vadd.f32 %v3638_v17, %v7986_v12  ;;  %v6275_v10 = vpop.eup %6274 }
 0x588   : > { %v5366_v6 = vmul.f32 -1.442695, %v3758_v13  ;;  %v3654_v63 = vadd.f32 %v3645_v0, %v3642_v4 }
 0x589   : > { %v3661_v30 = vmul.f32 %v6275_v10, %v3646_v26  ;;  %v5367_v22 = vmul.f32 -1.442695, %v3765_v18 }
 0x58a   : > { %6276 = vpow2.f32 %v5366_v6  ;;  %v5364_v56 = vmul.f32 -1.442695, %v3654_v63 }
 0x58b   : > { %v3662_v3 = vadd.f32 %v3661_v30, %v3643_v39 }
 0x58c   : > { %6278 = vpow2.f32 %v5364_v56 }
 0x58d   : > { %6280 = vpow2.f32 %v5367_v22 }
 0x594   : > { %v6277_v16 = vpop.eup %6276 }
 0x595   : > { %v3762_v50 = vadd.f32 1.0, %v6277_v16 }
 0x596   : > { %v6279_v25 = vpop.eup %6278 }
 0x597   : > { %v3658_v41 = vadd.f32 1.0, %v6279_v25  ;;  %v6281_v44 = vpop.eup %6280 }
 0x598   : > { %v3769_v17 = vadd.f32 1.0, %v6281_v44 }
 0x599   : > { %6282 = vrcp.f32 %v3658_v41 }
 0x59a   : > { %6284 = vtanh.f32 %v3662_v3  ;;  %v9448_v3 = vld [vmem:[#allocation5_spill] sm:$0xff] }
 0x59b   : > { %6286 = vrcp.f32 %v3762_v50 }
 0x59c   : > { %6288 = vrcp.f32 %v3769_v17 }
 0x5a3   : > { %v6283_v13 = vpop.eup %6282  ;;  %v3752_v4 = vpop.f32.mrb[40].mxu0 }
 0x5a4   : > { %v6285_v11 = vpop.eup %6284  ;;  %v3753_v0 = vadd.f32 %v3752_v4, %v7701_v51  ;;  %v5704_v35 = vpop.f32.mrb[41].mxu0  ;;  %v3664_v39 = vsub.f32 1.0, %v6283_v13  ;;  %v3666_v30 = vmul.f32 %v6283_v13, %v8150_v40  ;;  %v8347_v40 = vld [vmem:[%s9157_s5 + $0x10] ss:$24 sps:$4 sm:$0xff]   ;;  %v8363_v13 = vld [vmem:[%s9157_s5 + $0x40] ss:$24 sps:$4 sm:$0xff]  }
 0x5a5   : > { %v6287_v26 = vpop.eup %6286  ;;  %v3755_v18 = vpop.f32.mrb[42].mxu0  ;;  %v9453_v35 = vld [vmem:[#allocation18_spill] sm:$0xff] }
 0x5a6   : > { %v3772_v10 = vmul.f32 %v6287_v26, %v3753_v0  ;;  %v5705_v6 = vpop.f32.mrb[43].mxu0  ;;  %v3665_v63 = vmul.f32 %v6285_v11, %v3664_v39  ;;  %v6289_v16 = vpop.eup %6288  ;;  %v9451_v11 = vld [vmem:[#allocation6_spill] sm:$0xff]  ;;  %v8488_v0 = vld [vmem:[%s9157_s5 + $0x154] ss:$24 sps:$4 sm:$0xff]   ;;  %v8501_v26 = vld [vmem:[%s9157_s5 + $0x150] ss:$24 sps:$4 sm:$0xff]  }
 0x5a7   : > { %v3775_v25 = vsub.f32 1.0, %v6289_v16  ;;  %v3777_v44 = vmul.f32 %v6289_v16, %v8155_v34  ;;  %v8354_v34 = vld [vmem:[%s9157_s5 + $0x44] ss:$24 sps:$4 sm:$0xff]   ;;  %9452 = vst [vmem:[#allocation30_spill] sm:$0xff] %v8488_v0  ;;  %9455 = vst [vmem:[#allocation31_spill] sm:$0xff] %v8501_v26 }
 0x5a8   : > { %v3773_v56 = vadd.f32 %v3772_v10, %v9448_v3  ;;  %v8335_v22 = vadd.f32 %v3666_v30, %v3665_v63  ;;  %v8495_v39 = vld [vmem:[%s9157_s5 + $0xc] ss:$24 sps:$4 sm:$0xff]   ;;  %v8508_v10 = vld [vmem:[%s9157_s5 + $0x8] ss:$24 sps:$4 sm:$0xff]   ;;  %v8515_v6 = vld [vmem:[%s9157_s5 + $0x3c] ss:$24 sps:$4 sm:$0xff]  }
 0x5a9   : > { %9454 = vst [vmem:[#allocation59_spill] sm:$0xff] %v8495_v39  ;;  %v9456_v18 = vld [vmem:[#allocation58_spill] sm:$0xff]  ;;  %9457 = vst [vmem:[#allocation4_spill] sm:$0xff] %v8508_v10  ;;  %v8521_v63 = vld [vmem:[%s9157_s5 + $0x38] ss:$24 sps:$4 sm:$0xff]  }
 0x5aa   : > { %6290 = vtanh.f32 %v3773_v56  ;;  %5365 = vst [vmem:[%s6581_s15 + $0x10] sm:$0xff] %v8335_v22  ;;  %9458 = vst [vmem:[#allocation12_spill] sm:$0xff] %v8515_v6  ;;  %v8527_v30 = vld [vmem:[%s9157_s5 + $0x6c] ss:$24 sps:$4 sm:$0xff]   ;;  %v8533_v3 = vld [vmem:[%s9157_s5 + $0x68] ss:$24 sps:$4 sm:$0xff]  }
 0x5ab   : > { %9459 = vst [vmem:[#allocation14_spill] sm:$0xff] %v8521_v63  ;;  %9460 = vst [vmem:[#allocation23_spill] sm:$0xff] %v8527_v30  ;;  %v8539_v56 = vld [vmem:[%s9157_s5 + $0x9c] ss:$24 sps:$4 sm:$0xff]   ;;  %v8545_v16 = vld [vmem:[%s9157_s5 + $0x98] ss:$24 sps:$4 sm:$0xff]  }
 0x5ac   : > { %9461 = vst [vmem:[#allocation27_spill] sm:$0xff] %v8533_v3  ;;  %9462 = vst [vmem:[#allocation25_spill] sm:$0xff] %v8539_v56 }
 0x5ad   : > { %9463 = vst [vmem:[#allocation42_spill] sm:$0xff] %v8545_v16 }
 0x5b4   : > { %v6291_v50 = vpop.eup %6290 }
 0x5b5   : > { %v3776_v41 = vmul.f32 %v6291_v50, %v3775_v25  ;;  %v8551_v25 = vld [vmem:[%s9157_s5 + $0xcc] ss:$24 sps:$4 sm:$0xff]   ;;  %v8557_v50 = vld [vmem:[%s9157_s5 + $0xc8] ss:$24 sps:$4 sm:$0xff]  }
 0x5b6   : > { %9464 = vst [vmem:[#allocation43_spill] sm:$0xff] %v8551_v25  ;;  %9465 = vst [vmem:[#allocation44_spill] sm:$0xff] %v8557_v50 }
 0x5b7   : > { %v8340_v4 = vadd.f32 %v3777_v44, %v3776_v41  ;;  %v8563_v41 = vld [vmem:[%s9157_s5 + $0xfc] ss:$24 sps:$4 sm:$0xff]   ;;  %v8569_v44 = vld [vmem:[%s9157_s5 + $0xf8] ss:$24 sps:$4 sm:$0xff]  }
 0x5b8   : > { %9466 = vst [vmem:[#allocation45_spill] sm:$0xff] %v8563_v41  ;;  %9467 = vst [vmem:[#allocation46_spill] sm:$0xff] %v8569_v44 }
 0x5b9   : > { %v3779_v17 = vpack.c.bf16 %v8335_v22, %v8340_v4 }
 0x5bb   : > { %3813 = vmatmul.mubr.bf16.vlgmr.msra.gmra.mrb[104].mxu1 %v3779_v17  ;;  %3854 = vmatmul.mubr.bf16.vlgmr.msra.gmra.mrb[44].mxu0 %v3779_v17 }
 0x5bc   : > { %3863 = vmatpush1.bf16.msra.mxu1 %v8347_v40  ;;  %3940 = vmatpush1.bf16.msra.mxu0 %v7840_v61  ;;  %v8370_v61 = vld [vmem:[%s9157_s5 + $0x74] ss:$24 sps:$4 sm:$0xff]  }
 0x5bd   : > { %3864 = vmatprep.subr.bf16.mxu1 %v8354_v34  ;;  %3941 = vmatprep.subr.bf16.mxu0 %v7847_v21  ;;  %v8377_v21 = vld [vmem:[%s9157_s5 + $0x70] ss:$24 sps:$4 sm:$0xff]  }
 0x5be   : > { %3894 = vmatprep.mubr.bf16.mxu1 %v9347_v14  ;;  %3971 = vmatprep.mubr.bf16.mxu0 %v9347_v14 }
 0x5c0   : > { %3865 = vmatpush1.bf16.msra.mxu1 %v8363_v13  ;;  %3942 = vmatpush1.bf16.msra.mxu0 %v7856_v19  ;;  %v8384_v19 = vld [vmem:[%s9157_s5 + $0xa4] ss:$24 sps:$4 sm:$0xff]  }
 0x5c1   : > { %3866 = vmatprep.subr.bf16.mxu1 %v8370_v61  ;;  %3943 = vmatprep.subr.bf16.mxu0 %v7862_v37  ;;  %v8391_v37 = vld [vmem:[%s9157_s5 + $0xa0] ss:$24 sps:$4 sm:$0xff]  }
 0x5c4   : > { %3867 = vmatpush1.bf16.msra.mxu1 %v8377_v21  ;;  %3944 = vmatpush1.bf16.msra.mxu0 %v7870_v7  ;;  %v8398_v7 = vld [vmem:[%s9157_s5 + $0xd4] ss:$24 sps:$4 sm:$0xff]  }
 0x5c5   : > { %3868 = vmatprep.subr.bf16.mxu1 %v8384_v19  ;;  %3945 = vmatprep.subr.bf16.mxu0 %v7876_v60  ;;  %v8405_v60 = vld [vmem:[%s9157_s5 + $0xd0] ss:$24 sps:$4 sm:$0xff]  }
 0x5c8   : > { %3869 = vmatpush1.bf16.msra.mxu1 %v8391_v37  ;;  %3946 = vmatpush1.bf16.msra.mxu0 %v7884_v52  ;;  %v8412_v52 = vld [vmem:[%s9157_s5 + $0x104] ss:$24 sps:$4 sm:$0xff]  }
 0x5c9   : > { %3870 = vmatprep.subr.bf16.mxu1 %v8398_v7  ;;  %3947 = vmatprep.subr.bf16.mxu0 %v7890_v55  ;;  %v8419_v55 = vld [vmem:[%s9157_s5 + $0x100] ss:$24 sps:$4 sm:$0xff]  }
 0x5cc   : > { %3871 = vmatpush1.bf16.msra.mxu1 %v8405_v60  ;;  %3948 = vmatpush1.bf16.msra.mxu0 %v7898_v47  ;;  %v8426_v47 = vld [vmem:[%s9157_s5 + $0x134] ss:$24 sps:$4 sm:$0xff]  }
 0x5cd   : > { %3872 = vmatprep.subr.bf16.mxu1 %v8412_v52  ;;  %3949 = vmatprep.subr.bf16.mxu0 %v7904_v1  ;;  %v8433_v1 = vld [vmem:[%s9157_s5 + $0x130] ss:$24 sps:$4 sm:$0xff]  }
 0x5d0   : > { %3873 = vmatpush1.bf16.msra.mxu1 %v8419_v55  ;;  %3950 = vmatpush1.bf16.msra.mxu0 %v7912_v43  ;;  %v8440_v43 = vld [vmem:[%s9157_s5 + $0x164] ss:$24 sps:$4 sm:$0xff]  }
 0x5d1   : > { %3874 = vmatprep.subr.bf16.mxu1 %v8426_v47  ;;  %3951 = vmatprep.subr.bf16.mxu0 %v7918_v5  ;;  %v8447_v5 = vld [vmem:[%s9157_s5 + $0x160] ss:$24 sps:$4 sm:$0xff]  }
 0x5d4   : > { %3875 = vmatpush1.bf16.msra.mxu1 %v8433_v1  ;;  %3952 = vmatpush1.bf16.msra.mxu0 %v7926_v29  ;;  %v3938_v29 = vpack.c.bf16 %v8340_v4, %v8340_v4 }
 0x5d5   : > { %3876 = vmatprep.subr.bf16.mxu1 %v8440_v43  ;;  %3953 = vmatprep.subr.bf16.mxu0 %v7932_v9  ;;  %v9449_v9 = vld [vmem:[#allocation21_spill] sm:$0xff] }
 0x5d8   : > { %3877 = vmatpush1.bf16.msra.mxu1 %v8447_v5  ;;  %3954 = vmatpush1.bf16.msra.mxu0 %v7940_v28  ;;  %v9450_v28 = vld [vmem:[#allocation16_spill] sm:$0xff] }
 0x5d9   : > { %5706 = vmatprep.subr.bf16.mxu1 %v9345_v27  ;;  %4042 = vmatprep.subr.bf16.mxu0 %v8197_v62 }
 0x5db   : > { %3895 = vmatmul.mubr.bf16.vlgmr.msra.gmra.mrb[108].mxu1 %v3779_v17  ;;  %3972 = vmatmul.mubr.bf16.vlgmr.msra.gmra.mrb[48].mxu0 %v3938_v29  ;;  %v8575_v17 = vld [vmem:[%s9157_s5 + $0x12c] ss:$24 sps:$4 sm:$0xff]  }
 0x5dc   : > { %5707 = vmatpush3.bf16.msra.mxu1 %v8048_v38  ;;  %5722 = vmatprep.mubr.msk.bf16.mxu1 %vm6519_vm0, %v9345_v27  ;;  %9468 = vst [vmem:[#allocation47_spill] sm:$0xff] %v8575_v17 }
 0x5dd   : > { %5708 = vmatprep.subr.bf16.mxu1 %v9345_v27  ;;  %4043 = vmatpush1.bf16.msra.mxu0 %v8207_v31 }
 0x5de   : > { %4044 = vmatprep.subr.bf16.mxu0 %v8213_v2  ;;  %4074 = vmatprep.mubr.bf16.mxu0 %v9347_v14 }
 0x5e0   : > { %5709 = vmatpush3.bf16.msra.mxu1 %v8060_v49 }
 0x5e1   : > { %5710 = vmatprep.subr.bf16.mxu1 %v9345_v27  ;;  %4045 = vmatpush1.bf16.msra.mxu0 %v8222_v36 }
 0x5e2   : > { %4046 = vmatprep.subr.bf16.mxu0 %v8228_v15 }
 0x5e4   : > { %5711 = vmatpush3.bf16.msra.mxu1 %v8069_v23 }
 0x5e5   : > { %5712 = vmatprep.subr.bf16.mxu1 %v9345_v27  ;;  %4047 = vmatpush1.bf16.msra.mxu0 %v8236_v45 }
 0x5e6   : > { %4048 = vmatprep.subr.bf16.mxu0 %v8242_v59 }
 0x5e8   : > { %5713 = vmatpush3.bf16.msra.mxu1 %v8078_v53 }
 0x5e9   : > { %5714 = vmatprep.subr.bf16.mxu1 %v9345_v27  ;;  %4049 = vmatpush1.bf16.msra.mxu0 %v8250_v46 }
 0x5ea   : > { %4050 = vmatprep.subr.bf16.mxu0 %v8256_v24 }
 0x5ec   : > { %5715 = vmatpush3.bf16.msra.mxu1 %v9413_v58 }
 0x5ed   : > { %5716 = vmatprep.subr.bf16.mxu1 %v9345_v27  ;;  %4051 = vmatpush1.bf16.msra.mxu0 %v8264_v32 }
 0x5ee   : > { %4052 = vmatprep.subr.bf16.mxu0 %v8270_v20 }
 0x5f0   : > { %5717 = vmatpush3.bf16.msra.mxu1 %v9416_v57 }
 0x5f1   : > { %5718 = vmatprep.subr.bf16.mxu1 %v9345_v27  ;;  %4053 = vmatpush1.bf16.msra.mxu0 %v8278_v42 }
 0x5f2   : > { %4054 = vmatprep.subr.bf16.mxu0 %v9449_v9 }
 0x5f4   : > { %5719 = vmatpush3.bf16.msra.mxu1 %v9450_v28 }
 0x5f5   : > { %5720 = vmatprep.subr.bf16.mxu1 %v9345_v27  ;;  %4055 = vmatpush1.bf16.msra.mxu0 %v9451_v11 }
 0x5f6   : > { %4056 = vmatprep.subr.bf16.mxu0 %v8488_v0  ;;  %v9474_v0 = vld [vmem:[#allocation28_spill] sm:$0xff] }
 0x5f8   : > { %5721 = vmatpush3.bf16.msra.mxu1 %v9453_v35 }
 0x5f9   : > { %4083 = vmatprep.subr.bf16.mxu1 %v8495_v39  ;;  %4057 = vmatpush1.bf16.msra.mxu0 %v8501_v26 }
 0x5fa   : > { %4124 = vmatprep.subr.bf16.mxu0 %v9456_v18 }
 0x5fb   : > { %5723 = vmatmul.mubr.bf16.vlgmr.msra.gmra.mrb[112].mxu1 %v3938_v29  ;;  %v8581_v29 = vld [vmem:[%s9157_s5 + $0x128] ss:$24 sps:$4 sm:$0xff]  }
 0x5fc   : > { %4084 = vmatpush1.bf16.msra.mxu1 %v8508_v10  ;;  %4115 = vmatprep.mubr.bf16.mxu1 %v9347_v14  ;;  %9469 = vst [vmem:[#allocation48_spill] sm:$0xff] %v8581_v29 }
 0x5fd   : > { %4085 = vmatprep.subr.bf16.mxu1 %v8515_v6 }
 0x600   : > { %4086 = vmatpush1.bf16.msra.mxu1 %v8521_v63  ;;  %v9473_v63 = vld [vmem:[#allocation60_spill] sm:$0xff] }
 0x601   : > { %4087 = vmatprep.subr.bf16.mxu1 %v8527_v30 }
 0x604   : > { %4088 = vmatpush1.bf16.msra.mxu1 %v8533_v3 }
 0x605   : > { %4089 = vmatprep.subr.bf16.mxu1 %v8539_v56 }
 0x608   : > { %4090 = vmatpush1.bf16.msra.mxu1 %v8545_v16 }
 0x609   : > { %4091 = vmatprep.subr.bf16.mxu1 %v8551_v25 }
 0x60c   : > { %4092 = vmatpush1.bf16.msra.mxu1 %v8557_v50 }
 0x60d   : > { %4093 = vmatprep.subr.bf16.mxu1 %v8563_v41  ;;  %v8587_v41 = vld [vmem:[%s9157_s5 + $0x15c] ss:$24 sps:$4 sm:$0xff]  }
 0x60e   : > { %9470 = vst [vmem:[#allocation49_spill] sm:$0xff] %v8587_v41 }
 0x610   : > { %4094 = vmatpush1.bf16.msra.mxu1 %v8569_v44  ;;  %v8593_v44 = vld [vmem:[%s9157_s5 + $0x158] ss:$24 sps:$4 sm:$0xff]  }
 0x611   : > { %4095 = vmatprep.subr.bf16.mxu1 %v8575_v17  ;;  %9471 = vst [vmem:[#allocation50_spill] sm:$0xff] %v8593_v44  ;;  %v8599_v17 = vld [vmem:[%s9154_s2 + $0x4] ss:$12 sps:$4 sm:$0xff]  }
 0x612   : > { %9472 = vst [vmem:[#allocation51_spill] sm:$0xff] %v8599_v17 }
 0x614   : > { %4096 = vmatpush1.bf16.msra.mxu1 %v8581_v29 }
 0x615   : > { %4097 = vmatprep.subr.bf16.mxu1 %v8587_v41 }
 0x618   : > { %4098 = vmatpush1.bf16.msra.mxu1 %v8593_v44 }
 0x619   : > { %4201 = vmatprep.subr.bf16.mxu1 %v8599_v17 }
 0x68e   : > { %v3814_v29 = vpop.f32.mrb[104].mxu1  ;;  %v3855_v50 = vpop.f32.mrb[44].mxu0 }
 0x68f   : > { %v3816_v25 = vpop.f32.mrb[105].mxu1  ;;  %v3857_v16 = vpop.f32.mrb[45].mxu0  ;;  %v3903_v6 = vadd.f32 %v3814_v29, %v9473_v63  ;;  %v9476_v63 = vld [vmem:[#allocation34_spill] sm:$0xff] }
 0x690   : > { %v3818_v56 = vpop.f32.mrb[106].mxu1  ;;  %v3858_v41 = vpop.f32.mrb[46].mxu0  ;;  %v3904_v29 = vadd.f32 %v3816_v25, %v9402_v33 }
 0x691   : > { %v3819_v3 = vpop.f32.mrb[107].mxu1  ;;  %v3859_v30 = vpop.f32.mrb[47].mxu0  ;;  %v9475_v56 = vld [vmem:[#allocation29_spill] sm:$0xff] }
 0x692   : > { %v3906_v10 = vadd.f32 %v3859_v30, %v9443_v48 }
 0x694   : > { %v3909_v44 = vadd.f32 %v3906_v10, %v3903_v6 }
 0x696   : > { %v5368_v18 = vmul.f32 -1.442695, %v3909_v44 }
 0x698   : > { %6292 = vpow2.f32 %v5368_v18 }
 0x6a2   : > { %v6293_v26 = vpop.eup %6292 }
 0x6a3   : > { %v3913_v39 = vadd.f32 1.0, %v6293_v26  ;;  %v9477_v26 = vld [vmem:[#allocation35_spill] sm:$0xff] }
 0x6a5   : > { %6294 = vrcp.f32 %v3913_v39 }
 0x6ae   : > { %v3896_v35 = vpop.f32.mrb[108].mxu1  ;;  %v3973_v17 = vpop.f32.mrb[48].mxu0 }
 0x6af   : > { %v3974_v11 = vadd.f32 %v3973_v17, %v9474_v0  ;;  %v3897_v28 = vpop.f32.mrb[109].mxu1  ;;  %v3975_v16 = vpop.f32.mrb[49].mxu0  ;;  %v3905_v0 = vadd.f32 %v3855_v50, %v7989_v54 }
 0x6b0   : > { %v3976_v41 = vadd.f32 %v3975_v16, %v9475_v56  ;;  %v3898_v3 = vpop.f32.mrb[110].mxu1  ;;  %v3977_v9 = vpop.f32.mrb[50].mxu0 }
 0x6b1   : > { %v4020_v30 = vadd.f32 %v9476_v63, %v3974_v11  ;;  %v3907_v10 = vadd.f32 %v3898_v3, %v9404_v8  ;;  %v3900_v18 = vpop.f32.mrb[111].mxu1  ;;  %v3978_v6 = vpop.f32.mrb[51].mxu0 }
 0x6b2   : > { %v4027_v39 = vadd.f32 %v9477_v26, %v3976_v41  ;;  %v3908_v35 = vadd.f32 %v3900_v18, %v7986_v12  ;;  %v6295_v44 = vpop.eup %6294 }
 0x6b3   : > { %v5371_v17 = vmul.f32 -1.442695, %v4020_v30  ;;  %v3916_v28 = vadd.f32 %v3907_v10, %v3904_v29 }
 0x6b4   : > { %v3923_v16 = vmul.f32 %v6295_v44, %v3908_v35  ;;  %v5372_v25 = vmul.f32 -1.442695, %v4027_v39 }
 0x6b5   : > { %6296 = vpow2.f32 %v5371_v17  ;;  %v5369_v9 = vmul.f32 -1.442695, %v3916_v28 }
 0x6b6   : > { %v3924_v56 = vadd.f32 %v3923_v16, %v3905_v0 }
 0x6b7   : > { %6298 = vpow2.f32 %v5369_v9 }
 0x6b8   : > { %6300 = vpow2.f32 %v5372_v25 }
 0x6bf   : > { %v6297_v11 = vpop.eup %6296 }
 0x6c0   : > { %v4024_v3 = vadd.f32 1.0, %v6297_v11 }
 0x6c1   : > { %v6299_v63 = vpop.eup %6298 }
 0x6c2   : > { %v3920_v6 = vadd.f32 1.0, %v6299_v63  ;;  %v6301_v41 = vpop.eup %6300 }
 0x6c3   : > { %v4031_v18 = vadd.f32 1.0, %v6301_v41 }
 0x6c4   : > { %6302 = vrcp.f32 %v3920_v6 }
 0x6c5   : > { %6304 = vtanh.f32 %v3924_v56  ;;  %v9478_v56 = vld [vmem:[#allocation7_spill] sm:$0xff] }
 0x6c6   : > { %6306 = vrcp.f32 %v4024_v3 }
 0x6c7   : > { %6308 = vrcp.f32 %v4031_v18 }
 0x6ce   : > { %v6303_v30 = vpop.eup %6302  ;;  %v4014_v29 = vpop.f32.mrb[112].mxu1 }
 0x6cf   : > { %v6305_v50 = vpop.eup %6304  ;;  %v4015_v10 = vadd.f32 %v4014_v29, %v7701_v51  ;;  %v5724_v26 = vpop.f32.mrb[113].mxu1  ;;  %v3926_v0 = vsub.f32 1.0, %v6303_v30  ;;  %v3928_v16 = vmul.f32 %v6303_v30, %v8335_v22  ;;  %v8628_v22 = vld [vmem:[%s9154_s2] ss:$12 sps:$4 sm:$0xff]   ;;  %v8644_v30 = vld [vmem:[%s9154_s2 + $0x18] ss:$12 sps:$4 sm:$0xff]  }
 0x6d0   : > { %v6307_v35 = vpop.eup %6306  ;;  %v4017_v39 = vpop.f32.mrb[114].mxu1  ;;  %v8665_v26 = vld [vmem:[%s9154_s2 + $0x4c] ss:$12 sps:$4 sm:$0xff]  }
 0x6d1   : > { %v4034_v44 = vmul.f32 %v6307_v35, %v4015_v10  ;;  %v5725_v17 = vpop.f32.mrb[115].mxu1  ;;  %v3927_v28 = vmul.f32 %v6305_v50, %v3926_v0  ;;  %v6309_v11 = vpop.eup %6308  ;;  %v8651_v50 = vld [vmem:[%s9154_s2 + $0x34] ss:$12 sps:$4 sm:$0xff]   ;;  %v8658_v10 = vld [vmem:[%s9154_s2 + $0x30] ss:$12 sps:$4 sm:$0xff]  }
 0x6d2   : > { %v4037_v63 = vsub.f32 1.0, %v6309_v11  ;;  %v4039_v41 = vmul.f32 %v6309_v11, %v8340_v4  ;;  %v8635_v4 = vld [vmem:[%s9154_s2 + $0x1c] ss:$12 sps:$4 sm:$0xff]   ;;  %v8679_v35 = vld [vmem:[%s9154_s2 + $0x64] ss:$12 sps:$4 sm:$0xff]  }
 0x6d3   : > { %v4035_v9 = vadd.f32 %v4034_v44, %v9478_v56  ;;  %v8615_v25 = vadd.f32 %v3928_v16, %v3927_v28  ;;  %v8672_v0 = vld [vmem:[%s9154_s2 + $0x48] ss:$12 sps:$4 sm:$0xff]   ;;  %v8686_v39 = vld [vmem:[%s9154_s2 + $0x60] ss:$12 sps:$4 sm:$0xff]   ;;  %v8700_v17 = vld [vmem:[%s9154_s2 + $0x78] ss:$12 sps:$4 sm:$0xff]  }
 0x6d4   : > { %v8693_v44 = vld [vmem:[%s9154_s2 + $0x7c] ss:$12 sps:$4 sm:$0xff]   ;;  %v8707_v28 = vld [vmem:[%s9154_s2 + $0x94] ss:$12 sps:$4 sm:$0xff]   ;;  %v8721_v56 = vld [vmem:[%s9154_s2 + $0xac] ss:$12 sps:$4 sm:$0xff]  }
 0x6d5   : > { %6310 = vtanh.f32 %v4035_v9  ;;  %5370 = vst [vmem:[%s6581_s15 + $0x18] sm:$0xff] %v8615_v25  ;;  %v8714_v16 = vld [vmem:[%s9154_s2 + $0x90] ss:$12 sps:$4 sm:$0xff]   ;;  %v8728_v9 = vld [vmem:[%s9154_s2 + $0xa8] ss:$12 sps:$4 sm:$0xff]  }
 0x6df   : > { %v6311_v3 = vpop.eup %6310 }
 0x6e0   : > { %v4038_v6 = vmul.f32 %v6311_v3, %v4037_v63  ;;  %v9484_v63 = vld [vmem:[#allocation59_spill] sm:$0xff] }
 0x6e1   : > { %v9485_v3 = vld [vmem:[#allocation31_spill] sm:$0xff] }
 0x6e2   : > { %v8620_v29 = vadd.f32 %v4039_v41, %v4038_v6  ;;  %v9487_v6 = vld [vmem:[#allocation4_spill] sm:$0xff] }
 0x6e3   : > { %v9488_v41 = vld [vmem:[#allocation12_spill] sm:$0xff] }
 0x6e4   : > { %v4041_v18 = vpack.c.bf16 %v8615_v25, %v8620_v29  ;;  %v4200_v11 = vpack.c.bf16 %v8620_v29, %v8620_v29 }
 0x6e6   : > { %4075 = vmatmul.mubr.bf16.vlgmr.msra.gmra.mrb[52].mxu0 %v4041_v18  ;;  %4116 = vmatmul.mubr.bf16.vlgmr.msra.gmra.mrb[116].mxu1 %v4041_v18 }
 0x6e7   : > { %4125 = vmatpush1.bf16.msra.mxu0 %v8347_v40  ;;  %4202 = vmatpush1.bf16.msra.mxu1 %v8628_v22 }
 0x6e8   : > { %4126 = vmatprep.subr.bf16.mxu0 %v8354_v34  ;;  %4203 = vmatprep.subr.bf16.mxu1 %v8635_v4 }
 0x6e9   : > { %4156 = vmatprep.mubr.bf16.mxu0 %v9347_v14  ;;  %4233 = vmatprep.mubr.bf16.mxu1 %v9347_v14 }
 0x6eb   : > { %4127 = vmatpush1.bf16.msra.mxu0 %v8363_v13  ;;  %4204 = vmatpush1.bf16.msra.mxu1 %v8644_v30 }
 0x6ec   : > { %4128 = vmatprep.subr.bf16.mxu0 %v8370_v61  ;;  %4205 = vmatprep.subr.bf16.mxu1 %v8651_v50 }
 0x6ef   : > { %4129 = vmatpush1.bf16.msra.mxu0 %v8377_v21  ;;  %4206 = vmatpush1.bf16.msra.mxu1 %v8658_v10 }
 0x6f0   : > { %4130 = vmatprep.subr.bf16.mxu0 %v8384_v19  ;;  %4207 = vmatprep.subr.bf16.mxu1 %v8665_v26 }
 0x6f3   : > { %4131 = vmatpush1.bf16.msra.mxu0 %v8391_v37  ;;  %4208 = vmatpush1.bf16.msra.mxu1 %v8672_v0 }
 0x6f4   : > { %4132 = vmatprep.subr.bf16.mxu0 %v8398_v7  ;;  %4209 = vmatprep.subr.bf16.mxu1 %v8679_v35 }
 0x6f7   : > { %4133 = vmatpush1.bf16.msra.mxu0 %v8405_v60  ;;  %4210 = vmatpush1.bf16.msra.mxu1 %v8686_v39 }
 0x6f8   : > { %4134 = vmatprep.subr.bf16.mxu0 %v8412_v52  ;;  %4211 = vmatprep.subr.bf16.mxu1 %v8693_v44 }
 0x6fb   : > { %4135 = vmatpush1.bf16.msra.mxu0 %v8419_v55  ;;  %4212 = vmatpush1.bf16.msra.mxu1 %v8700_v17 }
 0x6fc   : > { %4136 = vmatprep.subr.bf16.mxu0 %v8426_v47  ;;  %4213 = vmatprep.subr.bf16.mxu1 %v8707_v28 }
 0x6ff   : > { %4137 = vmatpush1.bf16.msra.mxu0 %v8433_v1  ;;  %4214 = vmatpush1.bf16.msra.mxu1 %v8714_v16 }
 0x700   : > { %4138 = vmatprep.subr.bf16.mxu0 %v8440_v43  ;;  %4215 = vmatprep.subr.bf16.mxu1 %v8721_v56 }
 0x703   : > { %4139 = vmatpush1.bf16.msra.mxu0 %v8447_v5  ;;  %4216 = vmatpush1.bf16.msra.mxu1 %v8728_v9 }
 0x704   : > { %5726 = vmatprep.subr.bf16.mxu0 %v9345_v27  ;;  %4304 = vmatprep.subr.bf16.mxu1 %v8197_v62 }
 0x706   : > { %4157 = vmatmul.mubr.bf16.vlgmr.msra.gmra.mrb[56].mxu0 %v4041_v18  ;;  %4234 = vmatmul.mubr.bf16.vlgmr.msra.gmra.mrb[120].mxu1 %v4200_v11  ;;  %v9489_v18 = vld [vmem:[#allocation14_spill] sm:$0xff] }
 0x707   : > { %5727 = vmatpush3.bf16.msra.mxu0 %v8048_v38  ;;  %5742 = vmatprep.mubr.msk.bf16.mxu0 %vm6519_vm0, %v9345_v27  ;;  %v9479_v38 = vld [vmem:[#allocation21_spill] sm:$0xff] }
 0x708   : > { %5728 = vmatprep.subr.bf16.mxu0 %v9345_v27  ;;  %4305 = vmatpush1.bf16.msra.mxu1 %v8207_v31 }
 0x709   : > { %4306 = vmatprep.subr.bf16.mxu1 %v8213_v2  ;;  %4336 = vmatprep.mubr.bf16.mxu1 %v9347_v14 }
 0x70b   : > { %5729 = vmatpush3.bf16.msra.mxu0 %v8060_v49  ;;  %v9480_v49 = vld [vmem:[#allocation16_spill] sm:$0xff] }
 0x70c   : > { %5730 = vmatprep.subr.bf16.mxu0 %v9345_v27  ;;  %4307 = vmatpush1.bf16.msra.mxu1 %v8222_v36 }
 0x70d   : > { %4308 = vmatprep.subr.bf16.mxu1 %v8228_v15 }
 0x70f   : > { %5731 = vmatpush3.bf16.msra.mxu0 %v8069_v23  ;;  %v9481_v23 = vld [vmem:[#allocation6_spill] sm:$0xff] }
 0x710   : > { %5732 = vmatprep.subr.bf16.mxu0 %v9345_v27  ;;  %4309 = vmatpush1.bf16.msra.mxu1 %v8236_v45 }
 0x711   : > { %4310 = vmatprep.subr.bf16.mxu1 %v8242_v59  ;;  %v9504_v59 = vld [vmem:[#allocation28_spill] sm:$0xff] }
 0x713   : > { %5733 = vmatpush3.bf16.msra.mxu0 %v8078_v53  ;;  %v9482_v53 = vld [vmem:[#allocation30_spill] sm:$0xff] }
 0x714   : > { %5734 = vmatprep.subr.bf16.mxu0 %v9345_v27  ;;  %4311 = vmatpush1.bf16.msra.mxu1 %v8250_v46 }
 0x715   : > { %4312 = vmatprep.subr.bf16.mxu1 %v8256_v24 }
 0x717   : > { %5735 = vmatpush3.bf16.msra.mxu0 %v9413_v58  ;;  %v9483_v58 = vld [vmem:[#allocation18_spill] sm:$0xff] }
 0x718   : > { %5736 = vmatprep.subr.bf16.mxu0 %v9345_v27  ;;  %4313 = vmatpush1.bf16.msra.mxu1 %v8264_v32  ;;  %v9503_v32 = vld [vmem:[#allocation60_spill] sm:$0xff] }
 0x719   : > { %4314 = vmatprep.subr.bf16.mxu1 %v8270_v20 }
 0x71b   : > { %5737 = vmatpush3.bf16.msra.mxu0 %v9416_v57  ;;  %v9486_v57 = vld [vmem:[#allocation58_spill] sm:$0xff] }
 0x71c   : > { %5738 = vmatprep.subr.bf16.mxu0 %v9345_v27  ;;  %4315 = vmatpush1.bf16.msra.mxu1 %v8278_v42 }
 0x71d   : > { %4316 = vmatprep.subr.bf16.mxu1 %v9479_v38 }
 0x71f   : > { %5739 = vmatpush3.bf16.msra.mxu0 %v9480_v49  ;;  %v9490_v49 = vld [vmem:[#allocation23_spill] sm:$0xff] }
 0x720   : > { %5740 = vmatprep.subr.bf16.mxu0 %v9345_v27  ;;  %4317 = vmatpush1.bf16.msra.mxu1 %v9481_v23  ;;  %v9498_v23 = vld [vmem:[#allocation47_spill] sm:$0xff] }
 0x721   : > { %4318 = vmatprep.subr.bf16.mxu1 %v9482_v53  ;;  %v9491_v53 = vld [vmem:[#allocation27_spill] sm:$0xff] }
 0x723   : > { %5741 = vmatpush3.bf16.msra.mxu0 %v9483_v58  ;;  %v9492_v58 = vld [vmem:[#allocation25_spill] sm:$0xff] }
 0x724   : > { %4345 = vmatprep.subr.bf16.mxu0 %v9484_v63  ;;  %4319 = vmatpush1.bf16.msra.mxu1 %v9485_v3  ;;  %v9493_v63 = vld [vmem:[#allocation42_spill] sm:$0xff]  ;;  %v9494_v3 = vld [vmem:[#allocation43_spill] sm:$0xff] }
 0x725   : > { %4386 = vmatprep.subr.bf16.mxu1 %v9486_v57  ;;  %v9495_v57 = vld [vmem:[#allocation44_spill] sm:$0xff] }
 0x726   : > { %5743 = vmatmul.mubr.bf16.vlgmr.msra.gmra.mrb[60].mxu0 %v4200_v11  ;;  %v9496_v11 = vld [vmem:[#allocation45_spill] sm:$0xff] }
 0x727   : > { %4346 = vmatpush1.bf16.msra.mxu0 %v9487_v6  ;;  %4377 = vmatprep.mubr.bf16.mxu0 %v9347_v14  ;;  %v9497_v6 = vld [vmem:[#allocation46_spill] sm:$0xff] }
 0x728   : > { %4347 = vmatprep.subr.bf16.mxu0 %v9488_v41  ;;  %v9499_v41 = vld [vmem:[#allocation48_spill] sm:$0xff] }
 0x72b   : > { %4348 = vmatpush1.bf16.msra.mxu0 %v9489_v18  ;;  %v9500_v18 = vld [vmem:[#allocation49_spill] sm:$0xff] }
 0x72c   : > { %4349 = vmatprep.subr.bf16.mxu0 %v9490_v49  ;;  %v9501_v49 = vld [vmem:[#allocation50_spill] sm:$0xff] }
 0x72f   : > { %4350 = vmatpush1.bf16.msra.mxu0 %v9491_v53  ;;  %v9502_v53 = vld [vmem:[#allocation51_spill] sm:$0xff] }
 0x730   : > { %4351 = vmatprep.subr.bf16.mxu0 %v9492_v58 }
 0x733   : > { %4352 = vmatpush1.bf16.msra.mxu0 %v9493_v63 }
 0x734   : > { %4353 = vmatprep.subr.bf16.mxu0 %v9494_v3 }
 0x737   : > { %4354 = vmatpush1.bf16.msra.mxu0 %v9495_v57 }
 0x738   : > { %4355 = vmatprep.subr.bf16.mxu0 %v9496_v11 }
 0x73b   : > { %4356 = vmatpush1.bf16.msra.mxu0 %v9497_v6 }
 0x73c   : > { %4357 = vmatprep.subr.bf16.mxu0 %v9498_v23 }
 0x73f   : > { %4358 = vmatpush1.bf16.msra.mxu0 %v9499_v41 }
 0x740   : > { %4359 = vmatprep.subr.bf16.mxu0 %v9500_v18 }
 0x743   : > { %4360 = vmatpush1.bf16.msra.mxu0 %v9501_v49 }
 0x744   : > { %4463 = vmatprep.subr.bf16.mxu0 %v9502_v53 }
 0x7b9   : > { %v4076_v58 = vpop.f32.mrb[52].mxu0  ;;  %v4117_v63 = vpop.f32.mrb[116].mxu1 }
 0x7ba   : > { %v4078_v38 = vpop.f32.mrb[53].mxu0  ;;  %v4119_v3 = vpop.f32.mrb[117].mxu1  ;;  %v4165_v6 = vadd.f32 %v4076_v58, %v9503_v32  ;;  %v9506_v32 = vld [vmem:[#allocation36_spill] sm:$0xff] }
 0x7bb   : > { %v4080_v42 = vpop.f32.mrb[54].mxu0  ;;  %v4120_v57 = vpop.f32.mrb[118].mxu1  ;;  %v4166_v58 = vadd.f32 %v4078_v38, %v9402_v33 }
 0x7bc   : > { %v4081_v20 = vpop.f32.mrb[55].mxu0  ;;  %v4121_v11 = vpop.f32.mrb[119].mxu1  ;;  %v9505_v42 = vld [vmem:[#allocation29_spill] sm:$0xff] }
 0x7bd   : > { %v4168_v23 = vadd.f32 %v4121_v11, %v9443_v48 }
 0x7bf   : > { %v4171_v24 = vadd.f32 %v4168_v23, %v4165_v6 }
 0x7c1   : > { %v5373_v41 = vmul.f32 -1.442695, %v4171_v24 }
 0x7c3   : > { %6312 = vpow2.f32 %v5373_v41  ;;  %v9507_v41 = vld [vmem:[#allocation37_spill] sm:$0xff] }
 0x7cd   : > { %v6313_v18 = vpop.eup %6312 }
 0x7ce   : > { %v4175_v46 = vadd.f32 1.0, %v6313_v18 }
 0x7d0   : > { %6314 = vrcp.f32 %v4175_v46 }
 0x7d9   : > { %v4158_v49 = vpop.f32.mrb[56].mxu0  ;;  %v4235_v53 = vpop.f32.mrb[120].mxu1 }
 0x7da   : > { %v4236_v45 = vadd.f32 %v4235_v53, %v9504_v59  ;;  %v4159_v15 = vpop.f32.mrb[57].mxu0  ;;  %v4237_v3 = vpop.f32.mrb[121].mxu1  ;;  %v4167_v59 = vadd.f32 %v4117_v63, %v7989_v54 }
 0x7db   : > { %v4238_v57 = vadd.f32 %v4237_v3, %v9505_v42  ;;  %v4160_v20 = vpop.f32.mrb[58].mxu0  ;;  %v4239_v36 = vpop.f32.mrb[122].mxu1 }
 0x7dc   : > { %v4282_v11 = vadd.f32 %v9506_v32, %v4236_v45  ;;  %v4169_v24 = vadd.f32 %v4160_v20, %v9404_v8  ;;  %v4162_v23 = vpop.f32.mrb[59].mxu0  ;;  %v4240_v6 = vpop.f32.mrb[123].mxu1 }
 0x7dd   : > { %v4289_v46 = vadd.f32 %v9507_v41, %v4238_v57  ;;  %v4170_v18 = vadd.f32 %v4162_v23, %v7986_v12  ;;  %v6315_v49 = vpop.eup %6314 }
 0x7de   : > { %v5376_v53 = vmul.f32 -1.442695, %v4282_v11  ;;  %v4178_v15 = vadd.f32 %v4169_v24, %v4166_v58 }
 0x7df   : > { %v4185_v3 = vmul.f32 %v6315_v49, %v4170_v18  ;;  %v5377_v38 = vmul.f32 -1.442695, %v4289_v46 }
 0x7e0   : > { %6316 = vpow2.f32 %v5376_v53  ;;  %v5374_v36 = vmul.f32 -1.442695, %v4178_v15 }
 0x7e1   : > { %v4186_v42 = vadd.f32 %v4185_v3, %v4167_v59 }
 0x7e2   : > { %6318 = vpow2.f32 %v5374_v36 }
 0x7e3   : > { %6320 = vpow2.f32 %v5377_v38 }
 0x7ea   : > { %v6317_v45 = vpop.eup %6316 }
 0x7eb   : > { %v4286_v20 = vadd.f32 1.0, %v6317_v45 }
 0x7ec   : > { %v6319_v32 = vpop.eup %6318 }
 0x7ed   : > { %v4182_v6 = vadd.f32 1.0, %v6319_v32  ;;  %v6321_v57 = vpop.eup %6320 }
 0x7ee   : > { %v4293_v23 = vadd.f32 1.0, %v6321_v57 }
 0x7ef   : > { %6322 = vrcp.f32 %v4182_v6 }
 0x7f0   : > { %6324 = vtanh.f32 %v4186_v42  ;;  %v9508_v42 = vld [vmem:[#allocation8_spill] sm:$0xff] }
 0x7f1   : > { %6326 = vrcp.f32 %v4286_v20 }
 0x7f2   : > { %6328 = vrcp.f32 %v4293_v23 }
 0x7f9   : > { %v6323_v11 = vpop.eup %6322  ;;  %v4276_v58 = vpop.f32.mrb[60].mxu0 }
 0x7fa   : > { %v6325_v63 = vpop.eup %6324  ;;  %v4277_v24 = vadd.f32 %v4276_v58, %v7701_v51  ;;  %v5744_v41 = vpop.f32.mrb[61].mxu0  ;;  %v4188_v59 = vsub.f32 1.0, %v6323_v11  ;;  %v4190_v3 = vmul.f32 %v6323_v11, %v8615_v25  ;;  %v9509_v11 = vld [vmem:[#allocation20_spill] sm:$0xff] }
 0x7fb   : > { %v6327_v18 = vpop.eup %6326  ;;  %v4279_v46 = vpop.f32.mrb[62].mxu0  ;;  %v8878_v41 = vld [vmem:[%s9154_s2 + $0x50] ss:$12 sps:$4 sm:$0xff]  }
 0x7fc   : > { %v4296_v49 = vmul.f32 %v6327_v18, %v4277_v24  ;;  %v5745_v53 = vpop.f32.mrb[63].mxu0  ;;  %v4189_v15 = vmul.f32 %v6325_v63, %v4188_v59  ;;  %v6329_v45 = vpop.eup %6328  ;;  %v9510_v63 = vld [vmem:[#allocation22_spill] sm:$0xff]  ;;  %9513 = vst [vmem:[#allocation52_spill] sm:$0xff] %v8878_v41  ;;  %v9514_v59 = vld [vmem:[#allocation11_spill] sm:$0xff]  ;;  %v9515_v18 = vld [vmem:[#allocation13_spill] sm:$0xff] }
 0x7fd   : > { %v4299_v32 = vsub.f32 1.0, %v6329_v45  ;;  %v4301_v57 = vmul.f32 %v6329_v45, %v8620_v29  ;;  %v8848_v29 = vld [vmem:[%s9154_s2 + $0x8] ss:$12 sps:$4 sm:$0xff]   ;;  %v9512_v24 = vld [vmem:[#allocation26_spill] sm:$0xff]  ;;  %v9518_v53 = vld [vmem:[#allocation17_spill] sm:$0xff] }
 0x7fe   : > { %v4297_v36 = vadd.f32 %v4296_v49, %v9508_v42  ;;  %v8800_v38 = vadd.f32 %v4190_v3, %v4189_v15  ;;  %v8887_v46 = vld [vmem:[%s9154_s2 + $0x68] ss:$12 sps:$4 sm:$0xff]   ;;  %v8896_v15 = vld [vmem:[%s9154_s2 + $0x80] ss:$12 sps:$4 sm:$0xff]   ;;  %v9521_v42 = vld [vmem:[#allocation21_spill] sm:$0xff] }
 0x7ff   : > { %9516 = vst [vmem:[#allocation53_spill] sm:$0xff] %v8887_v46  ;;  %v9517_v49 = vld [vmem:[#allocation15_spill] sm:$0xff]  ;;  %9519 = vst [vmem:[#allocation54_spill] sm:$0xff] %v8896_v15  ;;  %v9523_v45 = vld [vmem:[#allocation6_spill] sm:$0xff] }
 0x800   : > { %6330 = vtanh.f32 %v4297_v36  ;;  %5375 = vst [vmem:[%s6581_s15 + $0x20] sm:$0xff] %v8800_v38  ;;  %v9520_v3 = vld [vmem:[#allocation19_spill] sm:$0xff]  ;;  %v8905_v36 = vld [vmem:[%s9154_s2 + $0x98] ss:$12 sps:$4 sm:$0xff]  }
 0x801   : > { %9522 = vst [vmem:[#allocation55_spill] sm:$0xff] %v8905_v36 }
 0x80a   : > { %v6331_v20 = vpop.eup %6330 }
 0x80b   : > { %v4300_v6 = vmul.f32 %v6331_v20, %v4299_v32  ;;  %v9524_v32 = vld [vmem:[#allocation30_spill] sm:$0xff]  ;;  %v8914_v20 = vld [vmem:[%s9154_s2 + $0xb0] ss:$12 sps:$4 sm:$0xff]  }
 0x80c   : > { %9525 = vst [vmem:[#allocation56_spill] sm:$0xff] %v8914_v20 }
 0x80d   : > { %v8805_v58 = vadd.f32 %v4301_v57, %v4300_v6  ;;  %v9526_v6 = vld [vmem:[#allocation59_spill] sm:$0xff] }
 0x80e   : > { %v9527_v57 = vld [vmem:[#allocation31_spill] sm:$0xff] }
 0x80f   : > { %v4303_v23 = vpack.c.bf16 %v8800_v38, %v8805_v58  ;;  %v4462_v25 = vpack.c.bf16 %v8805_v58, %v8805_v58 }
 0x811   : > { %4337 = vmatmul.mubr.bf16.vlgmr.msra.gmra.mrb[124].mxu1 %v4303_v23  ;;  %4378 = vmatmul.mubr.bf16.vlgmr.msra.gmra.mrb[64].mxu0 %v4303_v23 }
 0x812   : > { %4387 = vmatpush1.bf16.msra.mxu1 %v8347_v40  ;;  %4464 = vmatpush1.bf16.msra.mxu0 %v8628_v22 }
 0x813   : > { %4388 = vmatprep.subr.bf16.mxu1 %v8354_v34  ;;  %4465 = vmatprep.subr.bf16.mxu0 %v8635_v4 }
 0x814   : > { %4418 = vmatprep.mubr.bf16.mxu1 %v9347_v14  ;;  %4495 = vmatprep.mubr.bf16.mxu0 %v9347_v14 }
 0x816   : > { %4389 = vmatpush1.bf16.msra.mxu1 %v8363_v13  ;;  %4466 = vmatpush1.bf16.msra.mxu0 %v8644_v30 }
 0x817   : > { %4390 = vmatprep.subr.bf16.mxu1 %v8370_v61  ;;  %4467 = vmatprep.subr.bf16.mxu0 %v8651_v50 }
 0x81a   : > { %4391 = vmatpush1.bf16.msra.mxu1 %v8377_v21  ;;  %4468 = vmatpush1.bf16.msra.mxu0 %v8658_v10 }
 0x81b   : > { %4392 = vmatprep.subr.bf16.mxu1 %v8384_v19  ;;  %4469 = vmatprep.subr.bf16.mxu0 %v8665_v26 }
 0x81e   : > { %4393 = vmatpush1.bf16.msra.mxu1 %v8391_v37  ;;  %4470 = vmatpush1.bf16.msra.mxu0 %v8672_v0 }
 0x81f   : > { %4394 = vmatprep.subr.bf16.mxu1 %v8398_v7  ;;  %4471 = vmatprep.subr.bf16.mxu0 %v8679_v35 }
 0x822   : > { %4395 = vmatpush1.bf16.msra.mxu1 %v8405_v60  ;;  %4472 = vmatpush1.bf16.msra.mxu0 %v8686_v39 }
 0x823   : > { %4396 = vmatprep.subr.bf16.mxu1 %v8412_v52  ;;  %4473 = vmatprep.subr.bf16.mxu0 %v8693_v44 }
 0x826   : > { %4397 = vmatpush1.bf16.msra.mxu1 %v8419_v55  ;;  %4474 = vmatpush1.bf16.msra.mxu0 %v8700_v17 }
 0x827   : > { %4398 = vmatprep.subr.bf16.mxu1 %v8426_v47  ;;  %4475 = vmatprep.subr.bf16.mxu0 %v8707_v28 }
 0x82a   : > { %4399 = vmatpush1.bf16.msra.mxu1 %v8433_v1  ;;  %4476 = vmatpush1.bf16.msra.mxu0 %v8714_v16 }
 0x82b   : > { %4400 = vmatprep.subr.bf16.mxu1 %v8440_v43  ;;  %4477 = vmatprep.subr.bf16.mxu0 %v8721_v56 }
 0x82e   : > { %4401 = vmatpush1.bf16.msra.mxu1 %v8447_v5  ;;  %4478 = vmatpush1.bf16.msra.mxu0 %v8728_v9 }
 0x82f   : > { %5746 = vmatprep.subr.bf16.mxu1 %v9345_v27  ;;  %4566 = vmatprep.subr.bf16.mxu0 %v8197_v62  ;;  %v8860_v62 = vld [vmem:[%s9154_s2 + $0x20] ss:$12 sps:$4 sm:$0xff]  }
 0x831   : > { %4419 = vmatmul.mubr.bf16.vlgmr.msra.gmra.mrb[128].mxu1 %v4303_v23  ;;  %4496 = vmatmul.mubr.bf16.vlgmr.msra.gmra.mrb[68].mxu0 %v4462_v25  ;;  %v9528_v23 = vld [vmem:[#allocation58_spill] sm:$0xff] }
 0x832   : > { %5747 = vmatpush3.bf16.msra.mxu1 %v8848_v29  ;;  %5762 = vmatprep.mubr.msk.bf16.mxu1 %vm6519_vm0, %v9345_v27 }
 0x833   : > { %5748 = vmatprep.subr.bf16.mxu1 %v9345_v27  ;;  %4567 = vmatpush1.bf16.msra.mxu0 %v8207_v31  ;;  %v8869_v31 = vld [vmem:[%s9154_s2 + $0x38] ss:$12 sps:$4 sm:$0xff]  }
 0x834   : > { %4568 = vmatprep.subr.bf16.mxu0 %v8213_v2  ;;  %4598 = vmatprep.mubr.bf16.mxu0 %v9347_v14  ;;  %v9511_v2 = vld [vmem:[#allocation24_spill] sm:$0xff] }
 0x836   : > { %5749 = vmatpush3.bf16.msra.mxu1 %v8860_v62 }
 0x837   : > { %5750 = vmatprep.subr.bf16.mxu1 %v9345_v27  ;;  %4569 = vmatpush1.bf16.msra.mxu0 %v9509_v11  ;;  %v9529_v11 = vld [vmem:[#allocation4_spill] sm:$0xff] }
 0x838   : > { %4570 = vmatprep.subr.bf16.mxu0 %v9510_v63  ;;  %v9530_v63 = vld [vmem:[#allocation12_spill] sm:$0xff] }
 0x83a   : > { %5751 = vmatpush3.bf16.msra.mxu1 %v8869_v31 }
 0x83b   : > { %5752 = vmatprep.subr.bf16.mxu1 %v9345_v27  ;;  %4571 = vmatpush1.bf16.msra.mxu0 %v9511_v2  ;;  %v9531_v2 = vld [vmem:[#allocation14_spill] sm:$0xff] }
 0x83c   : > { %4572 = vmatprep.subr.bf16.mxu0 %v9512_v24  ;;  %v9532_v24 = vld [vmem:[#allocation23_spill] sm:$0xff] }
 0x83e   : > { %5753 = vmatpush3.bf16.msra.mxu1 %v8878_v41 }
 0x83f   : > { %5754 = vmatprep.subr.bf16.mxu1 %v9345_v27  ;;  %4573 = vmatpush1.bf16.msra.mxu0 %v9514_v59  ;;  %v9533_v59 = vld [vmem:[#allocation27_spill] sm:$0xff] }
 0x840   : > { %4574 = vmatprep.subr.bf16.mxu0 %v9515_v18  ;;  %v9534_v18 = vld [vmem:[#allocation25_spill] sm:$0xff] }
 0x842   : > { %5755 = vmatpush3.bf16.msra.mxu1 %v8887_v46 }
 0x843   : > { %5756 = vmatprep.subr.bf16.mxu1 %v9345_v27  ;;  %4575 = vmatpush1.bf16.msra.mxu0 %v9517_v49  ;;  %v9535_v49 = vld [vmem:[#allocation42_spill] sm:$0xff] }
 0x844   : > { %4576 = vmatprep.subr.bf16.mxu0 %v9518_v53  ;;  %v9536_v53 = vld [vmem:[#allocation43_spill] sm:$0xff] }
 0x846   : > { %5757 = vmatpush3.bf16.msra.mxu1 %v8896_v15 }
 0x847   : > { %5758 = vmatprep.subr.bf16.mxu1 %v9345_v27  ;;  %4577 = vmatpush1.bf16.msra.mxu0 %v9520_v3  ;;  %v9537_v3 = vld [vmem:[#allocation44_spill] sm:$0xff] }
 0x848   : > { %4578 = vmatprep.subr.bf16.mxu0 %v9521_v42  ;;  %v9539_v42 = vld [vmem:[#allocation46_spill] sm:$0xff] }
 0x84a   : > { %5759 = vmatpush3.bf16.msra.mxu1 %v8905_v36  ;;  %v9546_v36 = vld [vmem:[#allocation28_spill] sm:$0xff] }
 0x84b   : > { %5760 = vmatprep.subr.bf16.mxu1 %v9345_v27  ;;  %4579 = vmatpush1.bf16.msra.mxu0 %v9523_v45  ;;  %v9540_v45 = vld [vmem:[#allocation47_spill] sm:$0xff] }
 0x84c   : > { %4580 = vmatprep.subr.bf16.mxu0 %v9524_v32 }
 0x84e   : > { %5761 = vmatpush3.bf16.msra.mxu1 %v8914_v20 }
 0x84f   : > { %4607 = vmatprep.subr.bf16.mxu1 %v9526_v6  ;;  %4581 = vmatpush1.bf16.msra.mxu0 %v9527_v57  ;;  %v9545_v6 = vld [vmem:[#allocation60_spill] sm:$0xff] }
 0x850   : > { %4648 = vmatprep.subr.bf16.mxu0 %v9528_v23  ;;  %v9541_v23 = vld [vmem:[#allocation48_spill] sm:$0xff] }
 0x851   : > { %5763 = vmatmul.mubr.bf16.vlgmr.msra.gmra.mrb[132].mxu1 %v4462_v25  ;;  %v9538_v25 = vld [vmem:[#allocation45_spill] sm:$0xff] }
 0x852   : > { %4608 = vmatpush1.bf16.msra.mxu1 %v9529_v11  ;;  %4639 = vmatprep.mubr.bf16.mxu1 %v9347_v14 }
 0x853   : > { %4609 = vmatprep.subr.bf16.mxu1 %v9530_v63 }
 0x856   : > { %4610 = vmatpush1.bf16.msra.mxu1 %v9531_v2  ;;  %v9542_v2 = vld [vmem:[#allocation49_spill] sm:$0xff] }
 0x857   : > { %4611 = vmatprep.subr.bf16.mxu1 %v9532_v24  ;;  %v9543_v24 = vld [vmem:[#allocation50_spill] sm:$0xff] }
 0x85a   : > { %4612 = vmatpush1.bf16.msra.mxu1 %v9533_v59  ;;  %v9544_v59 = vld [vmem:[#allocation51_spill] sm:$0xff] }
 0x85b   : > { %4613 = vmatprep.subr.bf16.mxu1 %v9534_v18 }
 0x85e   : > { %4614 = vmatpush1.bf16.msra.mxu1 %v9535_v49 }
 0x85f   : > { %4615 = vmatprep.subr.bf16.mxu1 %v9536_v53 }
 0x862   : > { %4616 = vmatpush1.bf16.msra.mxu1 %v9537_v3 }
 0x863   : > { %4617 = vmatprep.subr.bf16.mxu1 %v9538_v25 }
 0x866   : > { %4618 = vmatpush1.bf16.msra.mxu1 %v9539_v42 }
 0x867   : > { %4619 = vmatprep.subr.bf16.mxu1 %v9540_v45 }
 0x86a   : > { %4620 = vmatpush1.bf16.msra.mxu1 %v9541_v23 }
 0x86b   : > { %4621 = vmatprep.subr.bf16.mxu1 %v9542_v2 }
 0x86e   : > { %4622 = vmatpush1.bf16.msra.mxu1 %v9543_v24 }
 0x86f   : > { %4725 = vmatprep.subr.bf16.mxu1 %v9544_v59 }
 0x8e4   : > { %v4338_v18 = vpop.f32.mrb[124].mxu1  ;;  %v4379_v49 = vpop.f32.mrb[64].mxu0 }
 0x8e5   : > { %v4340_v63 = vpop.f32.mrb[125].mxu1  ;;  %v4381_v53 = vpop.f32.mrb[65].mxu0  ;;  %v4427_v42 = vadd.f32 %v4338_v18, %v9545_v6  ;;  %v9548_v6 = vld [vmem:[#allocation38_spill] sm:$0xff] }
 0x8e6   : > { %v4342_v11 = vpop.f32.mrb[126].mxu1  ;;  %v4382_v3 = vpop.f32.mrb[66].mxu0  ;;  %v4428_v18 = vadd.f32 %v4340_v63, %v9402_v33 }
 0x8e7   : > { %v4343_v57 = vpop.f32.mrb[127].mxu1  ;;  %v4383_v25 = vpop.f32.mrb[67].mxu0  ;;  %v9547_v11 = vld [vmem:[#allocation29_spill] sm:$0xff] }
 0x8e8   : > { %v4430_v45 = vadd.f32 %v4383_v25, %v9443_v48 }
 0x8ea   : > { %v4433_v20 = vadd.f32 %v4430_v45, %v4427_v42 }
 0x8ec   : > { %v5378_v23 = vmul.f32 -1.442695, %v4433_v20 }
 0x8ee   : > { %6332 = vpow2.f32 %v5378_v23 }
 0x8f8   : > { %v6333_v2 = vpop.eup %6332 }
 0x8f9   : > { %v4437_v32 = vadd.f32 1.0, %v6333_v2  ;;  %v9549_v2 = vld [vmem:[#allocation39_spill] sm:$0xff] }
 0x8fb   : > { %6334 = vrcp.f32 %v4437_v32 }
 0x904   : > { %v4420_v24 = vpop.f32.mrb[128].mxu1  ;;  %v4497_v59 = vpop.f32.mrb[68].mxu0 }
 0x905   : > { %v4498_v15 = vadd.f32 %v4497_v59, %v9546_v36  ;;  %v4421_v46 = vpop.f32.mrb[129].mxu1  ;;  %v4499_v53 = vpop.f32.mrb[69].mxu0  ;;  %v4429_v36 = vadd.f32 %v4379_v49, %v7989_v54 }
 0x906   : > { %v4500_v3 = vadd.f32 %v4499_v53, %v9547_v11  ;;  %v4422_v57 = vpop.f32.mrb[130].mxu1  ;;  %v4501_v41 = vpop.f32.mrb[70].mxu0 }
 0x907   : > { %v4544_v25 = vadd.f32 %v9548_v6, %v4498_v15  ;;  %v4431_v20 = vadd.f32 %v4422_v57, %v9404_v8  ;;  %v4424_v42 = vpop.f32.mrb[131].mxu1  ;;  %v4502_v45 = vpop.f32.mrb[71].mxu0 }
 0x908   : > { %v4551_v32 = vadd.f32 %v9549_v2, %v4500_v3  ;;  %v4432_v24 = vadd.f32 %v4424_v42, %v7986_v12  ;;  %v6335_v23 = vpop.eup %6334 }
 0x909   : > { %v5381_v59 = vmul.f32 -1.442695, %v4544_v25  ;;  %v4440_v46 = vadd.f32 %v4431_v20, %v4428_v18 }
 0x90a   : > { %v4447_v53 = vmul.f32 %v6335_v23, %v4432_v24  ;;  %v5382_v63 = vmul.f32 -1.442695, %v4551_v32 }
 0x90b   : > { %6336 = vpow2.f32 %v5381_v59  ;;  %v5379_v41 = vmul.f32 -1.442695, %v4440_v46 }
 0x90c   : > { %v4448_v11 = vadd.f32 %v4447_v53, %v4429_v36 }
 0x90d   : > { %6338 = vpow2.f32 %v5379_v41 }
 0x90e   : > { %6340 = vpow2.f32 %v5382_v63 }
 0x915   : > { %v6337_v15 = vpop.eup %6336 }
 0x916   : > { %v4548_v57 = vadd.f32 1.0, %v6337_v15 }
 0x917   : > { %v6339_v6 = vpop.eup %6338 }
 0x918   : > { %v4444_v45 = vadd.f32 1.0, %v6339_v6  ;;  %v6341_v3 = vpop.eup %6340 }
 0x919   : > { %v4555_v42 = vadd.f32 1.0, %v6341_v3 }
 0x91a   : > { %6342 = vrcp.f32 %v4444_v45 }
 0x91b   : > { %6344 = vtanh.f32 %v4448_v11  ;;  %v9550_v11 = vld [vmem:[#allocation9_spill] sm:$0xff] }
 0x91c   : > { %6346 = vrcp.f32 %v4548_v57 }
 0x91d   : > { %6348 = vrcp.f32 %v4555_v42 }
 0x924   : > { %v6343_v25 = vpop.eup %6342  ;;  %v4538_v18 = vpop.f32.mrb[132].mxu1 }
 0x925   : > { %v6345_v49 = vpop.eup %6344  ;;  %v4539_v20 = vadd.f32 %v4538_v18, %v7701_v51  ;;  %v5764_v2 = vpop.f32.mrb[133].mxu1  ;;  %v4450_v36 = vsub.f32 1.0, %v6343_v25  ;;  %v4452_v53 = vmul.f32 %v6343_v25, %v8800_v38  ;;  %v9566_v38 = vld [vmem:[#allocation43_spill] sm:$0xff]  ;;  %v9571_v25 = vld [vmem:[#allocation48_spill] sm:$0xff] }
 0x926   : > { %v6347_v24 = vpop.eup %6346  ;;  %v4541_v32 = vpop.f32.mrb[134].mxu1 }
 0x927   : > { %v4558_v23 = vmul.f32 %v6347_v24, %v4539_v20  ;;  %v5765_v59 = vpop.f32.mrb[135].mxu1  ;;  %v4451_v46 = vmul.f32 %v6345_v49, %v4450_v36  ;;  %v6349_v15 = vpop.eup %6348  ;;  %v9572_v49 = vld [vmem:[#allocation49_spill] sm:$0xff]  ;;  %v9573_v20 = vld [vmem:[#allocation50_spill] sm:$0xff] }
 0x928   : > { %v4561_v6 = vsub.f32 1.0, %v6349_v15  ;;  %v4563_v3 = vmul.f32 %v6349_v15, %v8805_v58  ;;  %v9567_v58 = vld [vmem:[#allocation44_spill] sm:$0xff] }
 0x929   : > { %v4559_v41 = vadd.f32 %v4558_v23, %v9550_v11  ;;  %v8950_v63 = vadd.f32 %v4452_v53, %v4451_v46  ;;  %v9574_v11 = vld [vmem:[#allocation60_spill] sm:$0xff] }
 0x92b   : > { %6350 = vtanh.f32 %v4559_v41  ;;  %5380 = vst [vmem:[%s6581_s15 + $0x28] sm:$0xff] %v8950_v63 }
 0x935   : > { %v6351_v57 = vpop.eup %6350 }
 0x936   : > { %v4562_v45 = vmul.f32 %v6351_v57, %v4561_v6 }
 0x938   : > { %v8955_v18 = vadd.f32 %v4563_v3, %v4562_v45 }
 0x93a   : > { %v4565_v42 = vpack.c.bf16 %v8950_v63, %v8955_v18 }
 0x93c   : > { %4599 = vmatmul.mubr.bf16.vlgmr.msra.gmra.mrb[72].mxu0 %v4565_v42  ;;  %4640 = vmatmul.mubr.bf16.vlgmr.msra.gmra.mrb[136].mxu1 %v4565_v42 }
 0x93d   : > { %4649 = vmatpush1.bf16.msra.mxu0 %v8347_v40  ;;  %4726 = vmatpush1.bf16.msra.mxu1 %v8628_v22  ;;  %v4724_v40 = vpack.c.bf16 %v8955_v18, %v8955_v18  ;;  %v6489_v22 = vld [vmem:[%s9157_s5 + $0xf0] ss:$24 sps:$4 sm:$0xff]  }
 0x93e   : > { %4650 = vmatprep.subr.bf16.mxu0 %v8354_v34  ;;  %4727 = vmatprep.subr.bf16.mxu1 %v8635_v4  ;;  %v6478_v34 = vld [vmem:[%s9157_s5 + $0x4] ss:$24 sps:$4 sm:$0xff]  }
 0x93f   : > { %4680 = vmatprep.mubr.bf16.mxu0 %v9347_v14  ;;  %4757 = vmatprep.mubr.bf16.mxu1 %v9347_v14  ;;  %v6490_v4 = vld [vmem:[%s9157_s5 + $0x124] ss:$24 sps:$4 sm:$0xff]  }
 0x941   : > { %4651 = vmatpush1.bf16.msra.mxu0 %v8363_v13  ;;  %4728 = vmatpush1.bf16.msra.mxu1 %v8644_v30  ;;  %v6479_v13 = vld [vmem:[%s9157_s5] ss:$24 sps:$4 sm:$0xff]   ;;  %v9554_v30 = vld [vmem:[#allocation55_spill] sm:$0xff] }
 0x942   : > { %4652 = vmatprep.subr.bf16.mxu0 %v8370_v61  ;;  %4729 = vmatprep.subr.bf16.mxu1 %v8651_v50  ;;  %v6480_v61 = vld [vmem:[%s9157_s5 + $0x34] ss:$24 sps:$4 sm:$0xff]   ;;  %v6491_v50 = vld [vmem:[%s9157_s5 + $0x120] ss:$24 sps:$4 sm:$0xff]  }
 0x945   : > { %4653 = vmatpush1.bf16.msra.mxu0 %v8377_v21  ;;  %4730 = vmatpush1.bf16.msra.mxu1 %v8658_v10  ;;  %v6481_v21 = vld [vmem:[%s9157_s5 + $0x30] ss:$24 sps:$4 sm:$0xff]   ;;  %v9555_v10 = vld [vmem:[#allocation30_spill] sm:$0xff] }
 0x946   : > { %4654 = vmatprep.subr.bf16.mxu0 %v8384_v19  ;;  %4731 = vmatprep.subr.bf16.mxu1 %v8665_v26  ;;  %v6482_v19 = vld [vmem:[%s9157_s5 + $0x64] ss:$24 sps:$4 sm:$0xff]   ;;  %v9556_v26 = vld [vmem:[#allocation56_spill] sm:$0xff] }
 0x949   : > { %4655 = vmatpush1.bf16.msra.mxu0 %v8391_v37  ;;  %4732 = vmatpush1.bf16.msra.mxu1 %v8672_v0  ;;  %v6483_v37 = vld [vmem:[%s9157_s5 + $0x60] ss:$24 sps:$4 sm:$0xff]   ;;  %v9557_v0 = vld [vmem:[#allocation59_spill] sm:$0xff] }
 0x94a   : > { %4656 = vmatprep.subr.bf16.mxu0 %v8398_v7  ;;  %4733 = vmatprep.subr.bf16.mxu1 %v8679_v35  ;;  %v6484_v7 = vld [vmem:[%s9157_s5 + $0x94] ss:$24 sps:$4 sm:$0xff]  }
 0x94b   : > { %v9558_v35 = vld [vmem:[#allocation31_spill] sm:$0xff] }
 0x94d   : > { %4657 = vmatpush1.bf16.msra.mxu0 %v8405_v60  ;;  %4734 = vmatpush1.bf16.msra.mxu1 %v8686_v39  ;;  %v9551_v60 = vld [vmem:[#allocation52_spill] sm:$0xff] }
 0x94e   : > { %4658 = vmatprep.subr.bf16.mxu0 %v8412_v52  ;;  %4735 = vmatprep.subr.bf16.mxu1 %v8693_v44  ;;  %v6485_v52 = vld [vmem:[%s9157_s5 + $0x90] ss:$24 sps:$4 sm:$0xff]   ;;  %v6492_v39 = vld [vmem:[%s9157_s5 + $0x14] ss:$24 sps:$4 sm:$0xff]  }
 0x94f   : > { %v9560_v44 = vld [vmem:[#allocation12_spill] sm:$0xff] }
 0x951   : > { %4659 = vmatpush1.bf16.msra.mxu0 %v8419_v55  ;;  %4736 = vmatpush1.bf16.msra.mxu1 %v8700_v17  ;;  %v6486_v55 = vld [vmem:[%s9157_s5 + $0xc4] ss:$24 sps:$4 sm:$0xff]  }
 0x952   : > { %4660 = vmatprep.subr.bf16.mxu0 %v8426_v47  ;;  %4737 = vmatprep.subr.bf16.mxu1 %v8707_v28  ;;  %v9552_v47 = vld [vmem:[#allocation53_spill] sm:$0xff]  ;;  %v9561_v17 = vld [vmem:[#allocation14_spill] sm:$0xff]  ;;  %v9562_v28 = vld [vmem:[#allocation23_spill] sm:$0xff] }
 0x955   : > { %4661 = vmatpush1.bf16.msra.mxu0 %v8433_v1  ;;  %4738 = vmatpush1.bf16.msra.mxu1 %v8714_v16  ;;  %v6487_v1 = vld [vmem:[%s9157_s5 + $0xc0] ss:$24 sps:$4 sm:$0xff]   ;;  %v9563_v16 = vld [vmem:[#allocation27_spill] sm:$0xff] }
 0x956   : > { %4662 = vmatprep.subr.bf16.mxu0 %v8440_v43  ;;  %4739 = vmatprep.subr.bf16.mxu1 %v8721_v56  ;;  %v6488_v43 = vld [vmem:[%s9157_s5 + $0xf4] ss:$24 sps:$4 sm:$0xff]   ;;  %v9564_v56 = vld [vmem:[#allocation25_spill] sm:$0xff] }
 0x959   : > { %4663 = vmatpush1.bf16.msra.mxu0 %v8447_v5  ;;  %4740 = vmatpush1.bf16.msra.mxu1 %v8728_v9  ;;  %v9553_v5 = vld [vmem:[#allocation54_spill] sm:$0xff] }
 0x95a   : > { %5766 = vmatprep.subr.bf16.mxu0 %v9345_v27  ;;  %4828 = vmatprep.subr.bf16.mxu1 %v6478_v34  ;;  %v9565_v9 = vld [vmem:[#allocation42_spill] sm:$0xff]  ;;  %v9575_v34 = vld [vmem:[#allocation28_spill] sm:$0xff] }
 0x95c   : > { %4681 = vmatmul.mubr.bf16.vlgmr.msra.gmra.mrb[76].mxu0 %v4565_v42  ;;  %4758 = vmatmul.mubr.bf16.vlgmr.msra.gmra.mrb[140].mxu1 %v4724_v40 }
 0x95d   : > { %5767 = vmatpush3.bf16.msra.mxu0 %v8848_v29  ;;  %5782 = vmatprep.mubr.msk.bf16.mxu0 %vm6519_vm0, %v9345_v27  ;;  %v9568_v29 = vld [vmem:[#allocation45_spill] sm:$0xff] }
 0x95e   : > { %5768 = vmatprep.subr.bf16.mxu0 %v9345_v27  ;;  %4829 = vmatpush1.bf16.msra.mxu1 %v6479_v13 }
 0x95f   : > { %4830 = vmatprep.subr.bf16.mxu1 %v6480_v61  ;;  %4860 = vmatprep.mubr.bf16.mxu1 %v9347_v14 }
 0x961   : > { %5769 = vmatpush3.bf16.msra.mxu0 %v8860_v62  ;;  %v9569_v62 = vld [vmem:[#allocation46_spill] sm:$0xff] }
 0x962   : > { %5770 = vmatprep.subr.bf16.mxu0 %v9345_v27  ;;  %4831 = vmatpush1.bf16.msra.mxu1 %v6481_v21 }
 0x963   : > { %4832 = vmatprep.subr.bf16.mxu1 %v6482_v19  ;;  %v9576_v19 = vld [vmem:[#allocation29_spill] sm:$0xff] }
 0x965   : > { %5771 = vmatpush3.bf16.msra.mxu0 %v8869_v31  ;;  %v9570_v31 = vld [vmem:[#allocation47_spill] sm:$0xff] }
 0x966   : > { %5772 = vmatprep.subr.bf16.mxu0 %v9345_v27  ;;  %4833 = vmatpush1.bf16.msra.mxu1 %v6483_v37 }
 0x967   : > { %4834 = vmatprep.subr.bf16.mxu1 %v6484_v7 }
 0x969   : > { %5773 = vmatpush3.bf16.msra.mxu0 %v9551_v60 }
 0x96a   : > { %5774 = vmatprep.subr.bf16.mxu0 %v9345_v27  ;;  %4835 = vmatpush1.bf16.msra.mxu1 %v6485_v52 }
 0x96b   : > { %4836 = vmatprep.subr.bf16.mxu1 %v6486_v55  ;;  %v9577_v55 = vld [vmem:[#allocation40_spill] sm:$0xff] }
 0x96d   : > { %5775 = vmatpush3.bf16.msra.mxu0 %v9552_v47 }
 0x96e   : > { %5776 = vmatprep.subr.bf16.mxu0 %v9345_v27  ;;  %4837 = vmatpush1.bf16.msra.mxu1 %v6487_v1 }
 0x96f   : > { %4838 = vmatprep.subr.bf16.mxu1 %v6488_v43 }
 0x971   : > { %5777 = vmatpush3.bf16.msra.mxu0 %v9553_v5 }
 0x972   : > { %5778 = vmatprep.subr.bf16.mxu0 %v9345_v27  ;;  %4839 = vmatpush1.bf16.msra.mxu1 %v6489_v22  ;;  %v9578_v22 = vld [vmem:[#allocation41_spill] sm:$0xff] }
 0x973   : > { %4840 = vmatprep.subr.bf16.mxu1 %v6490_v4 }
 0x975   : > { %5779 = vmatpush3.bf16.msra.mxu0 %v9554_v30 }
 0x976   : > { %5780 = vmatprep.subr.bf16.mxu0 %v9345_v27  ;;  %4841 = vmatpush1.bf16.msra.mxu1 %v6491_v50  ;;  %v9559_v27 = vld [vmem:[#allocation4_spill] sm:$0xff] }
 0x977   : > { %4842 = vmatprep.subr.bf16.mxu1 %v9555_v10 }
 0x979   : > { %5781 = vmatpush3.bf16.msra.mxu0 %v9556_v26 }
 0x97a   : > { %4869 = vmatprep.subr.bf16.mxu0 %v9557_v0  ;;  %4843 = vmatpush1.bf16.msra.mxu1 %v9558_v35 }
 0x97b   : > { %4910 = vmatprep.subr.bf16.mxu1 %v6492_v39 }
 0x97c   : > { %5783 = vmatmul.mubr.bf16.vlgmr.msra.gmra.mrb[80].mxu0 %v4724_v40 }
 0x97d   : > { %4870 = vmatpush1.bf16.msra.mxu0 %v9559_v27  ;;  %4901 = vmatprep.mubr.bf16.mxu0 %v9347_v14 }
 0x97e   : > { %4871 = vmatprep.subr.bf16.mxu0 %v9560_v44 }
 0x981   : > { %4872 = vmatpush1.bf16.msra.mxu0 %v9561_v17 }
 0x982   : > { %4873 = vmatprep.subr.bf16.mxu0 %v9562_v28 }
 0x985   : > { %4874 = vmatpush1.bf16.msra.mxu0 %v9563_v16 }
 0x986   : > { %4875 = vmatprep.subr.bf16.mxu0 %v9564_v56 }
 0x989   : > { %4876 = vmatpush1.bf16.msra.mxu0 %v9565_v9 }
 0x98a   : > { %4877 = vmatprep.subr.bf16.mxu0 %v9566_v38 }
 0x98d   : > { %4878 = vmatpush1.bf16.msra.mxu0 %v9567_v58 }
 0x98e   : > { %4879 = vmatprep.subr.bf16.mxu0 %v9568_v29 }
 0x991   : > { %4880 = vmatpush1.bf16.msra.mxu0 %v9569_v62 }
 0x992   : > { %4881 = vmatprep.subr.bf16.mxu0 %v9570_v31 }
 0x995   : > { %4882 = vmatpush1.bf16.msra.mxu0 %v9571_v25 }
 0x996   : > { %4883 = vmatprep.subr.bf16.mxu0 %v9572_v49 }
 0x999   : > { %4884 = vmatpush1.bf16.msra.mxu0 %v9573_v20 }
 0xa0f   : > { %v4600_v2 = vpop.f32.mrb[72].mxu0  ;;  %v4641_v36 = vpop.f32.mrb[136].mxu1 }
 0xa10   : > { %v4602_v24 = vpop.f32.mrb[73].mxu0  ;;  %v4643_v32 = vpop.f32.mrb[137].mxu1  ;;  %v4689_v41 = vadd.f32 %v4600_v2, %v9574_v11  ;;  %v4691_v0 = vadd.f32 %v4641_v36, %v7989_v54 }
 0xa11   : > { %v4604_v23 = vpop.f32.mrb[74].mxu0  ;;  %v4644_v59 = vpop.f32.mrb[138].mxu1  ;;  %v4690_v52 = vadd.f32 %v4602_v24, %v9402_v33 }
 0xa12   : > { %v4605_v46 = vpop.f32.mrb[75].mxu0  ;;  %v4645_v53 = vpop.f32.mrb[139].mxu1  ;;  %v9579_v59 = vld [vmem:[#allocation10_spill] sm:$0xff] }
 0xa13   : > { %v4692_v15 = vadd.f32 %v4645_v53, %v9443_v48 }
 0xa15   : > { %v4695_v6 = vadd.f32 %v4692_v15, %v4689_v41 }
 0xa17   : > { %v5383_v57 = vmul.f32 -1.442695, %v4695_v6 }
 0xa19   : > { %6352 = vpow2.f32 %v5383_v57 }
 0xa23   : > { %v6353_v45 = vpop.eup %6352 }
 0xa24   : > { %v4699_v3 = vadd.f32 1.0, %v6353_v45 }
 0xa26   : > { %6354 = vrcp.f32 %v4699_v3 }
 0xa2f   : > { %v4682_v42 = vpop.f32.mrb[76].mxu0  ;;  %v4759_v40 = vpop.f32.mrb[140].mxu1 }
 0xa30   : > { %v4760_v13 = vadd.f32 %v4759_v40, %v9575_v34  ;;  %v4683_v61 = vpop.f32.mrb[77].mxu0  ;;  %v4761_v21 = vpop.f32.mrb[141].mxu1  ;;  %v6494_v42 = vld [vmem:[%s9157_s5 + $0x44] ss:$24 sps:$4 sm:$0xff]   ;;  %v6496_v40 = vld [vmem:[%s9157_s5 + $0x74] ss:$24 sps:$4 sm:$0xff]  }
 0xa31   : > { %v4762_v37 = vadd.f32 %v4761_v21, %v9576_v19  ;;  %v4684_v7 = vpop.f32.mrb[78].mxu0  ;;  %v4763_v60 = vpop.f32.mrb[142].mxu1  ;;  %v6497_v34 = vld [vmem:[%s9157_s5 + $0x70] ss:$24 sps:$4 sm:$0xff]   ;;  %v6500_v61 = vld [vmem:[%s9157_s5 + $0xd4] ss:$24 sps:$4 sm:$0xff]  }
 0xa32   : > { %v4806_v47 = vadd.f32 %v9577_v55, %v4760_v13  ;;  %v4693_v1 = vadd.f32 %v4684_v7, %v9404_v8  ;;  %v4686_v43 = vpop.f32.mrb[79].mxu0  ;;  %v4764_v5 = vpop.f32.mrb[143].mxu1  ;;  %v6499_v13 = vld [vmem:[%s9157_s5 + $0xa0] ss:$24 sps:$4 sm:$0xff]   ;;  %v6501_v21 = vld [vmem:[%s9157_s5 + $0xd0] ss:$24 sps:$4 sm:$0xff]  }
 0xa33   : > { %v4813_v4 = vadd.f32 %v9578_v22, %v4762_v37  ;;  %v4694_v30 = vadd.f32 %v4686_v43, %v7986_v12  ;;  %v6355_v50 = vpop.eup %6354  ;;  %v6502_v19 = vld [vmem:[%s9157_s5 + $0x104] ss:$24 sps:$4 sm:$0xff]   ;;  %v6503_v37 = vld [vmem:[%s9157_s5 + $0x100] ss:$24 sps:$4 sm:$0xff]   ;;  %v6504_v7 = vld [vmem:[%s9157_s5 + $0x134] ss:$24 sps:$4 sm:$0xff]  }
 0xa34   : > { %v5386_v10 = vmul.f32 -1.442695, %v4806_v47  ;;  %v4702_v26 = vadd.f32 %v4693_v1, %v4690_v52  ;;  %v6505_v60 = vld [vmem:[%s9157_s5 + $0x130] ss:$24 sps:$4 sm:$0xff]   ;;  %v6506_v52 = vld [vmem:[%s9157_s5 + $0x164] ss:$24 sps:$4 sm:$0xff]  }
 0xa35   : > { %v4709_v35 = vmul.f32 %v6355_v50, %v4694_v30  ;;  %v5387_v44 = vmul.f32 -1.442695, %v4813_v4  ;;  %v6507_v55 = vld [vmem:[%s9157_s5 + $0x160] ss:$24 sps:$4 sm:$0xff]  }
 0xa36   : > { %6356 = vpow2.f32 %v5386_v10  ;;  %v5384_v39 = vmul.f32 -1.442695, %v4702_v26 }
 0xa37   : > { %v4710_v27 = vadd.f32 %v4709_v35, %v4691_v0 }
 0xa38   : > { %6358 = vpow2.f32 %v5384_v39 }
 0xa39   : > { %6360 = vpow2.f32 %v5387_v44 }
 0xa40   : > { %v6357_v17 = vpop.eup %6356 }
 0xa41   : > { %v4810_v16 = vadd.f32 1.0, %v6357_v17 }
 0xa42   : > { %v6359_v28 = vpop.eup %6358 }
 0xa43   : > { %v4706_v56 = vadd.f32 1.0, %v6359_v28  ;;  %v6361_v9 = vpop.eup %6360 }
 0xa44   : > { %v4817_v38 = vadd.f32 1.0, %v6361_v9 }
 0xa45   : > { %6362 = vrcp.f32 %v4706_v56 }
 0xa46   : > { %6364 = vtanh.f32 %v4710_v27 }
 0xa47   : > { %6366 = vrcp.f32 %v4810_v16 }
 0xa48   : > { %6368 = vrcp.f32 %v4817_v38 }
 0xa4f   : > { %v6363_v58 = vpop.eup %6362  ;;  %v4800_v29 = vpop.f32.mrb[80].mxu0 }
 0xa50   : > { %v6365_v62 = vpop.eup %6364  ;;  %v4801_v31 = vadd.f32 %v4800_v29, %v7701_v51  ;;  %v5784_v25 = vpop.f32.mrb[81].mxu0  ;;  %v4712_v49 = vsub.f32 1.0, %v6363_v58  ;;  %v4714_v23 = vmul.f32 %v6363_v58, %v8950_v63  ;;  %v6493_v63 = vld [vmem:[%s9157_s5 + $0x10] ss:$24 sps:$4 sm:$0xff]  }
 0xa51   : > { %v6367_v20 = vpop.eup %6366  ;;  %v4803_v2 = vpop.f32.mrb[82].mxu0 }
 0xa52   : > { %v4820_v36 = vmul.f32 %v6367_v20, %v4801_v31  ;;  %v5785_v24 = vpop.f32.mrb[83].mxu0  ;;  %v4713_v32 = vmul.f32 %v6365_v62, %v4712_v49  ;;  %v6369_v41 = vpop.eup %6368 }
 0xa53   : > { %v4823_v15 = vsub.f32 1.0, %v6369_v41  ;;  %v4825_v57 = vmul.f32 %v6369_v41, %v8955_v18  ;;  %v6495_v18 = vld [vmem:[%s9157_s5 + $0x40] ss:$24 sps:$4 sm:$0xff]  }
 0xa54   : > { %v4821_v46 = vadd.f32 %v4820_v36, %v9579_v59  ;;  %v9089_v53 = vadd.f32 %v4714_v23, %v4713_v32 }
 0xa56   : > { %6370 = vtanh.f32 %v4821_v46  ;;  %5385 = vst [vmem:[%s6581_s15 + $0x30] sm:$0xff] %v9089_v53 }
 0xa60   : > { %v6371_v51 = vpop.eup %6370 }
 0xa61   : > { %v4824_v6 = vmul.f32 %v6371_v51, %v4823_v15 }
 0xa63   : > { %v4826_v45 = vadd.f32 %v4825_v57, %v4824_v6 }
 0xa65   : > { %v4827_v3 = vpack.c.bf16 %v9089_v53, %v4826_v45  ;;  %4980 = vst [vmem:[#allocation3] sm:$0xff] %v4826_v45 }
 0xa67   : > { %4861 = vmatmul.mubr.bf16.vlgmr.msra.gmra.mrb[144].mxu1 %v4827_v3  ;;  %4902 = vmatmul.mubr.bf16.vlgmr.msra.gmra.mrb[84].mxu0 %v4827_v3 }
 0xa68   : > { %4911 = vmatpush1.bf16.msra.mxu1 %v6493_v63  ;;  %4942 = vmatprep.mubr.bf16.mxu1 %v9347_v14  ;;  %v6498_v14 = vld [vmem:[%s9157_s5 + $0xa4] ss:$24 sps:$4 sm:$0xff]  }
 0xa69   : > { %4912 = vmatprep.subr.bf16.mxu1 %v6494_v42 }
 0xa6c   : > { %4913 = vmatpush1.bf16.msra.mxu1 %v6495_v18 }
 0xa6d   : > { %4914 = vmatprep.subr.bf16.mxu1 %v6496_v40 }
 0xa70   : > { %4915 = vmatpush1.bf16.msra.mxu1 %v6497_v34 }
 0xa71   : > { %4916 = vmatprep.subr.bf16.mxu1 %v6498_v14 }
 0xa74   : > { %4917 = vmatpush1.bf16.msra.mxu1 %v6499_v13 }
 0xa75   : > { %4918 = vmatprep.subr.bf16.mxu1 %v6500_v61 }
 0xa78   : > { %4919 = vmatpush1.bf16.msra.mxu1 %v6501_v21 }
 0xa79   : > { %4920 = vmatprep.subr.bf16.mxu1 %v6502_v19 }
 0xa7c   : > { %4921 = vmatpush1.bf16.msra.mxu1 %v6503_v37 }
 0xa7d   : > { %4922 = vmatprep.subr.bf16.mxu1 %v6504_v7 }
 0xa80   : > { %4923 = vmatpush1.bf16.msra.mxu1 %v6505_v60 }
 0xa81   : > { %4924 = vmatprep.subr.bf16.mxu1 %v6506_v52 }
 0xa84   : > { %4925 = vmatpush1.bf16.msra.mxu1 %v6507_v55 }
 0xa87   : > { %4943 = vmatmul.mubr.bf16.vlgmr.msra.gmra.mrb[148].mxu1 %v4827_v3 }
 0xb3a   : > { %v4862_v47 = vpop.f32.mrb[144].mxu1  ;;  %v4903_v1 = vpop.f32.mrb[84].mxu0 }
 0xb3b   : > { %v4864_v43 = vpop.f32.mrb[145].mxu1  ;;  %v4905_v5 = vpop.f32.mrb[85].mxu0  ;;  %v4951_v10 = vadd.f32 %v4862_v47, %v9574_v11 }
 0xb3c   : > { %v4866_v22 = vpop.f32.mrb[146].mxu1  ;;  %v4906_v4 = vpop.f32.mrb[86].mxu0  ;;  %v4952_v16 = vadd.f32 %v4864_v43, %v9402_v33 }
 0xb3d   : > { %v4867_v30 = vpop.f32.mrb[147].mxu1  ;;  %v4907_v50 = vpop.f32.mrb[87].mxu0 }
 0xb3e   : > { %v4954_v26 = vadd.f32 %v4907_v50, %v9443_v48  ;;  %v4953_v48 = vadd.f32 %v4903_v1, %v7989_v54 }
 0xb40   : > { %v4957_v0 = vadd.f32 %v4954_v26, %v4951_v10 }
 0xb42   : > { %v5388_v35 = vmul.f32 -1.442695, %v4957_v0 }
 0xb44   : > { %6372 = vpow2.f32 %v5388_v35 }
 0xb4e   : > { %v6373_v39 = vpop.eup %6372 }
 0xb4f   : > { %v4961_v27 = vadd.f32 1.0, %v6373_v39 }
 0xb51   : > { %6374 = vrcp.f32 %v4961_v27 }
 0xb5a   : > { %v4944_v44 = vpop.f32.mrb[148].mxu1 }
 0xb5b   : > { %v4945_v17 = vpop.f32.mrb[149].mxu1  ;;  %v6375_v58 = vpop.eup %6374 }
 0xb5c   : > { %v4946_v28 = vpop.f32.mrb[150].mxu1 }
 0xb5d   : > { %v4955_v56 = vadd.f32 %v4946_v28, %v9404_v8  ;;  %v4948_v9 = vpop.f32.mrb[151].mxu1 }
 0xb5e   : > { %v4956_v38 = vadd.f32 %v4948_v9, %v7986_v12 }
 0xb5f   : > { %v4964_v11 = vadd.f32 %v4955_v56, %v4952_v16 }
 0xb60   : > { %v4971_v29 = vmul.f32 %v6375_v58, %v4956_v38 }
 0xb61   : > { %v5389_v62 = vmul.f32 -1.442695, %v4964_v11 }
 0xb62   : > { %v4972_v31 = vadd.f32 %v4971_v29, %v4953_v48 }
 0xb63   : > { %6376 = vpow2.f32 %v5389_v62 }
 0xb6d   : > { %v6377_v25 = vpop.eup %6376 }
 0xb6e   : > { %v4968_v49 = vadd.f32 1.0, %v6377_v25 }
 0xb70   : > { %6378 = vrcp.f32 %v4968_v49 }
 0xb71   : > { %6380 = vtanh.f32 %v4972_v31 }
 0xb7a   : > { %v6379_v20 = vpop.eup %6378 }
 0xb7b   : > { %v4974_v33 = vsub.f32 1.0, %v6379_v20  ;;  %v6381_v2 = vpop.eup %6380  ;;  %v4976_v8 = vmul.f32 %v6379_v20, %v9089_v53 }
 0xb7d   : > { %v4975_v36 = vmul.f32 %v6381_v2, %v4974_v33 }
 0xb7f   : > { %v4977_v12 = vadd.f32 %v4976_v8, %v4975_v36 }
 0xb81   : > { %5390 = vst [vmem:[%s6581_s15 + $0x38] sm:$0xff] %v4977_v12  ;;  %4981 = vst [vmem:[#allocation3 + $0x8] sm:$0xff] %v4977_v12 }
 0xb82 PF: > { %s18_s27 = sadd.s32 1, %s6514_s27  }
 0xb83   : > { %p15_p5 = scmp.ge.s32.totalorder %s18_s27, 4  }
 0xb85   :  { %17 = sbr.rel (!%p15_p5) target bundleno = 1 (0x1), region = 101 }

</bundles_post_ra>
